<compile_context>
chip_gen: v6e
topology: v6e:2x2x1
jax: 0.10.0
libtpu: 0.0.40
codegen_flags: <defaults>
</compile_context>

<pallas_src>
import functools
import math

import jax
import jax.numpy as jnp
from jax import lax
from jax.experimental import pallas as pl
from jax.experimental.pallas import tpu as pltpu


# ---------------------------------------------------------------------------
# Model dimensions
# ---------------------------------------------------------------------------
IMG = 16                 # spatial size
C_IN = 3                 # input channels (NCHW)
PATCH = 4                # patch size -> 16 patches
EMBED = 64               # backbone embed dim
HEADS = 4
HEAD_DIM = EMBED // HEADS
MLP = 128
DEPTH = 2
FEAT = 1000              # pretrained(x) output dim (Linear(1000, ...) contract)
NUM_CLASSES = 257
NUM_CLASSES_PAD = 384    # 3 * 128 -> lane-dense head output, sliced to 257
NUM_PATCHES = (IMG // PATCH) ** 2
SEQ = NUM_PATCHES + 1    # +CLS token
PATCH_VEC = C_IN * PATCH * PATCH
EPS = 1e-6


# ---------------------------------------------------------------------------
# In-kernel helpers
# ---------------------------------------------------------------------------
def _gelu(x):
    # tanh-approximate GELU (EUP-friendly on TPU).
    c = math.sqrt(2.0 / math.pi)
    return 0.5 * x * (1.0 + jnp.tanh(c * (x + 0.044715 * x * x * x)))


def _ln(x, gamma, beta, eps):
    mu = jnp.mean(x, axis=-1, keepdims=True)
    xc = x - mu
    var = jnp.mean(xc * xc, axis=-1, keepdims=True)
    return xc * lax.rsqrt(var + eps) * gamma + beta


# ---------------------------------------------------------------------------
# One fused kernel: patch embed -> DEPTH transformer blocks -> final LN (CLS)
#                   -> folded (w_fc @ w_head) linear -> ReLU
# One grid step per batch element; all activations stay in VMEM/vregs.
# ---------------------------------------------------------------------------
def _fused_vit_kernel(p_ref, wpe_ref, bpe_ref, cls_ref, pos_ref,
                      ln1g_ref, ln1b_ref, wqkv_ref, bqkv_ref, wo_ref, bo_ref,
                      ln2g_ref, ln2b_ref, w1_ref, b1_ref, w2_ref, b2_ref,
                      lnfg_ref, lnfb_ref, whead_ref, bhead_ref,
                      o_ref, *, scale, eps):
    # --- patch embed + CLS token + positional embedding ---------------------
    patches = p_ref[0].astype(jnp.float32)                       # [NP, CPP]
    tok = jnp.dot(patches, wpe_ref[...],
                  preferred_element_type=jnp.float32) + bpe_ref[...]
    h = jnp.concatenate([cls_ref[...], tok], axis=0) + pos_ref[...]   # [S, D]

    # --- transformer blocks (static unroll over depth) ----------------------
    for d in range(DEPTH):
        hn = _ln(h, ln1g_ref[d], ln1b_ref[d], eps)
        qkv = jnp.dot(hn, wqkv_ref[d],
                      preferred_element_type=jnp.float32) + bqkv_ref[d]  # [S,3D]

        head_outs = []
        for hh in range(HEADS):                   # static unrolled head loop
            lo = hh * HEAD_DIM
            q = qkv[:, lo:lo + HEAD_DIM]                         # [S, dh]
            k = qkv[:, EMBED + lo:EMBED + lo + HEAD_DIM]
            v = qkv[:, 2 * EMBED + lo:2 * EMBED + lo + HEAD_DIM]
            # contract last dims of q and k directly (no explicit transpose)
            s = lax.dot_general(q, k, (((1,), (1,)), ((), ())),
                                preferred_element_type=jnp.float32) * scale
            s = s - jnp.max(s, axis=-1, keepdims=True)
            p = jnp.exp(s)
            p = p * pl.reciprocal(jnp.sum(p, axis=-1, keepdims=True),
                                  approx=True)
            head_outs.append(jnp.dot(p, v, preferred_element_type=jnp.float32))
        attn = jnp.concatenate(head_outs, axis=-1)               # [S, D]

        h = h + jnp.dot(attn, wo_ref[d],
                        preferred_element_type=jnp.float32) + bo_ref[d]

        hn2 = _ln(h, ln2g_ref[d], ln2b_ref[d], eps)
        m = _gelu(jnp.dot(hn2, w1_ref[d],
                          preferred_element_type=jnp.float32) + b1_ref[d])
        h = h + jnp.dot(m, w2_ref[d],
                        preferred_element_type=jnp.float32) + b2_ref[d]

    # --- final LN on CLS row + folded head linear + ReLU ---------------------
    cls_row = _ln(h[0:1, :], lnfg_ref[...], lnfb_ref[...], eps)   # [1, D]
    y = jnp.dot(cls_row, whead_ref[...],
                preferred_element_type=jnp.float32) + bhead_ref[...]  # [1, PAD]
    # new_head ReLU followed by outer F.relu: ReLU is idempotent -> one max.
    o_ref[0] = jnp.maximum(y, 0.0).astype(o_ref.dtype)


def fused_forward(patches, params):
    B = patches.shape[0]
    kernel = functools.partial(_fused_vit_kernel,
                               scale=1.0 / math.sqrt(HEAD_DIM), eps=EPS)

    def const2(shape):
        return pl.BlockSpec(shape, lambda i: (0, 0))

    def const3(shape):
        return pl.BlockSpec(shape, lambda i: (0, 0, 0))

    out = pl.pallas_call(
        kernel,
        out_shape=jax.ShapeDtypeStruct((B, 1, NUM_CLASSES_PAD), jnp.float32),
        grid=(B,),
        in_specs=[
            pl.BlockSpec((1, NUM_PATCHES, PATCH_VEC), lambda i: (i, 0, 0)),
            const2((PATCH_VEC, EMBED)),                           # w_pe
            const2((1, EMBED)),                                   # b_pe
            const2((1, EMBED)),                                   # cls
            const2((SEQ, EMBED)),                                 # pos
            const3((DEPTH, 1, EMBED)),                            # ln1_g
            const3((DEPTH, 1, EMBED)),                            # ln1_b
            const3((DEPTH, EMBED, 3 * EMBED)),                    # w_qkv
            const3((DEPTH, 1, 3 * EMBED)),                        # b_qkv
            const3((DEPTH, EMBED, EMBED)),                        # w_o
            const3((DEPTH, 1, EMBED)),                            # b_o
            const3((DEPTH, 1, EMBED)),                            # ln2_g
            const3((DEPTH, 1, EMBED)),                            # ln2_b
            const3((DEPTH, EMBED, MLP)),                          # w1
            const3((DEPTH, 1, MLP)),                              # b1
            const3((DEPTH, MLP, EMBED)),                          # w2
            const3((DEPTH, 1, EMBED)),                            # b2
            const2((1, EMBED)),                                   # ln_f_g
            const2((1, EMBED)),                                   # ln_f_b
            const2((EMBED, NUM_CLASSES_PAD)),                     # w_fold
            const2((1, NUM_CLASSES_PAD)),                         # b_fold
        ],
        out_specs=pl.BlockSpec((1, 1, NUM_CLASSES_PAD), lambda i: (i, 0, 0)),
        compiler_params=pltpu.CompilerParams(
            dimension_semantics=("parallel",)),
    )(patches,
      params["w_pe"], params["b_pe"], params["cls"], params["pos"],
      params["ln1_g"], params["ln1_b"], params["w_qkv"], params["b_qkv"],
      params["w_o"], params["b_o"], params["ln2_g"], params["ln2_b"],
      params["w1"], params["b1"], params["w2"], params["b2"],
      params["ln_f_g"], params["ln_f_b"], params["w_fold"], params["b_fold"])

    return out.reshape(B, NUM_CLASSES_PAD)[:, :NUM_CLASSES]


# ---------------------------------------------------------------------------
# Parameters (synthetic, deterministic) + weight folding
# ---------------------------------------------------------------------------
def init_params(key):
    def nrm(k, shape, scale=0.02):
        return scale * jax.random.normal(k, shape, dtype=jnp.float32)

    ks = jax.random.split(key, 8 + DEPTH)
    p = {
        "w_pe": nrm(ks[0], (PATCH_VEC, EMBED)),
        "b_pe": jnp.zeros((1, EMBED), jnp.float32),
        "cls": nrm(ks[1], (1, EMBED)),
        "pos": nrm(ks[2], (SEQ, EMBED)),
        "ln_f_g": jnp.ones((1, EMBED), jnp.float32),
        "ln_f_b": jnp.zeros((1, EMBED), jnp.float32),
    }

    # pretrained feature projection (EMBED -> 1000) and ModifiedVit.new_head
    # (Linear(1000, classNumber)).  No nonlinearity in between -> fold once.
    w_fc = nrm(ks[3], (EMBED, FEAT))
    b_fc = jnp.zeros((FEAT,), jnp.float32)
    w_head = nrm(ks[4], (FEAT, NUM_CLASSES))
    b_head = jnp.zeros((NUM_CLASSES,), jnp.float32)
    w_fold = w_fc @ w_head                                  # [EMBED, 257]
    b_fold = b_fc @ w_head + b_head                         # [257]
    pad = NUM_CLASSES_PAD - NUM_CLASSES
    p["w_fold"] = jnp.pad(w_fold, ((0, 0), (0, pad)))       # lane-dense 384
    p["b_fold"] = jnp.pad(b_fold, ((0, pad),)).reshape(1, NUM_CLASSES_PAD)

    # per-block weights stacked along leading DEPTH axis (one ref per kind)
    w_qkv, w_o, w1, w2 = [], [], [], []
    for d in range(DEPTH):
        bk = jax.random.split(ks[8 + d], 4)
        w_qkv.append(nrm(bk[0], (EMBED, 3 * EMBED)))
        w_o.append(nrm(bk[1], (EMBED, EMBED)))
        w1.append(nrm(bk[2], (EMBED, MLP)))
        w2.append(nrm(bk[3], (MLP, EMBED)))
    p["w_qkv"] = jnp.stack(w_qkv)                           # [D, E, 3E]
    p["b_qkv"] = jnp.zeros((DEPTH, 1, 3 * EMBED), jnp.float32)
    p["w_o"] = jnp.stack(w_o)                               # [D, E, E]
    p["b_o"] = jnp.zeros((DEPTH, 1, EMBED), jnp.float32)
    p["ln1_g"] = jnp.ones((DEPTH, 1, EMBED), jnp.float32)
    p["ln1_b"] = jnp.zeros((DEPTH, 1, EMBED), jnp.float32)
    p["ln2_g"] = jnp.ones((DEPTH, 1, EMBED), jnp.float32)
    p["ln2_b"] = jnp.zeros((DEPTH, 1, EMBED), jnp.float32)
    p["w1"] = jnp.stack(w1)                                 # [D, E, MLP]
    p["b1"] = jnp.zeros((DEPTH, 1, MLP), jnp.float32)
    p["w2"] = jnp.stack(w2)                                 # [D, MLP, E]
    p["b2"] = jnp.zeros((DEPTH, 1, EMBED), jnp.float32)
    return p


# ---------------------------------------------------------------------------
# Forward pass
# ---------------------------------------------------------------------------
def modified_vit_forward(x_nchw, params):
    """x_nchw: [B, 3, 16, 16] (NCHW, PyTorch conv layout) -> [B, 257]."""
    B = x_nchw.shape[0]

    # patch extraction (pure reshape/transpose glue; Conv2d(k=4,s=4) as matmul)
    xp = x_nchw.reshape(B, C_IN, IMG // PATCH, PATCH, IMG // PATCH, PATCH)
    xp = xp.transpose(0, 2, 4, 1, 3, 5)                 # [B, Hp, Wp, C, P, P]
    patches = xp.reshape(B, NUM_PATCHES, PATCH_VEC)

    # everything else is ONE fused Pallas kernel
    return fused_forward(patches, params)               # [B, 257]


if __name__ == "__main__":
    key = jax.random.PRNGKey(0)
    k_param, k_x = jax.random.split(key)
    params = init_params(k_param)
    x = jax.random.normal(k_x, (2, C_IN, IMG, IMG), dtype=jnp.float32)  # NCHW

    fwd = jax.jit(lambda xi: modified_vit_forward(xi, params))
    y = fwd(x)
    jax.block_until_ready(y)

    assert y.shape == (2, NUM_CLASSES), y.shape
    assert bool(jnp.all(y >= 0.0))          # ReLU output is non-negative
    assert bool(jnp.all(jnp.isfinite(y)))
    print("KERNEL_OK")
</pallas_src>

<mosaic_0001>
module attributes {stable_mosaic.version = 11 : i64} {
  func.func @_fused_vit_kernel(%arg0: i32, %arg1: memref<1x16x48xf32, #tpu.memory_space<vmem>>, %arg2: memref<48x64xf32, #tpu.memory_space<vmem>>, %arg3: memref<1x64xf32, #tpu.memory_space<vmem>>, %arg4: memref<1x64xf32, #tpu.memory_space<vmem>>, %arg5: memref<17x64xf32, #tpu.memory_space<vmem>>, %arg6: memref<2x1x64xf32, #tpu.memory_space<vmem>>, %arg7: memref<2x1x64xf32, #tpu.memory_space<vmem>>, %arg8: memref<2x64x192xf32, #tpu.memory_space<vmem>>, %arg9: memref<2x1x192xf32, #tpu.memory_space<vmem>>, %arg10: memref<2x64x64xf32, #tpu.memory_space<vmem>>, %arg11: memref<2x1x64xf32, #tpu.memory_space<vmem>>, %arg12: memref<2x1x64xf32, #tpu.memory_space<vmem>>, %arg13: memref<2x1x64xf32, #tpu.memory_space<vmem>>, %arg14: memref<2x64x128xf32, #tpu.memory_space<vmem>>, %arg15: memref<2x1x128xf32, #tpu.memory_space<vmem>>, %arg16: memref<2x128x64xf32, #tpu.memory_space<vmem>>, %arg17: memref<2x1x64xf32, #tpu.memory_space<vmem>>, %arg18: memref<1x64xf32, #tpu.memory_space<vmem>>, %arg19: memref<1x64xf32, #tpu.memory_space<vmem>>, %arg20: memref<64x384xf32, #tpu.memory_space<vmem>>, %arg21: memref<1x384xf32, #tpu.memory_space<vmem>>, %arg22: memref<1x1x384xf32, #tpu.memory_space<vmem>>) attributes {dimension_semantics = [#tpu.dimension_semantics<parallel>], iteration_bounds = array<i64: 2>, scalar_prefetch = 0 : i64, scratch_operands = 0 : i64, tpu.core_type = #tpu.core_type<tc>, window_params = [{transform_indices = @transform_0, window_bounds = array<i64: 1, 16, 48>}, {pipeline_mode = #tpu.pipeline_mode<synchronous>, transform_indices = @transform_1, window_bounds = array<i64: 48, 64>}, {pipeline_mode = #tpu.pipeline_mode<synchronous>, transform_indices = @transform_2, window_bounds = array<i64: 1, 64>}, {pipeline_mode = #tpu.pipeline_mode<synchronous>, transform_indices = @transform_3, window_bounds = array<i64: 1, 64>}, {pipeline_mode = #tpu.pipeline_mode<synchronous>, transform_indices = @transform_4, window_bounds = array<i64: 17, 64>}, {pipeline_mode = #tpu.pipeline_mode<synchronous>, transform_indices = @transform_5, window_bounds = array<i64: 2, 1, 64>}, {pipeline_mode = #tpu.pipeline_mode<synchronous>, transform_indices = @transform_6, window_bounds = array<i64: 2, 1, 64>}, {pipeline_mode = #tpu.pipeline_mode<synchronous>, transform_indices = @transform_7, window_bounds = array<i64: 2, 64, 192>}, {pipeline_mode = #tpu.pipeline_mode<synchronous>, transform_indices = @transform_8, window_bounds = array<i64: 2, 1, 192>}, {pipeline_mode = #tpu.pipeline_mode<synchronous>, transform_indices = @transform_9, window_bounds = array<i64: 2, 64, 64>}, {pipeline_mode = #tpu.pipeline_mode<synchronous>, transform_indices = @transform_10, window_bounds = array<i64: 2, 1, 64>}, {pipeline_mode = #tpu.pipeline_mode<synchronous>, transform_indices = @transform_11, window_bounds = array<i64: 2, 1, 64>}, {pipeline_mode = #tpu.pipeline_mode<synchronous>, transform_indices = @transform_12, window_bounds = array<i64: 2, 1, 64>}, {pipeline_mode = #tpu.pipeline_mode<synchronous>, transform_indices = @transform_13, window_bounds = array<i64: 2, 64, 128>}, {pipeline_mode = #tpu.pipeline_mode<synchronous>, transform_indices = @transform_14, window_bounds = array<i64: 2, 1, 128>}, {pipeline_mode = #tpu.pipeline_mode<synchronous>, transform_indices = @transform_15, window_bounds = array<i64: 2, 128, 64>}, {pipeline_mode = #tpu.pipeline_mode<synchronous>, transform_indices = @transform_16, window_bounds = array<i64: 2, 1, 64>}, {pipeline_mode = #tpu.pipeline_mode<synchronous>, transform_indices = @transform_17, window_bounds = array<i64: 1, 64>}, {pipeline_mode = #tpu.pipeline_mode<synchronous>, transform_indices = @transform_18, window_bounds = array<i64: 1, 64>}, {pipeline_mode = #tpu.pipeline_mode<synchronous>, transform_indices = @transform_19, window_bounds = array<i64: 64, 384>}, {pipeline_mode = #tpu.pipeline_mode<synchronous>, transform_indices = @transform_20, window_bounds = array<i64: 1, 384>}, {transform_indices = @transform_21, window_bounds = array<i64: 1, 1, 384>}]} {
    %c0 = arith.constant 0 : index
    %c0_0 = arith.constant 0 : index
    %c0_1 = arith.constant 0 : index
    %0 = vector.load %arg1[%c0, %c0_0, %c0_1] : memref<1x16x48xf32, #tpu.memory_space<vmem>>, vector<1x16x48xf32>
    %1 = vector.shape_cast %0 : vector<1x16x48xf32> to vector<16x48xf32>
    %c0_2 = arith.constant 0 : index
    %c0_3 = arith.constant 0 : index
    %2 = vector.load %arg2[%c0_2, %c0_3] : memref<48x64xf32, #tpu.memory_space<vmem>>, vector<48x64xf32>
    %cst = arith.constant dense<0.000000e+00> : vector<16x64xf32>
    %3 = tpu.matmul %1, %2, %cst {dimension_numbers = #tpu.dot_dimension_numbers<[1], [0], [0], [1], [0, 0, 1, 1], [], []>} : vector<16x48xf32>, vector<48x64xf32>, vector<16x64xf32> -> vector<16x64xf32>
    %c0_4 = arith.constant 0 : index
    %c0_5 = arith.constant 0 : index
    %4 = vector.load %arg3[%c0_4, %c0_5] : memref<1x64xf32, #tpu.memory_space<vmem>>, vector<1x64xf32>
    %5 = vector.broadcast %4 : vector<1x64xf32> to vector<16x64xf32>
    %6 = arith.addf %3, %5 : vector<16x64xf32>
    %c0_6 = arith.constant 0 : index
    %c0_7 = arith.constant 0 : index
    %7 = vector.load %arg4[%c0_6, %c0_7] : memref<1x64xf32, #tpu.memory_space<vmem>>, vector<1x64xf32>
    %8 = tpu.concatenate %7, %6 in 0 : vector<1x64xf32>, vector<16x64xf32> -> vector<17x64xf32>
    %c0_8 = arith.constant 0 : index
    %c0_9 = arith.constant 0 : index
    %9 = vector.load %arg5[%c0_8, %c0_9] : memref<17x64xf32, #tpu.memory_space<vmem>>, vector<17x64xf32>
    %10 = arith.addf %8, %9 : vector<17x64xf32>
    %c0_10 = arith.constant 0 : index
    %c0_11 = arith.constant 0 : index
    %c0_12 = arith.constant 0 : index
    %11 = vector.load %arg6[%c0_10, %c0_11, %c0_12] : memref<2x1x64xf32, #tpu.memory_space<vmem>>, vector<1x1x64xf32>
    %12 = vector.shape_cast %11 : vector<1x1x64xf32> to vector<1x64xf32>
    %c0_13 = arith.constant 0 : index
    %c0_14 = arith.constant 0 : index
    %c0_15 = arith.constant 0 : index
    %13 = vector.load %arg7[%c0_13, %c0_14, %c0_15] : memref<2x1x64xf32, #tpu.memory_space<vmem>>, vector<1x1x64xf32>
    %14 = vector.shape_cast %13 : vector<1x1x64xf32> to vector<1x64xf32>
    %cst_16 = arith.constant dense<0.000000e+00> : vector<17xf32>
    %15 = vector.multi_reduction <add>, %10, %cst_16 [1] : vector<17x64xf32> to vector<17xf32>
    %16 = vector.shape_cast %15 : vector<17xf32> to vector<17x1xf32>
    %cst_17 = arith.constant 6.400000e+01 : f32
    %17 = vector.broadcast %cst_17 : f32 to vector<17x1xf32>
    %18 = arith.divf %16, %17 : vector<17x1xf32>
    %19 = vector.broadcast %18 : vector<17x1xf32> to vector<17x64xf32>
    %20 = arith.subf %10, %19 : vector<17x64xf32>
    %21 = arith.mulf %20, %20 : vector<17x64xf32>
    %cst_18 = arith.constant dense<0.000000e+00> : vector<17xf32>
    %22 = vector.multi_reduction <add>, %21, %cst_18 [1] : vector<17x64xf32> to vector<17xf32>
    %23 = vector.shape_cast %22 : vector<17xf32> to vector<17x1xf32>
    %cst_19 = arith.constant 6.400000e+01 : f32
    %24 = vector.broadcast %cst_19 : f32 to vector<17x1xf32>
    %25 = arith.divf %23, %24 : vector<17x1xf32>
    %cst_20 = arith.constant 9.99999997E-7 : f32
    %26 = vector.broadcast %cst_20 : f32 to vector<17x1xf32>
    %27 = arith.addf %25, %26 : vector<17x1xf32>
    %28 = math.rsqrt %27 : vector<17x1xf32>
    %29 = vector.broadcast %28 : vector<17x1xf32> to vector<17x64xf32>
    %30 = arith.mulf %20, %29 : vector<17x64xf32>
    %31 = vector.broadcast %12 : vector<1x64xf32> to vector<17x64xf32>
    %32 = arith.mulf %30, %31 : vector<17x64xf32>
    %33 = vector.broadcast %14 : vector<1x64xf32> to vector<17x64xf32>
    %34 = arith.addf %32, %33 : vector<17x64xf32>
    %c0_21 = arith.constant 0 : index
    %c0_22 = arith.constant 0 : index
    %c0_23 = arith.constant 0 : index
    %35 = vector.load %arg8[%c0_21, %c0_22, %c0_23] : memref<2x64x192xf32, #tpu.memory_space<vmem>>, vector<1x64x192xf32>
    %36 = vector.shape_cast %35 : vector<1x64x192xf32> to vector<64x192xf32>
    %cst_24 = arith.constant dense<0.000000e+00> : vector<17x192xf32>
    %37 = tpu.matmul %34, %36, %cst_24 {dimension_numbers = #tpu.dot_dimension_numbers<[1], [0], [0], [1], [0, 0, 1, 1], [], []>} : vector<17x64xf32>, vector<64x192xf32>, vector<17x192xf32> -> vector<17x192xf32>
    %c0_25 = arith.constant 0 : index
    %c0_26 = arith.constant 0 : index
    %c0_27 = arith.constant 0 : index
    %38 = vector.load %arg9[%c0_25, %c0_26, %c0_27] : memref<2x1x192xf32, #tpu.memory_space<vmem>>, vector<1x1x192xf32>
    %39 = vector.shape_cast %38 : vector<1x1x192xf32> to vector<1x192xf32>
    %40 = vector.broadcast %39 : vector<1x192xf32> to vector<17x192xf32>
    %41 = arith.addf %37, %40 : vector<17x192xf32>
    %42 = vector.extract_strided_slice %41 {offsets = [0, 0], sizes = [17, 16], strides = [1, 1]} : vector<17x192xf32> to vector<17x16xf32>
    %43 = vector.extract_strided_slice %41 {offsets = [0, 64], sizes = [17, 16], strides = [1, 1]} : vector<17x192xf32> to vector<17x16xf32>
    %44 = vector.extract_strided_slice %41 {offsets = [0, 128], sizes = [17, 16], strides = [1, 1]} : vector<17x192xf32> to vector<17x16xf32>
    %cst_28 = arith.constant dense<0.000000e+00> : vector<17x17xf32>
    %45 = tpu.matmul %42, %43, %cst_28 {dimension_numbers = #tpu.dot_dimension_numbers<[1], [1], [0], [0], [0, 0, 1, 0], [], []>} : vector<17x16xf32>, vector<17x16xf32>, vector<17x17xf32> -> vector<17x17xf32>
    %cst_29 = arith.constant 2.500000e-01 : f32
    %46 = vector.broadcast %cst_29 : f32 to vector<17x17xf32>
    %47 = arith.mulf %45, %46 : vector<17x17xf32>
    %cst_30 = arith.constant dense<0xFF800000> : vector<17xf32>
    %48 = vector.multi_reduction <maximumf>, %47, %cst_30 [1] : vector<17x17xf32> to vector<17xf32>
    %49 = vector.shape_cast %48 : vector<17xf32> to vector<17x1xf32>
    %50 = vector.broadcast %49 : vector<17x1xf32> to vector<17x17xf32>
    %51 = arith.subf %47, %50 : vector<17x17xf32>
    %52 = math.exp %51 : vector<17x17xf32>
    %cst_31 = arith.constant dense<0.000000e+00> : vector<17xf32>
    %53 = vector.multi_reduction <add>, %52, %cst_31 [1] : vector<17x17xf32> to vector<17xf32>
    %54 = vector.shape_cast %53 : vector<17xf32> to vector<17x1xf32>
    %55 = tpu.reciprocal %54 {approx = true} : vector<17x1xf32> -> vector<17x1xf32>
    %56 = vector.broadcast %55 : vector<17x1xf32> to vector<17x17xf32>
    %57 = arith.mulf %52, %56 : vector<17x17xf32>
    %cst_32 = arith.constant dense<0.000000e+00> : vector<17x16xf32>
    %58 = tpu.matmul %57, %44, %cst_32 {dimension_numbers = #tpu.dot_dimension_numbers<[1], [0], [0], [1], [0, 0, 1, 1], [], []>} : vector<17x17xf32>, vector<17x16xf32>, vector<17x16xf32> -> vector<17x16xf32>
    %59 = vector.extract_strided_slice %41 {offsets = [0, 16], sizes = [17, 16], strides = [1, 1]} : vector<17x192xf32> to vector<17x16xf32>
    %60 = vector.extract_strided_slice %41 {offsets = [0, 80], sizes = [17, 16], strides = [1, 1]} : vector<17x192xf32> to vector<17x16xf32>
    %61 = vector.extract_strided_slice %41 {offsets = [0, 144], sizes = [17, 16], strides = [1, 1]} : vector<17x192xf32> to vector<17x16xf32>
    %cst_33 = arith.constant dense<0.000000e+00> : vector<17x17xf32>
    %62 = tpu.matmul %59, %60, %cst_33 {dimension_numbers = #tpu.dot_dimension_numbers<[1], [1], [0], [0], [0, 0, 1, 0], [], []>} : vector<17x16xf32>, vector<17x16xf32>, vector<17x17xf32> -> vector<17x17xf32>
    %cst_34 = arith.constant 2.500000e-01 : f32
    %63 = vector.broadcast %cst_34 : f32 to vector<17x17xf32>
    %64 = arith.mulf %62, %63 : vector<17x17xf32>
    %cst_35 = arith.constant dense<0xFF800000> : vector<17xf32>
    %65 = vector.multi_reduction <maximumf>, %64, %cst_35 [1] : vector<17x17xf32> to vector<17xf32>
    %66 = vector.shape_cast %65 : vector<17xf32> to vector<17x1xf32>
    %67 = vector.broadcast %66 : vector<17x1xf32> to vector<17x17xf32>
    %68 = arith.subf %64, %67 : vector<17x17xf32>
    %69 = math.exp %68 : vector<17x17xf32>
    %cst_36 = arith.constant dense<0.000000e+00> : vector<17xf32>
    %70 = vector.multi_reduction <add>, %69, %cst_36 [1] : vector<17x17xf32> to vector<17xf32>
    %71 = vector.shape_cast %70 : vector<17xf32> to vector<17x1xf32>
    %72 = tpu.reciprocal %71 {approx = true} : vector<17x1xf32> -> vector<17x1xf32>
    %73 = vector.broadcast %72 : vector<17x1xf32> to vector<17x17xf32>
    %74 = arith.mulf %69, %73 : vector<17x17xf32>
    %cst_37 = arith.constant dense<0.000000e+00> : vector<17x16xf32>
    %75 = tpu.matmul %74, %61, %cst_37 {dimension_numbers = #tpu.dot_dimension_numbers<[1], [0], [0], [1], [0, 0, 1, 1], [], []>} : vector<17x17xf32>, vector<17x16xf32>, vector<17x16xf32> -> vector<17x16xf32>
    %76 = vector.extract_strided_slice %41 {offsets = [0, 32], sizes = [17, 16], strides = [1, 1]} : vector<17x192xf32> to vector<17x16xf32>
    %77 = vector.extract_strided_slice %41 {offsets = [0, 96], sizes = [17, 16], strides = [1, 1]} : vector<17x192xf32> to vector<17x16xf32>
    %78 = vector.extract_strided_slice %41 {offsets = [0, 160], sizes = [17, 16], strides = [1, 1]} : vector<17x192xf32> to vector<17x16xf32>
    %cst_38 = arith.constant dense<0.000000e+00> : vector<17x17xf32>
    %79 = tpu.matmul %76, %77, %cst_38 {dimension_numbers = #tpu.dot_dimension_numbers<[1], [1], [0], [0], [0, 0, 1, 0], [], []>} : vector<17x16xf32>, vector<17x16xf32>, vector<17x17xf32> -> vector<17x17xf32>
    %cst_39 = arith.constant 2.500000e-01 : f32
    %80 = vector.broadcast %cst_39 : f32 to vector<17x17xf32>
    %81 = arith.mulf %79, %80 : vector<17x17xf32>
    %cst_40 = arith.constant dense<0xFF800000> : vector<17xf32>
    %82 = vector.multi_reduction <maximumf>, %81, %cst_40 [1] : vector<17x17xf32> to vector<17xf32>
    %83 = vector.shape_cast %82 : vector<17xf32> to vector<17x1xf32>
    %84 = vector.broadcast %83 : vector<17x1xf32> to vector<17x17xf32>
    %85 = arith.subf %81, %84 : vector<17x17xf32>
    %86 = math.exp %85 : vector<17x17xf32>
    %cst_41 = arith.constant dense<0.000000e+00> : vector<17xf32>
    %87 = vector.multi_reduction <add>, %86, %cst_41 [1] : vector<17x17xf32> to vector<17xf32>
    %88 = vector.shape_cast %87 : vector<17xf32> to vector<17x1xf32>
    %89 = tpu.reciprocal %88 {approx = true} : vector<17x1xf32> -> vector<17x1xf32>
    %90 = vector.broadcast %89 : vector<17x1xf32> to vector<17x17xf32>
    %91 = arith.mulf %86, %90 : vector<17x17xf32>
    %cst_42 = arith.constant dense<0.000000e+00> : vector<17x16xf32>
    %92 = tpu.matmul %91, %78, %cst_42 {dimension_numbers = #tpu.dot_dimension_numbers<[1], [0], [0], [1], [0, 0, 1, 1], [], []>} : vector<17x17xf32>, vector<17x16xf32>, vector<17x16xf32> -> vector<17x16xf32>
    %93 = vector.extract_strided_slice %41 {offsets = [0, 48], sizes = [17, 16], strides = [1, 1]} : vector<17x192xf32> to vector<17x16xf32>
    %94 = vector.extract_strided_slice %41 {offsets = [0, 112], sizes = [17, 16], strides = [1, 1]} : vector<17x192xf32> to vector<17x16xf32>
    %95 = vector.extract_strided_slice %41 {offsets = [0, 176], sizes = [17, 16], strides = [1, 1]} : vector<17x192xf32> to vector<17x16xf32>
    %cst_43 = arith.constant dense<0.000000e+00> : vector<17x17xf32>
    %96 = tpu.matmul %93, %94, %cst_43 {dimension_numbers = #tpu.dot_dimension_numbers<[1], [1], [0], [0], [0, 0, 1, 0], [], []>} : vector<17x16xf32>, vector<17x16xf32>, vector<17x17xf32> -> vector<17x17xf32>
    %cst_44 = arith.constant 2.500000e-01 : f32
    %97 = vector.broadcast %cst_44 : f32 to vector<17x17xf32>
    %98 = arith.mulf %96, %97 : vector<17x17xf32>
    %cst_45 = arith.constant dense<0xFF800000> : vector<17xf32>
    %99 = vector.multi_reduction <maximumf>, %98, %cst_45 [1] : vector<17x17xf32> to vector<17xf32>
    %100 = vector.shape_cast %99 : vector<17xf32> to vector<17x1xf32>
    %101 = vector.broadcast %100 : vector<17x1xf32> to vector<17x17xf32>
    %102 = arith.subf %98, %101 : vector<17x17xf32>
    %103 = math.exp %102 : vector<17x17xf32>
    %cst_46 = arith.constant dense<0.000000e+00> : vector<17xf32>
    %104 = vector.multi_reduction <add>, %103, %cst_46 [1] : vector<17x17xf32> to vector<17xf32>
    %105 = vector.shape_cast %104 : vector<17xf32> to vector<17x1xf32>
    %106 = tpu.reciprocal %105 {approx = true} : vector<17x1xf32> -> vector<17x1xf32>
    %107 = vector.broadcast %106 : vector<17x1xf32> to vector<17x17xf32>
    %108 = arith.mulf %103, %107 : vector<17x17xf32>
    %cst_47 = arith.constant dense<0.000000e+00> : vector<17x16xf32>
    %109 = tpu.matmul %108, %95, %cst_47 {dimension_numbers = #tpu.dot_dimension_numbers<[1], [0], [0], [1], [0, 0, 1, 1], [], []>} : vector<17x17xf32>, vector<17x16xf32>, vector<17x16xf32> -> vector<17x16xf32>
    %110 = tpu.concatenate %58, %75, %92, %109 in 1 : vector<17x16xf32>, vector<17x16xf32>, vector<17x16xf32>, vector<17x16xf32> -> vector<17x64xf32>
    %c0_48 = arith.constant 0 : index
    %c0_49 = arith.constant 0 : index
    %c0_50 = arith.constant 0 : index
    %111 = vector.load %arg10[%c0_48, %c0_49, %c0_50] : memref<2x64x64xf32, #tpu.memory_space<vmem>>, vector<1x64x64xf32>
    %112 = vector.shape_cast %111 : vector<1x64x64xf32> to vector<64x64xf32>
    %cst_51 = arith.constant dense<0.000000e+00> : vector<17x64xf32>
    %113 = tpu.matmul %110, %112, %cst_51 {dimension_numbers = #tpu.dot_dimension_numbers<[1], [0], [0], [1], [0, 0, 1, 1], [], []>} : vector<17x64xf32>, vector<64x64xf32>, vector<17x64xf32> -> vector<17x64xf32>
    %114 = arith.addf %10, %113 : vector<17x64xf32>
    %c0_52 = arith.constant 0 : index
    %c0_53 = arith.constant 0 : index
    %c0_54 = arith.constant 0 : index
    %115 = vector.load %arg11[%c0_52, %c0_53, %c0_54] : memref<2x1x64xf32, #tpu.memory_space<vmem>>, vector<1x1x64xf32>
    %116 = vector.shape_cast %115 : vector<1x1x64xf32> to vector<1x64xf32>
    %117 = vector.broadcast %116 : vector<1x64xf32> to vector<17x64xf32>
    %118 = arith.addf %114, %117 : vector<17x64xf32>
    %c0_55 = arith.constant 0 : index
    %c0_56 = arith.constant 0 : index
    %c0_57 = arith.constant 0 : index
    %119 = vector.load %arg12[%c0_55, %c0_56, %c0_57] : memref<2x1x64xf32, #tpu.memory_space<vmem>>, vector<1x1x64xf32>
    %120 = vector.shape_cast %119 : vector<1x1x64xf32> to vector<1x64xf32>
    %c0_58 = arith.constant 0 : index
    %c0_59 = arith.constant 0 : index
    %c0_60 = arith.constant 0 : index
    %121 = vector.load %arg13[%c0_58, %c0_59, %c0_60] : memref<2x1x64xf32, #tpu.memory_space<vmem>>, vector<1x1x64xf32>
    %122 = vector.shape_cast %121 : vector<1x1x64xf32> to vector<1x64xf32>
    %cst_61 = arith.constant dense<0.000000e+00> : vector<17xf32>
    %123 = vector.multi_reduction <add>, %118, %cst_61 [1] : vector<17x64xf32> to vector<17xf32>
    %124 = vector.shape_cast %123 : vector<17xf32> to vector<17x1xf32>
    %cst_62 = arith.constant 6.400000e+01 : f32
    %125 = vector.broadcast %cst_62 : f32 to vector<17x1xf32>
    %126 = arith.divf %124, %125 : vector<17x1xf32>
    %127 = vector.broadcast %126 : vector<17x1xf32> to vector<17x64xf32>
    %128 = arith.subf %118, %127 : vector<17x64xf32>
    %129 = arith.mulf %128, %128 : vector<17x64xf32>
    %cst_63 = arith.constant dense<0.000000e+00> : vector<17xf32>
    %130 = vector.multi_reduction <add>, %129, %cst_63 [1] : vector<17x64xf32> to vector<17xf32>
    %131 = vector.shape_cast %130 : vector<17xf32> to vector<17x1xf32>
    %cst_64 = arith.constant 6.400000e+01 : f32
    %132 = vector.broadcast %cst_64 : f32 to vector<17x1xf32>
    %133 = arith.divf %131, %132 : vector<17x1xf32>
    %cst_65 = arith.constant 9.99999997E-7 : f32
    %134 = vector.broadcast %cst_65 : f32 to vector<17x1xf32>
    %135 = arith.addf %133, %134 : vector<17x1xf32>
    %136 = math.rsqrt %135 : vector<17x1xf32>
    %137 = vector.broadcast %136 : vector<17x1xf32> to vector<17x64xf32>
    %138 = arith.mulf %128, %137 : vector<17x64xf32>
    %139 = vector.broadcast %120 : vector<1x64xf32> to vector<17x64xf32>
    %140 = arith.mulf %138, %139 : vector<17x64xf32>
    %141 = vector.broadcast %122 : vector<1x64xf32> to vector<17x64xf32>
    %142 = arith.addf %140, %141 : vector<17x64xf32>
    %c0_66 = arith.constant 0 : index
    %c0_67 = arith.constant 0 : index
    %c0_68 = arith.constant 0 : index
    %143 = vector.load %arg14[%c0_66, %c0_67, %c0_68] : memref<2x64x128xf32, #tpu.memory_space<vmem>>, vector<1x64x128xf32>
    %144 = vector.shape_cast %143 : vector<1x64x128xf32> to vector<64x128xf32>
    %cst_69 = arith.constant dense<0.000000e+00> : vector<17x128xf32>
    %145 = tpu.matmul %142, %144, %cst_69 {dimension_numbers = #tpu.dot_dimension_numbers<[1], [0], [0], [1], [0, 0, 1, 1], [], []>} : vector<17x64xf32>, vector<64x128xf32>, vector<17x128xf32> -> vector<17x128xf32>
    %c0_70 = arith.constant 0 : index
    %c0_71 = arith.constant 0 : index
    %c0_72 = arith.constant 0 : index
    %146 = vector.load %arg15[%c0_70, %c0_71, %c0_72] : memref<2x1x128xf32, #tpu.memory_space<vmem>>, vector<1x1x128xf32>
    %147 = vector.shape_cast %146 : vector<1x1x128xf32> to vector<1x128xf32>
    %148 = vector.broadcast %147 : vector<1x128xf32> to vector<17x128xf32>
    %149 = arith.addf %145, %148 : vector<17x128xf32>
    %cst_73 = arith.constant 5.000000e-01 : f32
    %150 = vector.broadcast %cst_73 : f32 to vector<17x128xf32>
    %151 = arith.mulf %150, %149 : vector<17x128xf32>
    %cst_74 = arith.constant 4.471500e-02 : f32
    %152 = vector.broadcast %cst_74 : f32 to vector<17x128xf32>
    %153 = arith.mulf %152, %149 : vector<17x128xf32>
    %154 = arith.mulf %153, %149 : vector<17x128xf32>
    %155 = arith.mulf %154, %149 : vector<17x128xf32>
    %156 = arith.addf %149, %155 : vector<17x128xf32>
    %cst_75 = arith.constant 0.797884583 : f32
    %157 = vector.broadcast %cst_75 : f32 to vector<17x128xf32>
    %158 = arith.mulf %157, %156 : vector<17x128xf32>
    %159 = math.tanh %158 : vector<17x128xf32>
    %cst_76 = arith.constant 1.000000e+00 : f32
    %160 = vector.broadcast %cst_76 : f32 to vector<17x128xf32>
    %161 = arith.addf %160, %159 : vector<17x128xf32>
    %162 = arith.mulf %151, %161 : vector<17x128xf32>
    %c0_77 = arith.constant 0 : index
    %c0_78 = arith.constant 0 : index
    %c0_79 = arith.constant 0 : index
    %163 = vector.load %arg16[%c0_77, %c0_78, %c0_79] : memref<2x128x64xf32, #tpu.memory_space<vmem>>, vector<1x128x64xf32>
    %164 = vector.shape_cast %163 : vector<1x128x64xf32> to vector<128x64xf32>
    %cst_80 = arith.constant dense<0.000000e+00> : vector<17x64xf32>
    %165 = tpu.matmul %162, %164, %cst_80 {dimension_numbers = #tpu.dot_dimension_numbers<[1], [0], [0], [1], [0, 0, 1, 1], [], []>} : vector<17x128xf32>, vector<128x64xf32>, vector<17x64xf32> -> vector<17x64xf32>
    %166 = arith.addf %118, %165 : vector<17x64xf32>
    %c0_81 = arith.constant 0 : index
    %c0_82 = arith.constant 0 : index
    %c0_83 = arith.constant 0 : index
    %167 = vector.load %arg17[%c0_81, %c0_82, %c0_83] : memref<2x1x64xf32, #tpu.memory_space<vmem>>, vector<1x1x64xf32>
    %168 = vector.shape_cast %167 : vector<1x1x64xf32> to vector<1x64xf32>
    %169 = vector.broadcast %168 : vector<1x64xf32> to vector<17x64xf32>
    %170 = arith.addf %166, %169 : vector<17x64xf32>
    %c1 = arith.constant 1 : index
    %c0_84 = arith.constant 0 : index
    %c0_85 = arith.constant 0 : index
    %171 = vector.load %arg6[%c1, %c0_84, %c0_85] : memref<2x1x64xf32, #tpu.memory_space<vmem>>, vector<1x1x64xf32>
    %172 = vector.shape_cast %171 : vector<1x1x64xf32> to vector<1x64xf32>
    %c1_86 = arith.constant 1 : index
    %c0_87 = arith.constant 0 : index
    %c0_88 = arith.constant 0 : index
    %173 = vector.load %arg7[%c1_86, %c0_87, %c0_88] : memref<2x1x64xf32, #tpu.memory_space<vmem>>, vector<1x1x64xf32>
    %174 = vector.shape_cast %173 : vector<1x1x64xf32> to vector<1x64xf32>
    %cst_89 = arith.constant dense<0.000000e+00> : vector<17xf32>
    %175 = vector.multi_reduction <add>, %170, %cst_89 [1] : vector<17x64xf32> to vector<17xf32>
    %176 = vector.shape_cast %175 : vector<17xf32> to vector<17x1xf32>
    %cst_90 = arith.constant 6.400000e+01 : f32
    %177 = vector.broadcast %cst_90 : f32 to vector<17x1xf32>
    %178 = arith.divf %176, %177 : vector<17x1xf32>
    %179 = vector.broadcast %178 : vector<17x1xf32> to vector<17x64xf32>
    %180 = arith.subf %170, %179 : vector<17x64xf32>
    %181 = arith.mulf %180, %180 : vector<17x64xf32>
    %cst_91 = arith.constant dense<0.000000e+00> : vector<17xf32>
    %182 = vector.multi_reduction <add>, %181, %cst_91 [1] : vector<17x64xf32> to vector<17xf32>
    %183 = vector.shape_cast %182 : vector<17xf32> to vector<17x1xf32>
    %cst_92 = arith.constant 6.400000e+01 : f32
    %184 = vector.broadcast %cst_92 : f32 to vector<17x1xf32>
    %185 = arith.divf %183, %184 : vector<17x1xf32>
    %cst_93 = arith.constant 9.99999997E-7 : f32
    %186 = vector.broadcast %cst_93 : f32 to vector<17x1xf32>
    %187 = arith.addf %185, %186 : vector<17x1xf32>
    %188 = math.rsqrt %187 : vector<17x1xf32>
    %189 = vector.broadcast %188 : vector<17x1xf32> to vector<17x64xf32>
    %190 = arith.mulf %180, %189 : vector<17x64xf32>
    %191 = vector.broadcast %172 : vector<1x64xf32> to vector<17x64xf32>
    %192 = arith.mulf %190, %191 : vector<17x64xf32>
    %193 = vector.broadcast %174 : vector<1x64xf32> to vector<17x64xf32>
    %194 = arith.addf %192, %193 : vector<17x64xf32>
    %c1_94 = arith.constant 1 : index
    %c0_95 = arith.constant 0 : index
    %c0_96 = arith.constant 0 : index
    %195 = vector.load %arg8[%c1_94, %c0_95, %c0_96] : memref<2x64x192xf32, #tpu.memory_space<vmem>>, vector<1x64x192xf32>
    %196 = vector.shape_cast %195 : vector<1x64x192xf32> to vector<64x192xf32>
    %cst_97 = arith.constant dense<0.000000e+00> : vector<17x192xf32>
    %197 = tpu.matmul %194, %196, %cst_97 {dimension_numbers = #tpu.dot_dimension_numbers<[1], [0], [0], [1], [0, 0, 1, 1], [], []>} : vector<17x64xf32>, vector<64x192xf32>, vector<17x192xf32> -> vector<17x192xf32>
    %c1_98 = arith.constant 1 : index
    %c0_99 = arith.constant 0 : index
    %c0_100 = arith.constant 0 : index
    %198 = vector.load %arg9[%c1_98, %c0_99, %c0_100] : memref<2x1x192xf32, #tpu.memory_space<vmem>>, vector<1x1x192xf32>
    %199 = vector.shape_cast %198 : vector<1x1x192xf32> to vector<1x192xf32>
    %200 = vector.broadcast %199 : vector<1x192xf32> to vector<17x192xf32>
    %201 = arith.addf %197, %200 : vector<17x192xf32>
    %202 = vector.extract_strided_slice %201 {offsets = [0, 0], sizes = [17, 16], strides = [1, 1]} : vector<17x192xf32> to vector<17x16xf32>
    %203 = vector.extract_strided_slice %201 {offsets = [0, 64], sizes = [17, 16], strides = [1, 1]} : vector<17x192xf32> to vector<17x16xf32>
    %204 = vector.extract_strided_slice %201 {offsets = [0, 128], sizes = [17, 16], strides = [1, 1]} : vector<17x192xf32> to vector<17x16xf32>
    %cst_101 = arith.constant dense<0.000000e+00> : vector<17x17xf32>
    %205 = tpu.matmul %202, %203, %cst_101 {dimension_numbers = #tpu.dot_dimension_numbers<[1], [1], [0], [0], [0, 0, 1, 0], [], []>} : vector<17x16xf32>, vector<17x16xf32>, vector<17x17xf32> -> vector<17x17xf32>
    %cst_102 = arith.constant 2.500000e-01 : f32
    %206 = vector.broadcast %cst_102 : f32 to vector<17x17xf32>
    %207 = arith.mulf %205, %206 : vector<17x17xf32>
    %cst_103 = arith.constant dense<0xFF800000> : vector<17xf32>
    %208 = vector.multi_reduction <maximumf>, %207, %cst_103 [1] : vector<17x17xf32> to vector<17xf32>
    %209 = vector.shape_cast %208 : vector<17xf32> to vector<17x1xf32>
    %210 = vector.broadcast %209 : vector<17x1xf32> to vector<17x17xf32>
    %211 = arith.subf %207, %210 : vector<17x17xf32>
    %212 = math.exp %211 : vector<17x17xf32>
    %cst_104 = arith.constant dense<0.000000e+00> : vector<17xf32>
    %213 = vector.multi_reduction <add>, %212, %cst_104 [1] : vector<17x17xf32> to vector<17xf32>
    %214 = vector.shape_cast %213 : vector<17xf32> to vector<17x1xf32>
    %215 = tpu.reciprocal %214 {approx = true} : vector<17x1xf32> -> vector<17x1xf32>
    %216 = vector.broadcast %215 : vector<17x1xf32> to vector<17x17xf32>
    %217 = arith.mulf %212, %216 : vector<17x17xf32>
    %cst_105 = arith.constant dense<0.000000e+00> : vector<17x16xf32>
    %218 = tpu.matmul %217, %204, %cst_105 {dimension_numbers = #tpu.dot_dimension_numbers<[1], [0], [0], [1], [0, 0, 1, 1], [], []>} : vector<17x17xf32>, vector<17x16xf32>, vector<17x16xf32> -> vector<17x16xf32>
    %219 = vector.extract_strided_slice %201 {offsets = [0, 16], sizes = [17, 16], strides = [1, 1]} : vector<17x192xf32> to vector<17x16xf32>
    %220 = vector.extract_strided_slice %201 {offsets = [0, 80], sizes = [17, 16], strides = [1, 1]} : vector<17x192xf32> to vector<17x16xf32>
    %221 = vector.extract_strided_slice %201 {offsets = [0, 144], sizes = [17, 16], strides = [1, 1]} : vector<17x192xf32> to vector<17x16xf32>
    %cst_106 = arith.constant dense<0.000000e+00> : vector<17x17xf32>
    %222 = tpu.matmul %219, %220, %cst_106 {dimension_numbers = #tpu.dot_dimension_numbers<[1], [1], [0], [0], [0, 0, 1, 0], [], []>} : vector<17x16xf32>, vector<17x16xf32>, vector<17x17xf32> -> vector<17x17xf32>
    %cst_107 = arith.constant 2.500000e-01 : f32
    %223 = vector.broadcast %cst_107 : f32 to vector<17x17xf32>
    %224 = arith.mulf %222, %223 : vector<17x17xf32>
    %cst_108 = arith.constant dense<0xFF800000> : vector<17xf32>
    %225 = vector.multi_reduction <maximumf>, %224, %cst_108 [1] : vector<17x17xf32> to vector<17xf32>
    %226 = vector.shape_cast %225 : vector<17xf32> to vector<17x1xf32>
    %227 = vector.broadcast %226 : vector<17x1xf32> to vector<17x17xf32>
    %228 = arith.subf %224, %227 : vector<17x17xf32>
    %229 = math.exp %228 : vector<17x17xf32>
    %cst_109 = arith.constant dense<0.000000e+00> : vector<17xf32>
    %230 = vector.multi_reduction <add>, %229, %cst_109 [1] : vector<17x17xf32> to vector<17xf32>
    %231 = vector.shape_cast %230 : vector<17xf32> to vector<17x1xf32>
    %232 = tpu.reciprocal %231 {approx = true} : vector<17x1xf32> -> vector<17x1xf32>
    %233 = vector.broadcast %232 : vector<17x1xf32> to vector<17x17xf32>
    %234 = arith.mulf %229, %233 : vector<17x17xf32>
    %cst_110 = arith.constant dense<0.000000e+00> : vector<17x16xf32>
    %235 = tpu.matmul %234, %221, %cst_110 {dimension_numbers = #tpu.dot_dimension_numbers<[1], [0], [0], [1], [0, 0, 1, 1], [], []>} : vector<17x17xf32>, vector<17x16xf32>, vector<17x16xf32> -> vector<17x16xf32>
    %236 = vector.extract_strided_slice %201 {offsets = [0, 32], sizes = [17, 16], strides = [1, 1]} : vector<17x192xf32> to vector<17x16xf32>
    %237 = vector.extract_strided_slice %201 {offsets = [0, 96], sizes = [17, 16], strides = [1, 1]} : vector<17x192xf32> to vector<17x16xf32>
    %238 = vector.extract_strided_slice %201 {offsets = [0, 160], sizes = [17, 16], strides = [1, 1]} : vector<17x192xf32> to vector<17x16xf32>
    %cst_111 = arith.constant dense<0.000000e+00> : vector<17x17xf32>
    %239 = tpu.matmul %236, %237, %cst_111 {dimension_numbers = #tpu.dot_dimension_numbers<[1], [1], [0], [0], [0, 0, 1, 0], [], []>} : vector<17x16xf32>, vector<17x16xf32>, vector<17x17xf32> -> vector<17x17xf32>
    %cst_112 = arith.constant 2.500000e-01 : f32
    %240 = vector.broadcast %cst_112 : f32 to vector<17x17xf32>
    %241 = arith.mulf %239, %240 : vector<17x17xf32>
    %cst_113 = arith.constant dense<0xFF800000> : vector<17xf32>
    %242 = vector.multi_reduction <maximumf>, %241, %cst_113 [1] : vector<17x17xf32> to vector<17xf32>
    %243 = vector.shape_cast %242 : vector<17xf32> to vector<17x1xf32>
    %244 = vector.broadcast %243 : vector<17x1xf32> to vector<17x17xf32>
    %245 = arith.subf %241, %244 : vector<17x17xf32>
    %246 = math.exp %245 : vector<17x17xf32>
    %cst_114 = arith.constant dense<0.000000e+00> : vector<17xf32>
    %247 = vector.multi_reduction <add>, %246, %cst_114 [1] : vector<17x17xf32> to vector<17xf32>
    %248 = vector.shape_cast %247 : vector<17xf32> to vector<17x1xf32>
    %249 = tpu.reciprocal %248 {approx = true} : vector<17x1xf32> -> vector<17x1xf32>
    %250 = vector.broadcast %249 : vector<17x1xf32> to vector<17x17xf32>
    %251 = arith.mulf %246, %250 : vector<17x17xf32>
    %cst_115 = arith.constant dense<0.000000e+00> : vector<17x16xf32>
    %252 = tpu.matmul %251, %238, %cst_115 {dimension_numbers = #tpu.dot_dimension_numbers<[1], [0], [0], [1], [0, 0, 1, 1], [], []>} : vector<17x17xf32>, vector<17x16xf32>, vector<17x16xf32> -> vector<17x16xf32>
    %253 = vector.extract_strided_slice %201 {offsets = [0, 48], sizes = [17, 16], strides = [1, 1]} : vector<17x192xf32> to vector<17x16xf32>
    %254 = vector.extract_strided_slice %201 {offsets = [0, 112], sizes = [17, 16], strides = [1, 1]} : vector<17x192xf32> to vector<17x16xf32>
    %255 = vector.extract_strided_slice %201 {offsets = [0, 176], sizes = [17, 16], strides = [1, 1]} : vector<17x192xf32> to vector<17x16xf32>
    %cst_116 = arith.constant dense<0.000000e+00> : vector<17x17xf32>
    %256 = tpu.matmul %253, %254, %cst_116 {dimension_numbers = #tpu.dot_dimension_numbers<[1], [1], [0], [0], [0, 0, 1, 0], [], []>} : vector<17x16xf32>, vector<17x16xf32>, vector<17x17xf32> -> vector<17x17xf32>
    %cst_117 = arith.constant 2.500000e-01 : f32
    %257 = vector.broadcast %cst_117 : f32 to vector<17x17xf32>
    %258 = arith.mulf %256, %257 : vector<17x17xf32>
    %cst_118 = arith.constant dense<0xFF800000> : vector<17xf32>
    %259 = vector.multi_reduction <maximumf>, %258, %cst_118 [1] : vector<17x17xf32> to vector<17xf32>
    %260 = vector.shape_cast %259 : vector<17xf32> to vector<17x1xf32>
    %261 = vector.broadcast %260 : vector<17x1xf32> to vector<17x17xf32>
    %262 = arith.subf %258, %261 : vector<17x17xf32>
    %263 = math.exp %262 : vector<17x17xf32>
    %cst_119 = arith.constant dense<0.000000e+00> : vector<17xf32>
    %264 = vector.multi_reduction <add>, %263, %cst_119 [1] : vector<17x17xf32> to vector<17xf32>
    %265 = vector.shape_cast %264 : vector<17xf32> to vector<17x1xf32>
    %266 = tpu.reciprocal %265 {approx = true} : vector<17x1xf32> -> vector<17x1xf32>
    %267 = vector.broadcast %266 : vector<17x1xf32> to vector<17x17xf32>
    %268 = arith.mulf %263, %267 : vector<17x17xf32>
    %cst_120 = arith.constant dense<0.000000e+00> : vector<17x16xf32>
    %269 = tpu.matmul %268, %255, %cst_120 {dimension_numbers = #tpu.dot_dimension_numbers<[1], [0], [0], [1], [0, 0, 1, 1], [], []>} : vector<17x17xf32>, vector<17x16xf32>, vector<17x16xf32> -> vector<17x16xf32>
    %270 = tpu.concatenate %218, %235, %252, %269 in 1 : vector<17x16xf32>, vector<17x16xf32>, vector<17x16xf32>, vector<17x16xf32> -> vector<17x64xf32>
    %c1_121 = arith.constant 1 : index
    %c0_122 = arith.constant 0 : index
    %c0_123 = arith.constant 0 : index
    %271 = vector.load %arg10[%c1_121, %c0_122, %c0_123] : memref<2x64x64xf32, #tpu.memory_space<vmem>>, vector<1x64x64xf32>
    %272 = vector.shape_cast %271 : vector<1x64x64xf32> to vector<64x64xf32>
    %cst_124 = arith.constant dense<0.000000e+00> : vector<17x64xf32>
    %273 = tpu.matmul %270, %272, %cst_124 {dimension_numbers = #tpu.dot_dimension_numbers<[1], [0], [0], [1], [0, 0, 1, 1], [], []>} : vector<17x64xf32>, vector<64x64xf32>, vector<17x64xf32> -> vector<17x64xf32>
    %274 = arith.addf %170, %273 : vector<17x64xf32>
    %c1_125 = arith.constant 1 : index
    %c0_126 = arith.constant 0 : index
    %c0_127 = arith.constant 0 : index
    %275 = vector.load %arg11[%c1_125, %c0_126, %c0_127] : memref<2x1x64xf32, #tpu.memory_space<vmem>>, vector<1x1x64xf32>
    %276 = vector.shape_cast %275 : vector<1x1x64xf32> to vector<1x64xf32>
    %277 = vector.broadcast %276 : vector<1x64xf32> to vector<17x64xf32>
    %278 = arith.addf %274, %277 : vector<17x64xf32>
    %c1_128 = arith.constant 1 : index
    %c0_129 = arith.constant 0 : index
    %c0_130 = arith.constant 0 : index
    %279 = vector.load %arg12[%c1_128, %c0_129, %c0_130] : memref<2x1x64xf32, #tpu.memory_space<vmem>>, vector<1x1x64xf32>
    %280 = vector.shape_cast %279 : vector<1x1x64xf32> to vector<1x64xf32>
    %c1_131 = arith.constant 1 : index
    %c0_132 = arith.constant 0 : index
    %c0_133 = arith.constant 0 : index
    %281 = vector.load %arg13[%c1_131, %c0_132, %c0_133] : memref<2x1x64xf32, #tpu.memory_space<vmem>>, vector<1x1x64xf32>
    %282 = vector.shape_cast %281 : vector<1x1x64xf32> to vector<1x64xf32>
    %cst_134 = arith.constant dense<0.000000e+00> : vector<17xf32>
    %283 = vector.multi_reduction <add>, %278, %cst_134 [1] : vector<17x64xf32> to vector<17xf32>
    %284 = vector.shape_cast %283 : vector<17xf32> to vector<17x1xf32>
    %cst_135 = arith.constant 6.400000e+01 : f32
    %285 = vector.broadcast %cst_135 : f32 to vector<17x1xf32>
    %286 = arith.divf %284, %285 : vector<17x1xf32>
    %287 = vector.broadcast %286 : vector<17x1xf32> to vector<17x64xf32>
    %288 = arith.subf %278, %287 : vector<17x64xf32>
    %289 = arith.mulf %288, %288 : vector<17x64xf32>
    %cst_136 = arith.constant dense<0.000000e+00> : vector<17xf32>
    %290 = vector.multi_reduction <add>, %289, %cst_136 [1] : vector<17x64xf32> to vector<17xf32>
    %291 = vector.shape_cast %290 : vector<17xf32> to vector<17x1xf32>
    %cst_137 = arith.constant 6.400000e+01 : f32
    %292 = vector.broadcast %cst_137 : f32 to vector<17x1xf32>
    %293 = arith.divf %291, %292 : vector<17x1xf32>
    %cst_138 = arith.constant 9.99999997E-7 : f32
    %294 = vector.broadcast %cst_138 : f32 to vector<17x1xf32>
    %295 = arith.addf %293, %294 : vector<17x1xf32>
    %296 = math.rsqrt %295 : vector<17x1xf32>
    %297 = vector.broadcast %296 : vector<17x1xf32> to vector<17x64xf32>
    %298 = arith.mulf %288, %297 : vector<17x64xf32>
    %299 = vector.broadcast %280 : vector<1x64xf32> to vector<17x64xf32>
    %300 = arith.mulf %298, %299 : vector<17x64xf32>
    %301 = vector.broadcast %282 : vector<1x64xf32> to vector<17x64xf32>
    %302 = arith.addf %300, %301 : vector<17x64xf32>
    %c1_139 = arith.constant 1 : index
    %c0_140 = arith.constant 0 : index
    %c0_141 = arith.constant 0 : index
    %303 = vector.load %arg14[%c1_139, %c0_140, %c0_141] : memref<2x64x128xf32, #tpu.memory_space<vmem>>, vector<1x64x128xf32>
    %304 = vector.shape_cast %303 : vector<1x64x128xf32> to vector<64x128xf32>
    %cst_142 = arith.constant dense<0.000000e+00> : vector<17x128xf32>
    %305 = tpu.matmul %302, %304, %cst_142 {dimension_numbers = #tpu.dot_dimension_numbers<[1], [0], [0], [1], [0, 0, 1, 1], [], []>} : vector<17x64xf32>, vector<64x128xf32>, vector<17x128xf32> -> vector<17x128xf32>
    %c1_143 = arith.constant 1 : index
    %c0_144 = arith.constant 0 : index
    %c0_145 = arith.constant 0 : index
    %306 = vector.load %arg15[%c1_143, %c0_144, %c0_145] : memref<2x1x128xf32, #tpu.memory_space<vmem>>, vector<1x1x128xf32>
    %307 = vector.shape_cast %306 : vector<1x1x128xf32> to vector<1x128xf32>
    %308 = vector.broadcast %307 : vector<1x128xf32> to vector<17x128xf32>
    %309 = arith.addf %305, %308 : vector<17x128xf32>
    %cst_146 = arith.constant 5.000000e-01 : f32
    %310 = vector.broadcast %cst_146 : f32 to vector<17x128xf32>
    %311 = arith.mulf %310, %309 : vector<17x128xf32>
    %cst_147 = arith.constant 4.471500e-02 : f32
    %312 = vector.broadcast %cst_147 : f32 to vector<17x128xf32>
    %313 = arith.mulf %312, %309 : vector<17x128xf32>
    %314 = arith.mulf %313, %309 : vector<17x128xf32>
    %315 = arith.mulf %314, %309 : vector<17x128xf32>
    %316 = arith.addf %309, %315 : vector<17x128xf32>
    %cst_148 = arith.constant 0.797884583 : f32
    %317 = vector.broadcast %cst_148 : f32 to vector<17x128xf32>
    %318 = arith.mulf %317, %316 : vector<17x128xf32>
    %319 = math.tanh %318 : vector<17x128xf32>
    %cst_149 = arith.constant 1.000000e+00 : f32
    %320 = vector.broadcast %cst_149 : f32 to vector<17x128xf32>
    %321 = arith.addf %320, %319 : vector<17x128xf32>
    %322 = arith.mulf %311, %321 : vector<17x128xf32>
    %c1_150 = arith.constant 1 : index
    %c0_151 = arith.constant 0 : index
    %c0_152 = arith.constant 0 : index
    %323 = vector.load %arg16[%c1_150, %c0_151, %c0_152] : memref<2x128x64xf32, #tpu.memory_space<vmem>>, vector<1x128x64xf32>
    %324 = vector.shape_cast %323 : vector<1x128x64xf32> to vector<128x64xf32>
    %cst_153 = arith.constant dense<0.000000e+00> : vector<17x64xf32>
    %325 = tpu.matmul %322, %324, %cst_153 {dimension_numbers = #tpu.dot_dimension_numbers<[1], [0], [0], [1], [0, 0, 1, 1], [], []>} : vector<17x128xf32>, vector<128x64xf32>, vector<17x64xf32> -> vector<17x64xf32>
    %326 = arith.addf %278, %325 : vector<17x64xf32>
    %c1_154 = arith.constant 1 : index
    %c0_155 = arith.constant 0 : index
    %c0_156 = arith.constant 0 : index
    %327 = vector.load %arg17[%c1_154, %c0_155, %c0_156] : memref<2x1x64xf32, #tpu.memory_space<vmem>>, vector<1x1x64xf32>
    %328 = vector.shape_cast %327 : vector<1x1x64xf32> to vector<1x64xf32>
    %329 = vector.broadcast %328 : vector<1x64xf32> to vector<17x64xf32>
    %330 = arith.addf %326, %329 : vector<17x64xf32>
    %331 = vector.extract_strided_slice %330 {offsets = [0, 0], sizes = [1, 64], strides = [1, 1]} : vector<17x64xf32> to vector<1x64xf32>
    %c0_157 = arith.constant 0 : index
    %c0_158 = arith.constant 0 : index
    %332 = vector.load %arg18[%c0_157, %c0_158] : memref<1x64xf32, #tpu.memory_space<vmem>>, vector<1x64xf32>
    %c0_159 = arith.constant 0 : index
    %c0_160 = arith.constant 0 : index
    %333 = vector.load %arg19[%c0_159, %c0_160] : memref<1x64xf32, #tpu.memory_space<vmem>>, vector<1x64xf32>
    %cst_161 = arith.constant dense<0.000000e+00> : vector<1xf32>
    %334 = vector.multi_reduction <add>, %331, %cst_161 [1] : vector<1x64xf32> to vector<1xf32>
    %335 = vector.shape_cast %334 : vector<1xf32> to vector<1x1xf32>
    %cst_162 = arith.constant 6.400000e+01 : f32
    %336 = vector.broadcast %cst_162 : f32 to vector<1x1xf32>
    %337 = arith.divf %335, %336 : vector<1x1xf32>
    %338 = vector.broadcast %337 : vector<1x1xf32> to vector<1x64xf32>
    %339 = arith.subf %331, %338 : vector<1x64xf32>
    %340 = arith.mulf %339, %339 : vector<1x64xf32>
    %cst_163 = arith.constant dense<0.000000e+00> : vector<1xf32>
    %341 = vector.multi_reduction <add>, %340, %cst_163 [1] : vector<1x64xf32> to vector<1xf32>
    %342 = vector.shape_cast %341 : vector<1xf32> to vector<1x1xf32>
    %cst_164 = arith.constant 6.400000e+01 : f32
    %343 = vector.broadcast %cst_164 : f32 to vector<1x1xf32>
    %344 = arith.divf %342, %343 : vector<1x1xf32>
    %cst_165 = arith.constant 9.99999997E-7 : f32
    %345 = vector.broadcast %cst_165 : f32 to vector<1x1xf32>
    %346 = arith.addf %344, %345 : vector<1x1xf32>
    %347 = math.rsqrt %346 : vector<1x1xf32>
    %348 = vector.broadcast %347 : vector<1x1xf32> to vector<1x64xf32>
    %349 = arith.mulf %339, %348 : vector<1x64xf32>
    %350 = arith.mulf %349, %332 : vector<1x64xf32>
    %351 = arith.addf %350, %333 : vector<1x64xf32>
    %c0_166 = arith.constant 0 : index
    %c0_167 = arith.constant 0 : index
    %352 = vector.load %arg20[%c0_166, %c0_167] : memref<64x384xf32, #tpu.memory_space<vmem>>, vector<64x384xf32>
    %cst_168 = arith.constant dense<0.000000e+00> : vector<1x384xf32>
    %353 = tpu.matmul %351, %352, %cst_168 {dimension_numbers = #tpu.dot_dimension_numbers<[1], [0], [0], [1], [0, 0, 1, 1], [], []>} : vector<1x64xf32>, vector<64x384xf32>, vector<1x384xf32> -> vector<1x384xf32>
    %c0_169 = arith.constant 0 : index
    %c0_170 = arith.constant 0 : index
    %354 = vector.load %arg21[%c0_169, %c0_170] : memref<1x384xf32, #tpu.memory_space<vmem>>, vector<1x384xf32>
    %355 = arith.addf %353, %354 : vector<1x384xf32>
    %cst_171 = arith.constant 0.000000e+00 : f32
    %356 = vector.broadcast %cst_171 : f32 to vector<1x384xf32>
    %357 = arith.maximumf %355, %356 : vector<1x384xf32>
    %c0_172 = arith.constant 0 : index
    %c0_173 = arith.constant 0 : index
    %c0_174 = arith.constant 0 : index
    %358 = vector.load %arg22[%c0_172, %c0_173, %c0_174] : memref<1x1x384xf32, #tpu.memory_space<vmem>>, vector<1x1x384xf32>
    %359 = vector.shape_cast %358 : vector<1x1x384xf32> to vector<1x384xf32>
    %360 = vector.shape_cast %357 : vector<1x384xf32> to vector<1x1x384xf32>
    tpu.vector_store %arg22[%c0_172, %c0_173, %c0_174], %360 {strides = array<i32>} : memref<1x1x384xf32, #tpu.memory_space<vmem>>, vector<1x1x384xf32>,
    return
  }
  func.func @transform_0(%arg0: i32) -> (i32, i32, i32) {
    %c0_i32 = arith.constant 0 : i32
    %c0_i32_0 = arith.constant 0 : i32
    %c0_i32_1 = arith.constant 0 : i32
    return %arg0, %c0_i32, %c0_i32_0 : i32, i32, i32
  }
  func.func @transform_1(%arg0: i32) -> (i32, i32) {
    %c0_i32 = arith.constant 0 : i32
    %c0_i32_0 = arith.constant 0 : i32
    %c0_i32_1 = arith.constant 0 : i32
    return %c0_i32, %c0_i32_0 : i32, i32
  }
  func.func @transform_2(%arg0: i32) -> (i32, i32) {
    %c0_i32 = arith.constant 0 : i32
    %c0_i32_0 = arith.constant 0 : i32
    %c0_i32_1 = arith.constant 0 : i32
    return %c0_i32, %c0_i32_0 : i32, i32
  }
  func.func @transform_3(%arg0: i32) -> (i32, i32) {
    %c0_i32 = arith.constant 0 : i32
    %c0_i32_0 = arith.constant 0 : i32
    %c0_i32_1 = arith.constant 0 : i32
    return %c0_i32, %c0_i32_0 : i32, i32
  }
  func.func @transform_4(%arg0: i32) -> (i32, i32) {
    %c0_i32 = arith.constant 0 : i32
    %c0_i32_0 = arith.constant 0 : i32
    %c0_i32_1 = arith.constant 0 : i32
    return %c0_i32, %c0_i32_0 : i32, i32
  }
  func.func @transform_5(%arg0: i32) -> (i32, i32, i32) {
    %c0_i32 = arith.constant 0 : i32
    %c0_i32_0 = arith.constant 0 : i32
    %c0_i32_1 = arith.constant 0 : i32
    %c0_i32_2 = arith.constant 0 : i32
    return %c0_i32, %c0_i32_0, %c0_i32_1 : i32, i32, i32
  }
  func.func @transform_6(%arg0: i32) -> (i32, i32, i32) {
    %c0_i32 = arith.constant 0 : i32
    %c0_i32_0 = arith.constant 0 : i32
    %c0_i32_1 = arith.constant 0 : i32
    %c0_i32_2 = arith.constant 0 : i32
    return %c0_i32, %c0_i32_0, %c0_i32_1 : i32, i32, i32
  }
  func.func @transform_7(%arg0: i32) -> (i32, i32, i32) {
    %c0_i32 = arith.constant 0 : i32
    %c0_i32_0 = arith.constant 0 : i32
    %c0_i32_1 = arith.constant 0 : i32
    %c0_i32_2 = arith.constant 0 : i32
    return %c0_i32, %c0_i32_0, %c0_i32_1 : i32, i32, i32
  }
  func.func @transform_8(%arg0: i32) -> (i32, i32, i32) {
    %c0_i32 = arith.constant 0 : i32
    %c0_i32_0 = arith.constant 0 : i32
    %c0_i32_1 = arith.constant 0 : i32
    %c0_i32_2 = arith.constant 0 : i32
    return %c0_i32, %c0_i32_0, %c0_i32_1 : i32, i32, i32
  }
  func.func @transform_9(%arg0: i32) -> (i32, i32, i32) {
    %c0_i32 = arith.constant 0 : i32
    %c0_i32_0 = arith.constant 0 : i32
    %c0_i32_1 = arith.constant 0 : i32
    %c0_i32_2 = arith.constant 0 : i32
    return %c0_i32, %c0_i32_0, %c0_i32_1 : i32, i32, i32
  }
  func.func @transform_10(%arg0: i32) -> (i32, i32, i32) {
    %c0_i32 = arith.constant 0 : i32
    %c0_i32_0 = arith.constant 0 : i32
    %c0_i32_1 = arith.constant 0 : i32
    %c0_i32_2 = arith.constant 0 : i32
    return %c0_i32, %c0_i32_0, %c0_i32_1 : i32, i32, i32
  }
  func.func @transform_11(%arg0: i32) -> (i32, i32, i32) {
    %c0_i32 = arith.constant 0 : i32
    %c0_i32_0 = arith.constant 0 : i32
    %c0_i32_1 = arith.constant 0 : i32
    %c0_i32_2 = arith.constant 0 : i32
    return %c0_i32, %c0_i32_0, %c0_i32_1 : i32, i32, i32
  }
  func.func @transform_12(%arg0: i32) -> (i32, i32, i32) {
    %c0_i32 = arith.constant 0 : i32
    %c0_i32_0 = arith.constant 0 : i32
    %c0_i32_1 = arith.constant 0 : i32
    %c0_i32_2 = arith.constant 0 : i32
    return %c0_i32, %c0_i32_0, %c0_i32_1 : i32, i32, i32
  }
  func.func @transform_13(%arg0: i32) -> (i32, i32, i32) {
    %c0_i32 = arith.constant 0 : i32
    %c0_i32_0 = arith.constant 0 : i32
    %c0_i32_1 = arith.constant 0 : i32
    %c0_i32_2 = arith.constant 0 : i32
    return %c0_i32, %c0_i32_0, %c0_i32_1 : i32, i32, i32
  }
  func.func @transform_14(%arg0: i32) -> (i32, i32, i32) {
    %c0_i32 = arith.constant 0 : i32
    %c0_i32_0 = arith.constant 0 : i32
    %c0_i32_1 = arith.constant 0 : i32
    %c0_i32_2 = arith.constant 0 : i32
    return %c0_i32, %c0_i32_0, %c0_i32_1 : i32, i32, i32
  }
  func.func @transform_15(%arg0: i32) -> (i32, i32, i32) {
    %c0_i32 = arith.constant 0 : i32
    %c0_i32_0 = arith.constant 0 : i32
    %c0_i32_1 = arith.constant 0 : i32
    %c0_i32_2 = arith.constant 0 : i32
    return %c0_i32, %c0_i32_0, %c0_i32_1 : i32, i32, i32
  }
  func.func @transform_16(%arg0: i32) -> (i32, i32, i32) {
    %c0_i32 = arith.constant 0 : i32
    %c0_i32_0 = arith.constant 0 : i32
    %c0_i32_1 = arith.constant 0 : i32
    %c0_i32_2 = arith.constant 0 : i32
    return %c0_i32, %c0_i32_0, %c0_i32_1 : i32, i32, i32
  }
  func.func @transform_17(%arg0: i32) -> (i32, i32) {
    %c0_i32 = arith.constant 0 : i32
    %c0_i32_0 = arith.constant 0 : i32
    %c0_i32_1 = arith.constant 0 : i32
    return %c0_i32, %c0_i32_0 : i32, i32
  }
  func.func @transform_18(%arg0: i32) -> (i32, i32) {
    %c0_i32 = arith.constant 0 : i32
    %c0_i32_0 = arith.constant 0 : i32
    %c0_i32_1 = arith.constant 0 : i32
    return %c0_i32, %c0_i32_0 : i32, i32
  }
  func.func @transform_19(%arg0: i32) -> (i32, i32) {
    %c0_i32 = arith.constant 0 : i32
    %c0_i32_0 = arith.constant 0 : i32
    %c0_i32_1 = arith.constant 0 : i32
    return %c0_i32, %c0_i32_0 : i32, i32
  }
  func.func @transform_20(%arg0: i32) -> (i32, i32) {
    %c0_i32 = arith.constant 0 : i32
    %c0_i32_0 = arith.constant 0 : i32
    %c0_i32_1 = arith.constant 0 : i32
    return %c0_i32, %c0_i32_0 : i32, i32
  }
  func.func @transform_21(%arg0: i32) -> (i32, i32, i32) {
    %c0_i32 = arith.constant 0 : i32
    %c0_i32_0 = arith.constant 0 : i32
    %c0_i32_1 = arith.constant 0 : i32
    return %arg0, %c0_i32, %c0_i32_0 : i32, i32, i32
  }
}

</mosaic_0001>

<bundles_post_ra>
// kernel: _lambda_.1
= control target key start
LH: loop header
LB: loop body
LE: loop exit
PB: predicated region body
PF: predicated region fallthrough
CT: control target
= control target key end

     0   :  { %s6737_s0 = inlined_call_operand.vmem [shape: f32[2,16,48], index: 0, kind: input, shape index: {}]   ;;  %s6738_s1 = inlined_call_operand.vmem [shape: f32[48,64], index: 1, kind: input, shape index: {}]   ;;  %s6739_s2 = inlined_call_operand.vmem [shape: f32[1,64], index: 2, kind: input, shape index: {}, may-alias: {2,18}]   ;;  %s6740_s3 = inlined_call_operand.vmem [shape: f32[1,64], index: 3, kind: input, shape index: {}]   ;;  %s6741_s4 = inlined_call_operand.vmem [shape: f32[17,64], index: 4, kind: input, shape index: {}]   ;;  %s6742_s5 = inlined_call_operand.vmem [shape: f32[2,1,64], index: 5, kind: input, shape index: {}, may-alias: {5,11}]   ;;  %s6743_s6 = inlined_call_operand.vmem [shape: f32[2,1,64], index: 6, kind: input, shape index: {}, may-alias: {6,10,12,16}]   ;;  %s6744_s7 = inlined_call_operand.vmem [shape: f32[2,64,192], index: 7, kind: input, shape index: {}]   ;;  %s6745_s8 = inlined_call_operand.vmem [shape: f32[2,1,192], index: 8, kind: input, shape index: {}]   ;;  %s6746_s9 = inlined_call_operand.vmem [shape: f32[2,64,64], index: 9, kind: input, shape index: {}]   ;;  %s6747_s10 = inlined_call_operand.vmem [shape: f32[2,1,64], index: 10, kind: input, shape index: {}, may-alias: {6,10,12,16}]   ;;  %s6748_s11 = inlined_call_operand.vmem [shape: f32[2,1,64], index: 11, kind: input, shape index: {}, may-alias: {5,11}]   ;;  %s6749_s12 = inlined_call_operand.vmem [shape: f32[2,1,64], index: 12, kind: input, shape index: {}, may-alias: {6,10,12,16}]   ;;  %s6750_s13 = inlined_call_operand.vmem [shape: f32[2,64,128], index: 13, kind: input, shape index: {}]   ;;  %s6751_s14 = inlined_call_operand.vmem [shape: f32[2,1,128], index: 14, kind: input, shape index: {}]   ;;  %s6752_s15 = inlined_call_operand.vmem [shape: f32[2,128,64], index: 15, kind: input, shape index: {}]   ;;  %s6753_s16 = inlined_call_operand.vmem [shape: f32[2,1,64], index: 16, kind: input, shape index: {}, may-alias: {6,10,12,16}]   ;;  %s6754_s17 = inlined_call_operand.vmem [shape: f32[1,64], index: 17, kind: input, shape index: {}]   ;;  %s6755_s18 = inlined_call_operand.vmem [shape: f32[1,64], index: 18, kind: input, shape index: {}, may-alias: {2,18}]   ;;  %s6756_s19 = inlined_call_operand.vmem [shape: f32[64,384], index: 19, kind: input, shape index: {}]   ;;  %s6757_s20 = inlined_call_operand.vmem [shape: f32[1,384], index: 20, kind: input, shape index: {}]   ;;  %s6758_s21 = inlined_call_operand.vmem [shape: f32[2,1,384], index: 21, kind: output, shape index: {}]  }
   0x1   :  { %6777 = sst [smem:[#allocation2_spill]] %s6737_s0 }
   0x2   :  { %6778 = sst [smem:[#allocation3_spill]] %s6738_s1 }
   0x3   :  { %6779 = sst [smem:[#allocation4_spill]] %s6739_s2  ;;  %s5349_s2 = smov 0  }
   0x4   :  { %6780 = sst [smem:[#allocation5_spill]] %s6740_s3 }
   0x5   :  { %6781 = sst [smem:[#allocation6_spill]] %s6741_s4 }
   0x6   :  { %6782 = sst [smem:[#allocation7_spill]] %s6742_s5 }
   0x7 LB: > { %s4234_s25 = sadd.s32 4294967295, %s5227_s2   ;;  %p4238_p0 = scmp.ge.s32.totalorder %s5227_s2, 1  ;;  %s5227_s2 = sphi %s5349_s2, %s31_s2  }
   0x8   : > { %p587_p1 = scmp.lt.s32.totalorder %s5227_s2, 3 }
   0xa   : > { %p588_p2 = pnand %p4238_p0, %p587_p1 }
   0xb   : > { %s6783_s3 = sld [smem:[#allocation3_spill]] (!%p588_p2)  ;;  %p646_p3 = scmp.lt.s32.totalorder (!%p588_p2), %s4234_s25, 1 }
   0xc   : > { %591 = sbr.rel (%p588_p2) target bundleno = 5694 (0x163e), region = 104  ;;  %s6784_s24 = sld [smem:[#allocation2_spill]] (!%p588_p2) }
   0xd   : > { %s6785_s5 = sld [smem:[#allocation4_spill]] (!%p588_p2)  ;;  %s6774_s28 = smov (!%p588_p2), 48  }
   0xe   : > { %s6786_s1 = sld [smem:[#allocation6_spill]] (!%p588_p2)  ;;  %s6766_s29 = smov (!%p588_p2), 112  }
   0xf   : > { %s6787_s27 = sld [smem:[#allocation5_spill]] (!%p588_p2)  ;;  %s6772_s0 = smov (!%p588_p2), 32  }
  0x10   : > { %s6764_s4 = smov (!%p588_p2), 96   ;;  %s6770_s30 = smov (!%p588_p2), 16  }
  0x11   : > { %v662_v0 = vld [vmem:[%s6783_s3 + $0x28] sm:$0xff]  ;;  %v661_v1 = vld [vmem:[%s6783_s3 + $0x20] sm:$0xff]  ;;  %v660_v2 = vld [vmem:[%s6783_s3 + $0x18] sm:$0xff]  ;;  %s6797_s25 = smov (!%p646_p3, %s4234_s25), 1  ;;  %vm670_vm0 = vcmask 392192   ;;  %vm755_vm1 = vcmask 1040384  }
  0x12   : > { %4612 = vmatprep.subr.mxu0 %v662_v0  ;;  %v659_v3 = vld [vmem:[%s6783_s3 + $0x10] sm:$0xff]  ;;  %s4416_s22 = sshll.u32 %s6797_s25, 4  ;;  %v658_v4 = vld [vmem:[%s6783_s3 + $0x8] sm:$0xff]  ;;  %v657_v6 = vld [vmem:[%s6783_s3] sm:$0xff]  ;;  %vm778_vm2 = vcmask 516096   ;;  %vm771_vm3 = vcmask 523264  }
  0x13   : > { %4613 = vmatpush3.msra.mxu0 %v662_v0  ;;  %s650_s26 = scalar_lea.vmem %s6784_s24, %s4416_s22  ;;  %v4241_v8 = vld [vmem:[%s6785_s5] ss:$0 sm:$0xff]  ;;  %v846_v42 = vld [vmem:[%s6744_s7 + $0x78] sm:$0xff]  ;;  %v845_v43 = vld [vmem:[%s6744_s7 + $0x70] sm:$0xff]  ;;  %v5229_v47 = vmov 0.0   ;;  %s6788_s5 = sld [smem:[#allocation7_spill]] }
  0x14   : > { %4614 = vmatprep.subr.mxu0 %v661_v1  ;;  %v655_v5 = vld [vmem:[%s650_s26] sm:$0xff]  ;;  %v656_v7 = vld [vmem:[%s650_s26 + $0x8] sm:$0xff]  ;;  %v765_v11 = vld [vmem:[%s6786_s1 + $0x10] sm:$0x1]  ;;  %884 = vmatprep.subr.mxu1 %v846_v42  ;;  %vm5231_vm4 = vmmov 0   ;;  %s6762_s22 = smov 80  }
  0x15   : > { %4615 = vmatpush3.msra.mxu0 %v661_v1  ;;  %4624 = vmatprep.mubr.msk.f32.mxu0 %vm670_vm0, %v655_v5  ;;  %v752_v15 = vld [vmem:[%s6787_s27] sm:$0x1]  ;;  %v764_v22 = vld [vmem:[%s6786_s1 + $0x8] sm:$0xff]  ;;  %v842_v46 = vld [vmem:[%s6744_s7 + $0x58] sm:$0xff]  ;;  %s6768_s27 = smov 64   ;;  %vm960_vm5 = vcmask 130048  }
  0x16   : > { %4616 = vmatprep.subr.mxu0 %v660_v2  ;;  %v763_v18 = vld [vmem:[%s6786_s1] sm:$0xff]  ;;  %v844_v44 = vld [vmem:[%s6744_s7 + $0x68] sm:$0xff]  ;;  %885 = vmatpush1.msra.mxu1 %v845_v43  ;;  %v841_v48 = vld [vmem:[%s6744_s7 + $0x50] sm:$0xff]  ;;  %vm1056_vm6 = vcmask 138240   ;;  %vm1063_vm7 = vcmask 131072   ;;  %vm1941_vm8 = vcmask 261120  }
  0x17   : > { %4617 = vmatpush3.msra.mxu0 %v660_v2  ;;  %v843_v45 = vld [vmem:[%s6744_s7 + $0x60] sm:$0xff]  ;;  %932 = vmatprep.mubr.f32.mxu1 %v5229_v47  ;;  %v840_v49 = vld [vmem:[%s6744_s7 + $0x48] sm:$0xff]  ;;  %v838_v51 = vld [vmem:[%s6744_s7 + $0x38] sm:$0xff]  ;;  %s6790_s1 = smov 64   ;;  %s6793_s23 = smov 112  }
  0x18   : > { %4618 = vmatprep.subr.mxu0 %v659_v3  ;;  %886 = vmatprep.subr.mxu1 %v844_v44  ;;  %v839_v50 = vld [vmem:[%s6744_s7 + $0x40] sm:$0xff]  ;;  %v837_v52 = vld [vmem:[%s6744_s7 + $0x30] sm:$0xff]  ;;  %v836_v53 = vld [vmem:[%s6744_s7 + $0x28] sm:$0xff]  ;;  %s6794_s24 = smov 96  }
  0x19   : > { %4619 = vmatpush3.msra.mxu0 %v659_v3  ;;  %887 = vmatpush1.msra.mxu1 %v843_v45  ;;  %v835_v54 = vld [vmem:[%s6744_s7 + $0x20] sm:$0xff]  ;;  %v834_v55 = vld [vmem:[%s6744_s7 + $0x18] sm:$0xff]  ;;  %v833_v56 = vld [vmem:[%s6744_s7 + $0x10] sm:$0xff] }
  0x1a   : > { %4620 = vmatprep.subr.mxu0 %v658_v4  ;;  %888 = vmatprep.subr.mxu1 %v842_v46  ;;  %v832_v57 = vld [vmem:[%s6744_s7 + $0x8] sm:$0xff]  ;;  %v831_v58 = vld [vmem:[%s6744_s7] sm:$0xff] }
  0x1b   : > { %4621 = vmatpush3.msra.mxu0 %v658_v4  ;;  %889 = vmatpush1.msra.mxu1 %v841_v48  ;;  %v4244_v5 = vld [vmem:[%s6788_s5] ss:$0 sm:$0xff] }
  0x1c   : > { %4622 = vmatprep.subr.mxu0 %v657_v6  ;;  %890 = vmatprep.subr.mxu1 %v840_v49 }
  0x1d   : > { %4623 = vmatpush3.msra.mxu0 %v657_v6  ;;  %891 = vmatpush1.msra.mxu1 %v839_v50 }
  0x1e   : > { %4625 = vmatmul.mubr.msk.f32.vlgmr.msra.gmra.mxu0 %vm670_vm0, %v656_v7  ;;  %4627 = vmatprep.subr.mxu0 %v5229_v47  ;;  %v4245_v7 = vld [vmem:[%s6743_s6] ss:$0 sm:$0xff] }
  0x1f   : > { %892 = vmatprep.subr.mxu1 %v838_v51  ;;  %4633 = vmatprep.mubr.msk.f32.mxu0 %vm5231_vm4, %v5229_v47 }
  0x20   : > { %893 = vmatpush1.msra.mxu1 %v837_v52 }
  0x21   : > { %894 = vmatprep.subr.mxu1 %v836_v53 }
  0x22   : > { %895 = vmatpush1.msra.mxu1 %v835_v54 }
  0x23   : > { %896 = vmatprep.subr.mxu1 %v834_v55 }
  0x24   : > { %897 = vmatpush1.msra.mxu1 %v833_v56 }
  0x25   : > { %898 = vmatprep.subr.mxu1 %v832_v57 }
  0x26   : > { %899 = vmatpush1.msra.mxu1 %v831_v58 }
  0x27   : > { %4642 = vmatprep.subr.mxu1 %v5229_v47 }
  0xde   : > { %v4626_v9 = vpop.f32.mrf.mxu0 }
  0xdf   : > { %v749_v10 = vadd.f32 %v4626_v9, %v4241_v8 }
  0xe0   : > { %v743_v12 = vpop.f32.mrf.mxu0 }
  0xe1   : > { %v757_v13 = vrot.slane %v749_v10, 7  ;;  %v744_v14 = vadd.f32 %v4241_v8, %v743_v12 }
  0xe3   : > { %v5392_v16 = vadd.f32 %v765_v11, %v757_v13  ;;  %v756_v17 = vrot.slane %v744_v14, 7 }
  0xe5   : > { %v758_v19 = vsel %vm755_vm1, %v756_v17, %v757_v13  ;;  %v779_v20 = vsel %vm778_vm2, %v5392_v16, 0.0  ;;  %v762_v21 = vsel %vm755_vm1, %v752_v15, %v756_v17 }
  0xe6   : > { %780 = vadd.xlane.f32.xlu1 %v779_v20  ;;  %v5404_v23 = vadd.f32 %v763_v18, %v762_v21  ;;  %v5408_v25 = vadd.f32 %v764_v22, %v758_v19  ;;  %v849_v19 = vlaneseq }
  0xe8   : > { %v772_v24 = vsel %vm771_vm3, %v5404_v23, 0.0  ;;  %v775_v26 = vsel %vm771_vm3, %v5408_v25, 0.0  ;;  %v5496_v20 = vshrl.u32 %v849_v19, 7  ;;  %vm4178_vm9 = vcmp.lt.s32.totalorder %v849_v19, 384 }
  0xe9   : > { %773 = vadd.xlane.f32.xlu0 %v772_v24  ;;  %v847_v24 = vld [vmem:[%s6745_s8] sm:$0x3] }
  0xea   : > { %v5499_v21 = vsub.s32 0, %v5496_v20 }
  0xed   : > { %776 = vadd.xlane.f32.xlu0 %v775_v26 }
 0x16f   : > { %v781_v27 = vpop.xlane.xlu1 %780 }
 0x170   : > { %v785_v28 = vmul.f32 0.015625, %v781_v27  ;;  %v852_v27 = vrot.slane %v847_v24, %v5499_v21 }
 0x172   : > { %v774_v29 = vpop.xlane.xlu0 %773  ;;  %v5413_v31 = vsub.f32 %v5392_v16, %v785_v28 }
 0x173   : > { %v783_v30 = vmul.f32 0.015625, %v774_v29  ;;  %v5506_v29 = vsub.s32 1, %v5496_v20 }
 0x174   : > { %v791_v38 = vmul.f32 %v5413_v31, %v5413_v31 }
 0x175   : > { %v5416_v32 = vsub.f32 %v5404_v23, %v783_v30 }
 0x176   : > { %v777_v33 = vpop.xlane.xlu0 %776  ;;  %v798_v40 = vsel %vm778_vm2, %v791_v38, 0.0 }
 0x177   : > { %v784_v34 = vmul.f32 0.015625, %v777_v33  ;;  %v789_v35 = vmul.f32 %v5416_v32, %v5416_v32 }
 0x179   : > { %v5421_v36 = vsub.f32 %v5408_v25, %v784_v34  ;;  %v792_v37 = vsel %vm771_vm3, %v789_v35, 0.0  ;;  %v856_v34 = vrot.slane %v847_v24, %v5506_v29 }
 0x17a   : > { %793 = vadd.xlane.f32.xlu1 %v792_v37 }
 0x17b   : > { %v790_v39 = vmul.f32 %v5421_v36, %v5421_v36 }
 0x17d   : > { %v795_v41 = vsel %vm771_vm3, %v790_v39, 0.0 }
 0x17e   : > { %799 = vadd.xlane.f32.xlu1 %v798_v40  ;;  %796 = vadd.xlane.f32.xlu0 %v795_v41 }
 0x203   : > { %v794_v59 = vpop.xlane.xlu1 %793 }
 0x204   : > { %v801_v60 = vmul.f32 0.015625, %v794_v59 }
 0x206   : > { %v804_v61 = vadd.f32 1e-06, %v801_v60 }
 0x207   : > { %v800_v62 = vpop.xlane.xlu1 %799  ;;  %v797_v63 = vpop.xlane.xlu0 %796 }
 0x208   : > { %5087 = vrsqrt.f32 %v804_v61  ;;  %v803_v0 = vmul.f32 0.015625, %v800_v62  ;;  %v802_v1 = vmul.f32 0.015625, %v797_v63 }
 0x20a   : > { %v806_v2 = vadd.f32 1e-06, %v803_v0  ;;  %v805_v3 = vadd.f32 1e-06, %v802_v1 }
 0x20c   : > { %5089 = vrsqrt.f32 %v806_v2 }
 0x20d   : > { %5091 = vrsqrt.f32 %v805_v3 }
 0x215   : > { %v5088_v4 = vpop.eup %5087 }
 0x216   : > { %v810_v6 = vmul.f32 %v5088_v4, %v5416_v32 }
 0x218   : > { %v819_v8 = vmul.f32 %v4244_v5, %v810_v6 }
 0x219   : > { %v5090_v9 = vpop.eup %5089 }
 0x21a   : > { %v5092_v10 = vpop.eup %5091  ;;  %v828_v11 = vadd.f32 %v4245_v7, %v819_v8  ;;  %v812_v13 = vmul.f32 %v5090_v9, %v5413_v31 }
 0x21b   : > { %v811_v12 = vmul.f32 %v5092_v10, %v5421_v36 }
 0x21c   : > { %4246 = vmatmul.mubr.msk.f32.vlgmr.msra.gmra.mxu1 %vm771_vm3, %v828_v11  ;;  %v821_v17 = vmul.f32 %v4244_v5, %v812_v13 }
 0x21d   : > { %938 = vmatprep.mubr.f32.mxu1 %v5229_v47  ;;  %v820_v14 = vmul.f32 %v4244_v5, %v811_v12 }
 0x21e   : > { %v830_v18 = vadd.f32 %v4245_v7, %v821_v17 }
 0x21f   : > { %v829_v15 = vadd.f32 %v4245_v7, %v820_v14 }
 0x221   : > { %4247 = vmatmul.mubr.msk.f32.gmra.mxu1 %vm771_vm3, %v829_v15 }
 0x222   : > { %944 = vmatprep.mubr.f32.mxu1 %v5229_v47 }
 0x225   : > { %4248 = vmatmul.mubr.msk.f32.gmra.mxu1 %vm771_vm3, %v830_v18 }
 0x226   : > { %4648 = vmatprep.mubr.msk.f32.mxu1 %vm5231_vm4, %v5229_v47 }
 0x2dc   : > { %v934_v22 = vpop.f32.mrf.mxu1 }
 0x2dd   : > { %v935_v33 = vadd.f32 %v934_v22, %v852_v27 }
 0x2de   : > { %v936_v26 = vpop.f32.mrf.mxu1 }
 0x2df   : > { %v5529_v39 = vadd.f32 %v936_v26, %v856_v34 }
 0x2e1   : > { %v940_v28 = vpop.f32.mrf.mxu1 }
 0x2e2   : > { %v5508_v30 = vadd.f32 %v940_v28, %v852_v27 }
 0x2e3   : > { %v942_v31 = vpop.f32.mrf.mxu1 }
 0x2e4   : > { %956 = vrot.lane.b32.xlu1 %v5508_v30, %s6768_s27  ;;  %v5524_v38 = vadd.f32 %v942_v31, %v856_v34 }
 0x2e5   : > { %v946_v32 = vpop.f32.mrf.mxu1 }
 0x2e6   : > { %v5517_v35 = vadd.f32 %v946_v32, %v852_v27 }
 0x2e7   : > { %v948_v36 = vpop.f32.mrf.mxu1 }
 0x2e8   : > { %v5519_v37 = vadd.f32 %v948_v36, %v856_v34  ;;  %958 = vrot.lane.b32.xlu0 %v5517_v35, %s6768_s27  ;;  %954 = vrot.lane.b32.xlu1 %v935_v33, %s6768_s27  ;;  %s6795_s27 = smov 80  }
 0x2ea   : > { %4643 = vmatpush3.msk.msra.mxu1 %vm755_vm1, %v5519_v37 }
 0x2eb   : > { %4644 = vmatprep.subr.mxu1 %v5229_v47 }
 0x2ec   : > { %4645 = vmatpush3.msra.mxu1 %v5524_v38  ;;  %1191 = vrot.lane.b32.xlu0 %v5508_v30, %s6774_s28 }
 0x2ed   : > { %1193 = vrot.lane.b32.xlu1 %v5517_v35, %s6774_s28  ;;  %4646 = vmatprep.subr.mxu1 %v5229_v47 }
 0x2ee   : > { %4647 = vmatpush3.msra.mxu1 %v5529_v39 }
 0x2ef   : > { %4672 = vmatprep.subr.mxu1 %v5229_v47 }
 0x2f0   : > { %1183 = vrot.lane.b32.xlu0 %v935_v33, %s6766_s29 }
 0x2f1   : > { %1189 = vrot.lane.b32.xlu1 %v935_v33, %s6774_s28 }
 0x2f4   : > { %1185 = vrot.lane.b32.xlu0 %v5508_v30, %s6766_s29 }
 0x2f5   : > { %1434 = vrot.lane.b32.xlu1 %v5517_v35, %s6772_s0 }
 0x2f8   : > { %1187 = vrot.lane.b32.xlu0 %v5517_v35, %s6766_s29 }
 0x2f9   : > { %1432 = vrot.lane.b32.xlu1 %v5508_v30, %s6772_s0 }
 0x2fc   : > { %1424 = vrot.lane.b32.xlu0 %v935_v33, %s6764_s4 }
 0x2fd   : > { %1430 = vrot.lane.b32.xlu1 %v935_v33, %s6772_s0 }
 0x300   : > { %1426 = vrot.lane.b32.xlu0 %v5508_v30, %s6764_s4 }
 0x301   : > { %1673 = vrot.lane.b32.xlu1 %v5517_v35, %s6770_s30 }
 0x304   : > { %1428 = vrot.lane.b32.xlu0 %v5517_v35, %s6764_s4 }
 0x305   : > { %1671 = vrot.lane.b32.xlu1 %v5508_v30, %s6770_s30 }
 0x308   : > { %1663 = vrot.lane.b32.xlu0 %v935_v33, %s6762_s22 }
 0x309   : > { %1669 = vrot.lane.b32.xlu1 %v935_v33, %s6770_s30 }
 0x30c   : > { %1667 = vrot.lane.b32.xlu0 %v5517_v35, %s6762_s22 }
 0x30d   : > { %1665 = vrot.lane.b32.xlu1 %v5508_v30, %s6762_s22 }
 0x310   : > { %1329 = vrot.lane.b32.xlu0 %v5519_v37, %s6766_s29 }
 0x311   : > { %1327 = vrot.lane.b32.xlu1 %v5524_v38, %s6766_s29 }
 0x315   : > { %1325 = vrot.lane.b32.xlu1 %v5529_v39, %s6766_s29 }
 0x356   : > { %v957_v40 = vpop.permute.xlu1 %956 }
 0x35a   : > { %v959_v41 = vpop.permute.xlu0 %958  ;;  %v955_v42 = vpop.permute.xlu1 %954 }
 0x35b   : > { %4628 = vmatpush3.xpose.msk.msra.mxu0 %vm960_vm5, %v959_v41 }
 0x35c   : > { %4629 = vmatprep.subr.mxu0 %v5229_v47 }
 0x35e   : > { %v1192_v43 = vpop.permute.xlu0 %1191 }
 0x35f   : > { %v1194_v44 = vpop.permute.xlu1 %1193  ;;  %4630 = vmatpush3.xpose.msk.msra.mxu0 %vm960_vm5, %v957_v40 }
 0x360   : > { %4631 = vmatprep.subr.mxu0 %v5229_v47 }
 0x362   : > { %v1184_v46 = vpop.permute.xlu0 %1183 }
 0x363   : > { %v1190_v45 = vpop.permute.xlu1 %1189  ;;  %4632 = vmatpush3.xpose.msk.msra.mxu0 %vm960_vm5, %v955_v42 }
 0x364   : > { %4657 = vmatprep.subr.mxu0 %v5229_v47 }
 0x366   : > { %4634 = vmatmul.mubr.msk.f32.vlgmr.msra.gmra.mxu0 %vm960_vm5, %v935_v33  ;;  %v1186_v49 = vpop.permute.xlu0 %1185 }
 0x367   : > { %4658 = vmatpush3.xpose.msk.msra.mxu0 %vm960_vm5, %v1194_v44  ;;  %4636 = vmatprep.mubr.msk.f32.mxu0 %vm5231_vm4, %v5229_v47  ;;  %v1435_v48 = vpop.permute.xlu1 %1434 }
 0x368   : > { %4659 = vmatprep.subr.mxu0 %v5229_v47 }
 0x36a   : > { %4637 = vmatmul.mubr.msk.f32.gmra.mxu0 %vm960_vm5, %v5508_v30  ;;  %v1188_v51 = vpop.permute.xlu0 %1187 }
 0x36b   : > { %4660 = vmatpush3.xpose.msk.msra.mxu0 %vm960_vm5, %v1192_v43  ;;  %4639 = vmatprep.mubr.msk.f32.mxu0 %vm5231_vm4, %v5229_v47  ;;  %v1433_v50 = vpop.permute.xlu1 %1432 }
 0x36c   : > { %4661 = vmatprep.subr.mxu0 %v5229_v47 }
 0x36e   : > { %4640 = vmatmul.mubr.msk.f32.gmra.mxu0 %vm960_vm5, %v5517_v35  ;;  %v1425_v53 = vpop.permute.xlu0 %1424 }
 0x36f   : > { %4662 = vmatpush3.xpose.msk.msra.mxu0 %vm960_vm5, %v1190_v45  ;;  %4663 = vmatprep.mubr.msk.f32.mxu0 %vm5231_vm4, %v5229_v47  ;;  %v1431_v52 = vpop.permute.xlu1 %1430 }
 0x370   : > { %4687 = vmatprep.subr.mxu0 %v5229_v47 }
 0x372   : > { %4664 = vmatmul.mubr.msk.f32.vlgmr.msra.gmra.mxu0 %vm960_vm5, %v1184_v46  ;;  %v1427_v55 = vpop.permute.xlu0 %1426 }
 0x373   : > { %4688 = vmatpush3.xpose.msk.msra.mxu0 %vm960_vm5, %v1435_v48  ;;  %4666 = vmatprep.mubr.msk.f32.mxu0 %vm5231_vm4, %v5229_v47  ;;  %v1674_v54 = vpop.permute.xlu1 %1673 }
 0x374   : > { %4689 = vmatprep.subr.mxu0 %v5229_v47 }
 0x376   : > { %4667 = vmatmul.mubr.msk.f32.gmra.mxu0 %vm960_vm5, %v1186_v49  ;;  %v1429_v57 = vpop.permute.xlu0 %1428 }
 0x377   : > { %4690 = vmatpush3.xpose.msk.msra.mxu0 %vm960_vm5, %v1433_v50  ;;  %4669 = vmatprep.mubr.msk.f32.mxu0 %vm5231_vm4, %v5229_v47  ;;  %v1672_v56 = vpop.permute.xlu1 %1671 }
 0x378   : > { %4691 = vmatprep.subr.mxu0 %v5229_v47 }
 0x37a   : > { %4670 = vmatmul.mubr.msk.f32.gmra.mxu0 %vm960_vm5, %v1188_v51  ;;  %v1664_v59 = vpop.permute.xlu0 %1663 }
 0x37b   : > { %4692 = vmatpush3.xpose.msk.msra.mxu0 %vm960_vm5, %v1431_v52  ;;  %4693 = vmatprep.mubr.msk.f32.mxu0 %vm5231_vm4, %v5229_v47  ;;  %v1670_v58 = vpop.permute.xlu1 %1669 }
 0x37c   : > { %4717 = vmatprep.subr.mxu0 %v5229_v47 }
 0x37e   : > { %4694 = vmatmul.mubr.msk.f32.vlgmr.msra.gmra.mxu0 %vm960_vm5, %v1425_v53  ;;  %v1668_v61 = vpop.permute.xlu0 %1667 }
 0x37f   : > { %4718 = vmatpush3.xpose.msk.msra.mxu0 %vm960_vm5, %v1674_v54  ;;  %4696 = vmatprep.mubr.msk.f32.mxu0 %vm5231_vm4, %v5229_v47  ;;  %v1666_v60 = vpop.permute.xlu1 %1665 }
 0x380   : > { %4719 = vmatprep.subr.mxu0 %v5229_v47 }
 0x382   : > { %4697 = vmatmul.mubr.msk.f32.gmra.mxu0 %vm960_vm5, %v1427_v55 }
 0x383   : > { %4720 = vmatpush3.xpose.msk.msra.mxu0 %vm960_vm5, %v1672_v56  ;;  %4699 = vmatprep.mubr.msk.f32.mxu0 %vm5231_vm4, %v5229_v47 }
 0x384   : > { %4721 = vmatprep.subr.mxu0 %v5229_v47 }
 0x386   : > { %4700 = vmatmul.mubr.msk.f32.gmra.mxu0 %vm960_vm5, %v1429_v57  ;;  %v5685_v57 = vpop.permute.xlu1 %1327 }
 0x387   : > { %4722 = vmatpush3.xpose.msk.msra.mxu0 %vm960_vm5, %v1670_v58  ;;  %4723 = vmatprep.mubr.msk.f32.mxu0 %vm5231_vm4, %v5229_v47 }
 0x388   : > { %4747 = vmatprep.subr.mxu0 %v5229_v47 }
 0x38a   : > { %4724 = vmatmul.mubr.msk.f32.vlgmr.msra.gmra.mxu0 %vm960_vm5, %v1664_v59  ;;  %v5687_v58 = vpop.permute.xlu1 %1325  ;;  %v5689_v59 = vpop.permute.xlu0 %1329 }
 0x38b   : > { %4726 = vmatprep.mubr.msk.f32.mxu0 %vm5231_vm4, %v5229_v47 }
 0x38e   : > { %4727 = vmatmul.mubr.msk.f32.gmra.mxu0 %vm960_vm5, %v1666_v60 }
 0x38f   : > { %4729 = vmatprep.mubr.msk.f32.mxu0 %vm5231_vm4, %v5229_v47 }
 0x392   : > { %4730 = vmatmul.mubr.msk.f32.gmra.mxu0 %vm960_vm5, %v1668_v61 }
 0x393   : > { %4763 = vmatprep.mubr.msk.f32.mxu0 %vm5231_vm4, %v5229_v47 }
 0x426   : > { %v1039_v62 = vpop.f32.mrf.mxu0 }
 0x427   : > { %v5633_v63 = vmul.f32 0.25, %v1039_v62 }
 0x428   : > { %v4635_v0 = vpop.f32.mrf.mxu0 }
 0x429   : > { %v1057_v1 = vsel %vm1056_vm6, %v5633_v63, -inf }
 0x42a   : > { %1058 = vmax.xlane.f32.xlu1 %v1057_v1  ;;  %v1044_v2 = vpop.f32.mrf.mxu0 }
 0x42b   : > { %v5637_v3 = vmul.f32 0.25, %v1044_v2 }
 0x42c   : > { %v4638_v4 = vpop.f32.mrf.mxu0 }
 0x42d   : > { %v1060_v5 = vsel %vm1056_vm6, %v5637_v3, -inf }
 0x42e   : > { %1061 = vmax.xlane.f32.xlu0 %v1060_v5  ;;  %v1049_v6 = vpop.f32.mrf.mxu0 }
 0x42f   : > { %v5641_v7 = vmul.f32 0.25, %v1049_v6 }
 0x430   : > { %v4641_v8 = vpop.f32.mrf.mxu0 }
 0x431   : > { %v1064_v9 = vsel %vm1063_vm7, %v5641_v7, -inf }
 0x432   : > { %1065 = vmax.xlane.f32.xlu0 %v1064_v9  ;;  %v1273_v10 = vpop.f32.mrf.mxu0 }
 0x433   : > { %v5645_v11 = vmul.f32 0.25, %v1273_v10 }
 0x434   : > { %v4665_v12 = vpop.f32.mrf.mxu0 }
 0x435   : > { %v1290_v13 = vsel %vm1056_vm6, %v5645_v11, -inf }
 0x436   : > { %1291 = vmax.xlane.f32.xlu0 %v1290_v13  ;;  %v1278_v14 = vpop.f32.mrf.mxu0 }
 0x437   : > { %v5649_v15 = vmul.f32 0.25, %v1278_v14 }
 0x438   : > { %v4668_v17 = vpop.f32.mrf.mxu0 }
 0x439   : > { %v1293_v18 = vsel %vm1056_vm6, %v5649_v15, -inf }
 0x43a   : > { %1294 = vmax.xlane.f32.xlu1 %v1293_v18  ;;  %v1283_v22 = vpop.f32.mrf.mxu0 }
 0x43b   : > { %v5653_v24 = vmul.f32 0.25, %v1283_v22 }
 0x43c   : > { %v4671_v26 = vpop.f32.mrf.mxu0 }
 0x43d   : > { %v1296_v27 = vsel %vm1063_vm7, %v5653_v24, -inf }
 0x43e   : > { %1297 = vmax.xlane.f32.xlu0 %v1296_v27  ;;  %v1514_v28 = vpop.f32.mrf.mxu0 }
 0x43f   : > { %v5657_v30 = vmul.f32 0.25, %v1514_v28 }
 0x440   : > { %v4695_v31 = vpop.f32.mrf.mxu0 }
 0x441   : > { %v1531_v32 = vsel %vm1056_vm6, %v5657_v30, -inf }
 0x442   : > { %1532 = vmax.xlane.f32.xlu1 %v1531_v32  ;;  %v1519_v33 = vpop.f32.mrf.mxu0 }
 0x443   : > { %v5661_v34 = vmul.f32 0.25, %v1519_v33 }
 0x444   : > { %v4698_v35 = vpop.f32.mrf.mxu0 }
 0x445   : > { %v1534_v36 = vsel %vm1056_vm6, %v5661_v34, -inf }
 0x446   : > { %1535 = vmax.xlane.f32.xlu0 %v1534_v36  ;;  %v1524_v40 = vpop.f32.mrf.mxu0 }
 0x447   : > { %v5665_v41 = vmul.f32 0.25, %v1524_v40 }
 0x448   : > { %v4701_v42 = vpop.f32.mrf.mxu0 }
 0x449   : > { %v1537_v43 = vsel %vm1063_vm7, %v5665_v41, -inf }
 0x44a   : > { %1538 = vmax.xlane.f32.xlu1 %v1537_v43  ;;  %v1753_v44 = vpop.f32.mrf.mxu0 }
 0x44b   : > { %v5669_v45 = vmul.f32 0.25, %v1753_v44 }
 0x44c   : > { %v4725_v46 = vpop.f32.mrf.mxu0 }
 0x44d   : > { %v1770_v48 = vsel %vm1056_vm6, %v5669_v45, -inf }
 0x44e   : > { %1771 = vmax.xlane.f32.xlu0 %v1770_v48  ;;  %v1758_v49 = vpop.f32.mrf.mxu0 }
 0x44f   : > { %v5673_v50 = vmul.f32 0.25, %v1758_v49 }
 0x450   : > { %v4728_v51 = vpop.f32.mrf.mxu0 }
 0x451   : > { %v1773_v52 = vsel %vm1056_vm6, %v5673_v50, -inf }
 0x452   : > { %1774 = vmax.xlane.f32.xlu1 %v1773_v52  ;;  %v1763_v53 = vpop.f32.mrf.mxu0 }
 0x453   : > { %v5677_v54 = vmul.f32 0.25, %v1763_v53 }
 0x454   : > { %v4731_v55 = vpop.f32.mrf.mxu0 }
 0x455   : > { %v1776_v56 = vsel %vm1063_vm7, %v5677_v54, -inf }
 0x456   : > { %1777 = vmax.xlane.f32.xlu0 %v1776_v56 }
 0x463   : > { %1566 = vrot.lane.b32.xlu1 %v5524_v38, %s6764_s4 }
 0x46c   : > { %1568 = vrot.lane.b32.xlu0 %v5519_v37, %s6764_s4 }
 0x4b3   : > { %v1059_v60 = vpop.xlane.xlu1 %1058 }
 0x4b4   : > { %v1067_v61 = vsub.f32 %v5633_v63, %v1059_v60 }
 0x4b6   : > { %v1070_v62 = vmul.f32 1.442695, %v1067_v61 }
 0x4b7   : > { %v1062_v0 = vpop.xlane.xlu0 %1061 }
 0x4b8   : > { %5093 = vpow2.f32 %v1070_v62  ;;  %v1068_v1 = vsub.f32 %v5637_v3, %v1062_v0 }
 0x4ba   : > { %v1072_v2 = vmul.f32 1.442695, %v1068_v1 }
 0x4bb   : > { %v1066_v4 = vpop.xlane.xlu0 %1065 }
 0x4bc   : > { %5095 = vpow2.f32 %v1072_v2  ;;  %v1069_v5 = vsub.f32 %v5641_v7, %v1066_v4 }
 0x4be   : > { %v1074_v6 = vmul.f32 1.442695, %v1069_v5 }
 0x4bf   : > { %v1292_v8 = vpop.xlane.xlu0 %1291 }
 0x4c0   : > { %5097 = vpow2.f32 %v1074_v6  ;;  %v1299_v9 = vsub.f32 %v5645_v11, %v1292_v8 }
 0x4c2   : > { %v1302_v10 = vmul.f32 1.442695, %v1299_v9 }
 0x4c3   : > { %v1295_v12 = vpop.xlane.xlu1 %1294 }
 0x4c4   : > { %5099 = vpow2.f32 %v1302_v10  ;;  %v1300_v63 = vsub.f32 %v5649_v15, %v1295_v12 }
 0x4c5   : > { %v5696_v13 = vpop.eup %5093 }
 0x4c6   : > { %v1304_v14 = vmul.f32 1.442695, %v1300_v63  ;;  %v1076_v3 = vsel %vm1056_vm6, %v5696_v13, 0.0 }
 0x4c7   : > { %v1298_v17 = vpop.xlane.xlu0 %1297  ;;  %1077 = vadd.xlane.f32.xlu1 %v1076_v3 }
 0x4c8   : > { %5101 = vpow2.f32 %v1304_v14  ;;  %v1301_v7 = vsub.f32 %v5653_v24, %v1298_v17 }
 0x4c9   : > { %v5701_v18 = vpop.eup %5095 }
 0x4ca   : > { %v1306_v22 = vmul.f32 1.442695, %v1301_v7  ;;  %v1079_v11 = vsel %vm1056_vm6, %v5701_v18, 0.0 }
 0x4cb   : > { %1080 = vadd.xlane.f32.xlu0 %v1079_v11  ;;  %v1533_v35 = vpop.xlane.xlu1 %1532 }
 0x4cc   : > { %5103 = vpow2.f32 %v1306_v22  ;;  %v1540_v36 = vsub.f32 %v5657_v30, %v1533_v35 }
 0x4cd   : > { %v5705_v15 = vpop.eup %5097 }
 0x4ce   : > { %v1082_v26 = vsel %vm1063_vm7, %v5705_v15, 0.0  ;;  %v1543_v44 = vmul.f32 1.442695, %v1540_v36 }
 0x4cf   : > { %1083 = vadd.xlane.f32.xlu1 %v1082_v26  ;;  %v1536_v40 = vpop.xlane.xlu0 %1535 }
 0x4d0   : > { %v1541_v43 = vsub.f32 %v5661_v34, %v1536_v40  ;;  %5105 = vpow2.f32 %v1543_v44 }
 0x4d1   : > { %v5709_v27 = vpop.eup %5099 }
 0x4d2   : > { %v1308_v28 = vsel %vm1056_vm6, %v5709_v27, 0.0  ;;  %v1545_v51 = vmul.f32 1.442695, %v1541_v43 }
 0x4d3   : > { %1309 = vadd.xlane.f32.xlu0 %v1308_v28  ;;  %v1539_v42 = vpop.xlane.xlu1 %1538 }
 0x4d4   : > { %v1542_v46 = vsub.f32 %v5665_v41, %v1539_v42  ;;  %5107 = vpow2.f32 %v1545_v51 }
 0x4d5   : > { %v5713_v24 = vpop.eup %5101 }
 0x4d6   : > { %v1311_v31 = vsel %vm1056_vm6, %v5713_v24, 0.0 }
 0x4d7   : > { %1312 = vadd.xlane.f32.xlu1 %v1311_v31  ;;  %v1772_v48 = vpop.xlane.xlu0 %1771 }
 0x4d8   : > { %v1779_v52 = vsub.f32 %v5669_v45, %v1772_v48 }
 0x4d9   : > { %v5717_v32 = vpop.eup %5103 }
 0x4da   : > { %v1314_v33 = vsel %vm1063_vm7, %v5717_v32, 0.0  ;;  %v1782_v56 = vmul.f32 1.442695, %v1779_v52 }
 0x4db   : > { %1315 = vadd.xlane.f32.xlu0 %v1314_v33  ;;  %v1775_v49 = vpop.xlane.xlu1 %1774 }
 0x4dc   : > { %v1780_v53 = vsub.f32 %v5673_v50, %v1775_v49 }
 0x4dd   : > { %v5731_v41 = vpop.eup %5105 }
 0x4de   : > { %v1784_v30 = vmul.f32 1.442695, %v1780_v53  ;;  %v1549_v45 = vsel %vm1056_vm6, %v5731_v41, 0.0 }
 0x4df   : > { %v1778_v55 = vpop.xlane.xlu0 %1777  ;;  %v1567_v8 = vpop.permute.xlu1 %1566 }
 0x4e0   : > { %v1781_v60 = vsub.f32 %v5677_v54, %v1778_v55 }
 0x4e1   : > { %v5733_v61 = vpop.eup %5107 }
 0x4e2   : > { %v1786_v34 = vmul.f32 1.442695, %v1781_v60  ;;  %v1552_v0 = vsel %vm1056_vm6, %v5733_v61, 0.0 }
 0x4e3   : > { %v1569_v9 = vpop.permute.xlu0 %1568 }
 0x4e8   : > { %1807 = vrot.lane.b32.xlu1 %v5519_v37, %s6762_s22  ;;  %v1547_v37 = vmul.f32 1.442695, %v1542_v46 }
 0x4ea   : > { %5109 = vpow2.f32 %v1547_v37 }
 0x4eb   : > { %5111 = vpow2.f32 %v1782_v56 }
 0x4ec   : > { %5113 = vpow2.f32 %v1784_v30 }
 0x4ed   : > { %5115 = vpow2.f32 %v1786_v34 }
 0x4f1   : > { %1564 = vrot.lane.b32.xlu0 %v5529_v39, %s6764_s4  ;;  %s6789_s4 = smov 16  }
 0x4f7   : > { %v5737_v62 = vpop.eup %5109 }
 0x4f8   : > { %v5739_v50 = vpop.eup %5111  ;;  %v1555_v54 = vsel %vm1063_vm7, %v5737_v62, 0.0 }
 0x4f9   : > { %v5745_v1 = vpop.eup %5113  ;;  %v1788_v2 = vsel %vm1056_vm6, %v5739_v50, 0.0 }
 0x4fa   : > { %v1791_v4 = vsel %vm1056_vm6, %v5745_v1, 0.0  ;;  %v5751_v5 = vpop.eup %5115 }
 0x4fb   : > { %v1794_v6 = vsel %vm1063_vm7, %v5751_v5, 0.0 }
 0x50c   : > { %1550 = vadd.xlane.f32.xlu1 %v1549_v45 }
 0x510   : > { %1553 = vadd.xlane.f32.xlu0 %v1552_v0  ;;  %1556 = vadd.xlane.f32.xlu1 %v1555_v54 }
 0x514   : > { %1789 = vadd.xlane.f32.xlu1 %v1788_v2  ;;  %1792 = vadd.xlane.f32.xlu0 %v1791_v4 }
 0x518   : > { %1795 = vadd.xlane.f32.xlu1 %v1794_v6  ;;  %v1954_v6 = vld [vmem:[%s6746_s9 + $0x30] sm:$0xff] }
 0x529   : > { %1803 = vrot.lane.b32.xlu1 %v5529_v39, %s6762_s22 }
 0x52a   : > { %1805 = vrot.lane.b32.xlu0 %v5524_v38, %s6762_s22 }
 0x550   : > { %v1078_v10 = vpop.xlane.xlu1 %1077 }
 0x551   : > { %5117 = vrcp.f32 %v1078_v10  ;;  %v1951_v10 = vld [vmem:[%s6746_s9 + $0x18] sm:$0xff] }
 0x554   : > { %v1081_v12 = vpop.xlane.xlu0 %1080 }
 0x555   : > { %5119 = vrcp.f32 %v1081_v12  ;;  %v1950_v12 = vld [vmem:[%s6746_s9 + $0x10] sm:$0xff] }
 0x558   : > { %v1084_v63 = vpop.xlane.xlu1 %1083 }
 0x559   : > { %5121 = vrcp.f32 %v1084_v63  ;;  %v1949_v63 = vld [vmem:[%s6746_s9 + $0x8] sm:$0xff] }
 0x55c   : > { %v1310_v14 = vpop.xlane.xlu0 %1309 }
 0x55d   : > { %5123 = vrcp.f32 %v1310_v14 }
 0x55e   : > { %v5118_v3 = vpop.eup %5117 }
 0x55f   : > { %v1088_v17 = vmul.f32 %v5118_v3, %v5696_v13  ;;  %v1948_v3 = vld [vmem:[%s6746_s9] sm:$0xff] }
 0x560   : > { %v1313_v7 = vpop.xlane.xlu1 %1312 }
 0x561   : > { %5125 = vrcp.f32 %v1313_v7  ;;  %4649 = vmatmul.mubr.msk.f32.vlgmr.msra.gmra.mxu1 %vm1056_vm6, %v1088_v17 }
 0x562   : > { %v5120_v39 = vpop.eup %5119  ;;  %4673 = vmatpush3.msk.msra.mxu1 %vm755_vm1, %v5689_v59  ;;  %4651 = vmatprep.mubr.msk.f32.mxu1 %vm5231_vm4, %v5229_v47 }
 0x563   : > { %4674 = vmatprep.subr.mxu1 %v5229_v47  ;;  %v1089_v38 = vmul.f32 %v5120_v39, %v5701_v18 }
 0x564   : > { %4675 = vmatpush3.msra.mxu1 %v5685_v57  ;;  %v1316_v22 = vpop.xlane.xlu0 %1315  ;;  %v1808_v28 = vpop.permute.xlu1 %1807 }
 0x565   : > { %5127 = vrcp.f32 %v1316_v22  ;;  %4676 = vmatprep.subr.mxu1 %v5229_v47  ;;  %4652 = vmatmul.mubr.msk.f32.gmra.mxu1 %vm1056_vm6, %v1089_v38 }
 0x566   : > { %v5122_v13 = vpop.eup %5121  ;;  %4677 = vmatpush3.msra.mxu1 %v5687_v58  ;;  %4654 = vmatprep.mubr.msk.f32.mxu1 %vm5231_vm4, %v5229_v47 }
 0x567   : > { %v1090_v59 = vmul.f32 %v5122_v13, %v5705_v15  ;;  %4702 = vmatprep.subr.mxu1 %v5229_v47 }
 0x568   : > { %v1565_v15 = vpop.permute.xlu0 %1564 }
 0x569   : > { %4655 = vmatmul.mubr.msk.f32.gmra.mxu1 %vm1056_vm6, %v1090_v59 }
 0x56a   : > { %v5124_v18 = vpop.eup %5123  ;;  %4678 = vmatprep.mubr.msk.f32.mxu1 %vm5231_vm4, %v5229_v47 }
 0x56b   : > { %v1320_v57 = vmul.f32 %v5124_v18, %v5709_v27 }
 0x56d   : > { %4679 = vmatmul.mubr.msk.f32.vlgmr.msra.gmra.mxu1 %vm1056_vm6, %v1320_v57 }
 0x56e   : > { %v5126_v11 = vpop.eup %5125  ;;  %4703 = vmatpush3.msk.msra.mxu1 %vm755_vm1, %v1569_v9  ;;  %4681 = vmatprep.mubr.msk.f32.mxu1 %vm5231_vm4, %v5229_v47  ;;  %v1952_v9 = vld [vmem:[%s6746_s9 + $0x20] sm:$0xff] }
 0x56f   : > { %4704 = vmatprep.subr.mxu1 %v5229_v47  ;;  %v1321_v58 = vmul.f32 %v5126_v11, %v5713_v24 }
 0x570   : > { %4705 = vmatpush3.msra.mxu1 %v1567_v8  ;;  %v1953_v8 = vld [vmem:[%s6746_s9 + $0x28] sm:$0xff] }
 0x571   : > { %4706 = vmatprep.subr.mxu1 %v5229_v47  ;;  %4682 = vmatmul.mubr.msk.f32.gmra.mxu1 %vm1056_vm6, %v1321_v58 }
 0x572   : > { %v5128_v26 = vpop.eup %5127  ;;  %4707 = vmatpush3.msra.mxu1 %v1565_v15  ;;  %4684 = vmatprep.mubr.msk.f32.mxu1 %vm5231_vm4, %v5229_v47 }
 0x573   : > { %v1322_v27 = vmul.f32 %v5128_v26, %v5717_v32  ;;  %4732 = vmatprep.subr.mxu1 %v5229_v47 }
 0x575   : > { %4685 = vmatmul.mubr.msk.f32.gmra.mxu1 %vm1056_vm6, %v1322_v27 }
 0x576   : > { %4708 = vmatprep.mubr.msk.f32.mxu1 %vm5231_vm4, %v5229_v47 }
 0x595   : > { %v1551_v24 = vpop.xlane.xlu1 %1550 }
 0x596   : > { %5129 = vrcp.f32 %v1551_v24 }
 0x599   : > { %v1554_v31 = vpop.xlane.xlu0 %1553  ;;  %v1557_v33 = vpop.xlane.xlu1 %1556 }
 0x59a   : > { %5131 = vrcp.f32 %v1554_v31 }
 0x59b   : > { %5133 = vrcp.f32 %v1557_v33 }
 0x59d   : > { %v1790_v35 = vpop.xlane.xlu1 %1789  ;;  %v1793_v36 = vpop.xlane.xlu0 %1792 }
 0x59e   : > { %5135 = vrcp.f32 %v1790_v35 }
 0x59f   : > { %5137 = vrcp.f32 %v1793_v36 }
 0x5a1   : > { %v1796_v42 = vpop.xlane.xlu1 %1795  ;;  %v1806_v44 = vpop.permute.xlu0 %1805 }
 0x5a2   : > { %5139 = vrcp.f32 %v1796_v42 }
 0x5a3   : > { %v5130_v40 = vpop.eup %5129 }
 0x5a4   : > { %v1561_v32 = vmul.f32 %v5130_v40, %v5731_v41 }
 0x5a5   : > { %v1804_v49 = vpop.permute.xlu1 %1803 }
 0x5a6   : > { %4709 = vmatmul.mubr.msk.f32.vlgmr.msra.gmra.mxu1 %vm1056_vm6, %v1561_v32 }
 0x5a7   : > { %v5132_v43 = vpop.eup %5131  ;;  %4733 = vmatpush3.msk.msra.mxu1 %vm755_vm1, %v1808_v28  ;;  %4711 = vmatprep.mubr.msk.f32.mxu1 %vm5231_vm4, %v5229_v47 }
 0x5a8   : > { %4734 = vmatprep.subr.mxu1 %v5229_v47  ;;  %v1562_v46 = vmul.f32 %v5132_v43, %v5733_v61  ;;  %v5134_v48 = vpop.eup %5133  ;;  %v1955_v61 = vld [vmem:[%s6746_s9 + $0x38] sm:$0xff] }
 0x5a9   : > { %4735 = vmatpush3.msra.mxu1 %v1806_v44  ;;  %v1563_v51 = vmul.f32 %v5134_v48, %v5737_v62  ;;  %4748 = vmatpush3.msra.mxu0 %v1955_v61 }
 0x5aa   : > { %4736 = vmatprep.subr.mxu1 %v5229_v47  ;;  %4712 = vmatmul.mubr.msk.f32.gmra.mxu1 %vm1056_vm6, %v1562_v46 }
 0x5ab   : > { %4737 = vmatpush3.msra.mxu1 %v1804_v49  ;;  %4714 = vmatprep.mubr.msk.f32.mxu1 %vm5231_vm4, %v5229_v47  ;;  %v5136_v52 = vpop.eup %5135 }
 0x5ac   : > { %4772 = vmatprep.subr.mxu1 %v5229_v47  ;;  %v1800_v37 = vmul.f32 %v5136_v52, %v5739_v50  ;;  %v5138_v53 = vpop.eup %5137  ;;  %4749 = vmatprep.subr.mxu0 %v5229_v47 }
 0x5ad   : > { %v1801_v55 = vmul.f32 %v5138_v53, %v5745_v1  ;;  %4750 = vmatpush3.msra.mxu0 %v1954_v6 }
 0x5ae   : > { %4715 = vmatmul.mubr.msk.f32.gmra.mxu1 %vm1056_vm6, %v1563_v51  ;;  %4751 = vmatprep.subr.mxu0 %v5229_v47 }
 0x5af   : > { %4738 = vmatprep.mubr.msk.f32.mxu1 %vm5231_vm4, %v5229_v47  ;;  %v5140_v56 = vpop.eup %5139  ;;  %4752 = vmatpush3.msra.mxu0 %v1953_v8 }
 0x5b0   : > { %v1802_v30 = vmul.f32 %v5140_v56, %v5751_v5  ;;  %4753 = vmatprep.subr.mxu0 %v5229_v47 }
 0x5b1   : > { %4754 = vmatpush3.msra.mxu0 %v1952_v9 }
 0x5b2   : > { %4739 = vmatmul.mubr.msk.f32.vlgmr.msra.gmra.mxu1 %vm1056_vm6, %v1800_v37  ;;  %4755 = vmatprep.subr.mxu0 %v5229_v47  ;;  %v4292_v37 = vld [vmem:[%s6747_s10] ss:$0 sm:$0xff] }
 0x5b3   : > { %4741 = vmatprep.mubr.msk.f32.mxu1 %vm5231_vm4, %v5229_v47  ;;  %4756 = vmatpush3.msra.mxu0 %v1951_v10 }
 0x5b4   : > { %4757 = vmatprep.subr.mxu0 %v5229_v47 }
 0x5b5   : > { %4758 = vmatpush3.msra.mxu0 %v1950_v12 }
 0x5b6   : > { %4742 = vmatmul.mubr.msk.f32.gmra.mxu1 %vm1056_vm6, %v1801_v55  ;;  %4759 = vmatprep.subr.mxu0 %v5229_v47 }
 0x5b7   : > { %4744 = vmatprep.mubr.msk.f32.mxu1 %vm5231_vm4, %v5229_v47  ;;  %4760 = vmatpush3.msra.mxu0 %v1949_v63 }
 0x5b8   : > { %4761 = vmatprep.subr.mxu0 %v5229_v47 }
 0x5b9   : > { %4762 = vmatpush3.msra.mxu0 %v1948_v3 }
 0x5ba   : > { %4745 = vmatmul.mubr.msk.f32.gmra.mxu1 %vm1056_vm6, %v1802_v30  ;;  %4797 = vmatprep.subr.mxu0 %v5229_v47 }
 0x5bb   : > { %4788 = vmatprep.mubr.msk.f32.mxu1 %vm5231_vm4, %v5229_v47 }
 0x621   : > { %v5822_v60 = vpop.f32.mrf.mxu1 }
 0x623   : > { %v4650_v34 = vpop.f32.mrf.mxu1 }
 0x625   : > { %v5824_v41 = vpop.f32.mrf.mxu1 }
 0x627   : > { %v4653_v45 = vpop.f32.mrf.mxu1 }
 0x629   : > { %v5830_v62 = vpop.f32.mrf.mxu1 }
 0x62b   : > { %v4656_v50 = vpop.f32.mrf.mxu1 }
 0x62d   : > { %v1410_v0 = vpop.f32.mrf.mxu1 }
 0x62e   : > { %1905 = vrot.lane.b32.xlu0 %v1410_v0, %s6770_s30 }
 0x62f   : > { %v4680_v54 = vpop.f32.mrf.mxu1 }
 0x631   : > { %v1415_v1 = vpop.f32.mrf.mxu1 }
 0x632   : > { %1907 = vrot.lane.b32.xlu1 %v1415_v1, %s6770_s30 }
 0x633   : > { %v4683_v2 = vpop.f32.mrf.mxu1 }
 0x635   : > { %v1420_v4 = vpop.f32.mrf.mxu1 }
 0x637   : > { %v4686_v5 = vpop.f32.mrf.mxu1 }
 0x666   : > { %v1649_v14 = vpop.f32.mrf.mxu1 }
 0x667   : > { %1917 = vrot.lane.b32.xlu1 %v1649_v14, %s6772_s0 }
 0x668   : > { %v4710_v17 = vpop.f32.mrf.mxu1 }
 0x66a   : > { %v1654_v7 = vpop.f32.mrf.mxu1 }
 0x66b   : > { %1919 = vrot.lane.b32.xlu0 %v1654_v7, %s6772_s0  ;;  %v2124_v7 = vld [vmem:[%s6750_s13 + $0x38] sm:$0xff] }
 0x66c   : > { %v4713_v39 = vpop.f32.mrf.mxu1  ;;  %4773 = vmatpush3.msra.mxu1 %v2124_v7 }
 0x66d   : > { %4774 = vmatprep.subr.mxu1 %v5229_v47  ;;  %v2123_v39 = vld [vmem:[%s6750_s13 + $0x30] sm:$0xff] }
 0x66e   : > { %v1659_v38 = vpop.f32.mrf.mxu1  ;;  %4775 = vmatpush3.msra.mxu1 %v2123_v39 }
 0x66f   : > { %4776 = vmatprep.subr.mxu1 %v5229_v47 }
 0x670   : > { %v4716_v22 = vpop.f32.mrf.mxu1 }
 0x671   : > { %v2121_v22 = vld [vmem:[%s6750_s13 + $0x20] sm:$0xff] }
 0x672   : > { %v1888_v13 = vpop.f32.mrf.mxu1 }
 0x673   : > { %1929 = vrot.lane.b32.xlu0 %v1888_v13, %s6774_s28  ;;  %v2120_v13 = vld [vmem:[%s6750_s13 + $0x18] sm:$0xff] }
 0x674   : > { %v4740_v59 = vpop.f32.mrf.mxu1 }
 0x675   : > { %v2119_v59 = vld [vmem:[%s6750_s13 + $0x10] sm:$0xff] }
 0x676   : > { %v1893_v18 = vpop.f32.mrf.mxu1 }
 0x677   : > { %1909 = vrot.lane.b32.xlu0 %v1420_v4, %s6789_s4  ;;  %1931 = vrot.lane.b32.xlu1 %v1893_v18, %s6774_s28  ;;  %v2118_v18 = vld [vmem:[%s6750_s13 + $0x8] sm:$0xff] }
 0x678   : > { %v4743_v57 = vpop.f32.mrf.mxu1 }
 0x679   : > { %v2117_v57 = vld [vmem:[%s6750_s13] sm:$0xff] }
 0x67a   : > { %v1898_v11 = vpop.f32.mrf.mxu1 }
 0x67b   : > { %1921 = vrot.lane.b32.xlu1 %v1659_v38, %s6772_s0  ;;  %1933 = vrot.lane.b32.xlu0 %v1898_v11, %s6774_s28  ;;  %v2122_v38 = vld [vmem:[%s6750_s13 + $0x28] sm:$0xff]  ;;  %s6791_s28 = smov 48   ;;  %s6792_s0 = smov 32  }
 0x67c   : > { %v4746_v58 = vpop.f32.mrf.mxu1  ;;  %4777 = vmatpush3.msra.mxu1 %v2122_v38 }
 0x67d   : > { %4778 = vmatprep.subr.mxu1 %v5229_v47 }
 0x67e   : > { %4779 = vmatpush3.msra.mxu1 %v2121_v22 }
 0x67f   : > { %4780 = vmatprep.subr.mxu1 %v5229_v47 }
 0x680   : > { %4781 = vmatpush3.msra.mxu1 %v2120_v13 }
 0x681   : > { %4782 = vmatprep.subr.mxu1 %v5229_v47 }
 0x682   : > { %4783 = vmatpush3.msra.mxu1 %v2119_v59 }
 0x683   : > { %4784 = vmatprep.subr.mxu1 %v5229_v47 }
 0x684   : > { %4785 = vmatpush3.msra.mxu1 %v2118_v18 }
 0x685   : > { %4786 = vmatprep.subr.mxu1 %v5229_v47 }
 0x686   : > { %4787 = vmatpush3.msra.mxu1 %v2117_v57 }
 0x6a0   : > { %v1906_v15 = vpop.permute.xlu0 %1905 }
 0x6a1   : > { %v1938_v24 = vsel %vm960_vm5, %v5822_v60, %v1906_v15 }
 0x6a4   : > { %v1908_v26 = vpop.permute.xlu1 %1907 }
 0x6a5   : > { %v1939_v36 = vsel %vm960_vm5, %v5824_v41, %v1908_v26 }
 0x6d9   : > { %v1918_v28 = vpop.permute.xlu1 %1917 }
 0x6da   : > { %v1942_v31 = vsel %vm1941_vm8, %v1938_v24, %v1918_v28 }
 0x6dd   : > { %v1920_v27 = vpop.permute.xlu0 %1919 }
 0x6de   : > { %v1943_v40 = vsel %vm1941_vm8, %v1939_v36, %v1920_v27  ;;  %v4293_v36 = vld [vmem:[%s6748_s11] ss:$0 sm:$0xff] }
 0x6e5   : > { %v1930_v33 = vpop.permute.xlu0 %1929 }
 0x6e6   : > { %v1945_v35 = vsel %vm670_vm0, %v1942_v31, %v1930_v33 }
 0x6e7   : > { %4764 = vmatmul.mubr.msk.f32.vlgmr.msra.gmra.mxu0 %vm771_vm3, %v1945_v35 }
 0x6e8   : > { %4766 = vmatprep.mubr.msk.f32.mxu0 %vm5231_vm4, %v5229_v47 }
 0x6e9   : > { %v1910_v32 = vpop.permute.xlu0 %1909  ;;  %v1932_v42 = vpop.permute.xlu1 %1931 }
 0x6ea   : > { %v1946_v43 = vsel %vm670_vm0, %v1943_v40, %v1932_v42  ;;  %v1940_v44 = vsel %vm960_vm5, %v5830_v62, %v1910_v32  ;;  %v4294_v32 = vld [vmem:[%s6749_s12] ss:$0 sm:$0xff] }
 0x6eb   : > { %4767 = vmatmul.mubr.msk.f32.gmra.mxu0 %vm771_vm3, %v1946_v43 }
 0x6ec   : > { %4769 = vmatprep.mubr.msk.f32.mxu0 %vm5231_vm4, %v5229_v47 }
 0x6ed   : > { %v1934_v46 = vpop.permute.xlu0 %1933  ;;  %v1922_v48 = vpop.permute.xlu1 %1921 }
 0x6ee   : > { %v1944_v49 = vsel %vm1941_vm8, %v1940_v44, %v1922_v48 }
 0x6ef   : > { %v1947_v51 = vsel %vm670_vm0, %v1944_v49, %v1934_v46 }
 0x6f0   : > { %4770 = vmatmul.mubr.msk.f32.gmra.mxu0 %vm771_vm3, %v1947_v51 }
 0x6f1   : > { %4829 = vmatprep.mubr.msk.f32.mxu0 %vm5231_vm4, %v5229_v47 }
 0x7a7   : > { %v2031_v52 = vpop.f32.mrf.mxu0 }
 0x7a8   : > { %v2045_v53 = vadd.f32 %v2031_v52, %v5404_v23 }
 0x7a9   : > { %v4765_v55 = vpop.f32.mrf.mxu0 }
 0x7aa   : > { %v5894_v56 = vadd.f32 %v4292_v37, %v2045_v53  ;;  %v2263_v55 = vld [vmem:[%s6752_s15 + $0x78] sm:$0xff] }
 0x7ab   : > { %v2036_v30 = vpop.f32.mrf.mxu0  ;;  %4798 = vmatpush3.msra.mxu0 %v2263_v55 }
 0x7ac   : > { %v2046_v60 = vadd.f32 %v2036_v30, %v5408_v25  ;;  %v2060_v34 = vsel %vm771_vm3, %v5894_v56, 0.0  ;;  %4799 = vmatprep.subr.mxu0 %v5229_v47  ;;  %v2262_v30 = vld [vmem:[%s6752_s15 + $0x70] sm:$0xff] }
 0x7ad   : > { %2061 = vadd.xlane.f32.xlu1 %v2060_v34  ;;  %v4768_v41 = vpop.f32.mrf.mxu0  ;;  %4800 = vmatpush3.msra.mxu0 %v2262_v30  ;;  %v2260_v34 = vld [vmem:[%s6752_s15 + $0x60] sm:$0xff] }
 0x7ae   : > { %v5899_v61 = vadd.f32 %v4292_v37, %v2046_v60  ;;  %4801 = vmatprep.subr.mxu0 %v5229_v47  ;;  %v2261_v60 = vld [vmem:[%s6752_s15 + $0x68] sm:$0xff]  ;;  %v2259_v41 = vld [vmem:[%s6752_s15 + $0x58] sm:$0xff] }
 0x7af   : > { %4802 = vmatpush3.msra.mxu0 %v2261_v60 }
 0x7b0   : > { %v2041_v45 = vpop.f32.mrf.mxu0  ;;  %v2063_v62 = vsel %vm771_vm3, %v5899_v61, 0.0  ;;  %4803 = vmatprep.subr.mxu0 %v5229_v47 }
 0x7b1   : > { %v2047_v50 = vadd.f32 %v2041_v45, %v5392_v16  ;;  %2064 = vadd.xlane.f32.xlu0 %v2063_v62  ;;  %4804 = vmatpush3.msra.mxu0 %v2260_v34  ;;  %v2258_v45 = vld [vmem:[%s6752_s15 + $0x50] sm:$0xff]  ;;  %v2257_v62 = vld [vmem:[%s6752_s15 + $0x48] sm:$0xff] }
 0x7b2   : > { %v4771_v23 = vpop.f32.mrf.mxu0  ;;  %4805 = vmatprep.subr.mxu0 %v5229_v47 }
 0x7b3   : > { %v5904_v0 = vadd.f32 %v4292_v37, %v2047_v50  ;;  %4806 = vmatpush3.msra.mxu0 %v2259_v41  ;;  %v2256_v50 = vld [vmem:[%s6752_s15 + $0x40] sm:$0xff]  ;;  %v2255_v23 = vld [vmem:[%s6752_s15 + $0x38] sm:$0xff] }
 0x7b4   : > { %4807 = vmatprep.subr.mxu0 %v5229_v47 }
 0x7b5   : > { %v2066_v25 = vsel %vm778_vm2, %v5904_v0, 0.0  ;;  %4808 = vmatpush3.msra.mxu0 %v2258_v45 }
 0x7b6   : > { %2067 = vadd.xlane.f32.xlu0 %v2066_v25  ;;  %4809 = vmatprep.subr.mxu0 %v5229_v47  ;;  %v2254_v25 = vld [vmem:[%s6752_s15 + $0x30] sm:$0xff] }
 0x7b7   : > { %4810 = vmatpush3.msra.mxu0 %v2257_v62 }
 0x7b8   : > { %4811 = vmatprep.subr.mxu0 %v5229_v47 }
 0x7b9   : > { %4812 = vmatpush3.msra.mxu0 %v2256_v50 }
 0x7ba   : > { %4813 = vmatprep.subr.mxu0 %v5229_v47 }
 0x7bb   : > { %4814 = vmatpush3.msra.mxu0 %v2255_v23 }
 0x7bc   : > { %4815 = vmatprep.subr.mxu0 %v5229_v47 }
 0x7bd   : > { %4816 = vmatpush3.msra.mxu0 %v2254_v25 }
 0x7be   : > { %4817 = vmatprep.subr.mxu0 %v5229_v47 }
 0x836   : > { %v2062_v54 = vpop.xlane.xlu1 %2061 }
 0x837   : > { %v2069_v1 = vmul.f32 0.015625, %v2062_v54  ;;  %v2253_v54 = vld [vmem:[%s6752_s15 + $0x28] sm:$0xff] }
 0x838   : > { %4818 = vmatpush3.msra.mxu0 %v2253_v54 }
 0x839   : > { %v2072_v2 = vsub.f32 %v5894_v56, %v2069_v1  ;;  %v2252_v1 = vld [vmem:[%s6752_s15 + $0x20] sm:$0xff]  ;;  %4819 = vmatprep.subr.mxu0 %v5229_v47 }
 0x83a   : > { %v2065_v4 = vpop.xlane.xlu0 %2064  ;;  %4820 = vmatpush3.msra.mxu0 %v2252_v1 }
 0x83b   : > { %v2070_v5 = vmul.f32 0.015625, %v2065_v4  ;;  %v2075_v6 = vmul.f32 %v2072_v2, %v2072_v2  ;;  %4821 = vmatprep.subr.mxu0 %v5229_v47  ;;  %v2250_v4 = vld [vmem:[%s6752_s15 + $0x10] sm:$0xff] }
 0x83d   : > { %v2073_v8 = vsub.f32 %v5899_v61, %v2070_v5  ;;  %v2078_v9 = vsel %vm771_vm3, %v2075_v6, 0.0  ;;  %v2249_v5 = vld [vmem:[%s6752_s15 + $0x8] sm:$0xff]  ;;  %v2248_v6 = vld [vmem:[%s6752_s15] sm:$0xff] }
 0x83e   : > { %2079 = vadd.xlane.f32.xlu0 %v2078_v9 }
 0x83f   : > { %v2068_v16 = vpop.xlane.xlu0 %2067  ;;  %v2076_v10 = vmul.f32 %v2073_v8, %v2073_v8 }
 0x840   : > { %v2071_v12 = vmul.f32 0.015625, %v2068_v16 }
 0x841   : > { %v2081_v63 = vsel %vm771_vm3, %v2076_v10, 0.0 }
 0x842   : > { %v2074_v14 = vsub.f32 %v5904_v0, %v2071_v12  ;;  %2082 = vadd.xlane.f32.xlu1 %v2081_v63 }
 0x844   : > { %v2077_v3 = vmul.f32 %v2074_v14, %v2074_v14 }
 0x846   : > { %v2084_v17 = vsel %vm778_vm2, %v2077_v3, 0.0 }
 0x847   : > { %2085 = vadd.xlane.f32.xlu0 %v2084_v17 }
 0x8c7   : > { %v2080_v11 = vpop.xlane.xlu0 %2079 }
 0x8c8   : > { %v2087_v58 = vmul.f32 0.015625, %v2080_v11 }
 0x8ca   : > { %v2090_v15 = vadd.f32 1e-06, %v2087_v58 }
 0x8cb   : > { %v2083_v26 = vpop.xlane.xlu1 %2082 }
 0x8cc   : > { %5141 = vrsqrt.f32 %v2090_v15  ;;  %v2088_v27 = vmul.f32 0.015625, %v2083_v26 }
 0x8ce   : > { %v2091_v28 = vadd.f32 1e-06, %v2088_v27 }
 0x8d0   : > { %5143 = vrsqrt.f32 %v2091_v28  ;;  %v2086_v24 = vpop.xlane.xlu0 %2085 }
 0x8d1   : > { %v2089_v31 = vmul.f32 0.015625, %v2086_v24 }
 0x8d3   : > { %v2092_v33 = vadd.f32 1e-06, %v2089_v31 }
 0x8d5   : > { %5145 = vrsqrt.f32 %v2092_v33 }
 0x8d9   : > { %v5142_v35 = vpop.eup %5141 }
 0x8da   : > { %v2096_v40 = vmul.f32 %v5142_v35, %v2072_v2  ;;  %v2251_v2 = vld [vmem:[%s6752_s15 + $0x18] sm:$0xff] }
 0x8db   : > { %4822 = vmatpush3.msra.mxu0 %v2251_v2 }
 0x8dc   : > { %v2105_v42 = vmul.f32 %v4293_v36, %v2096_v40  ;;  %4823 = vmatprep.subr.mxu0 %v5229_v47 }
 0x8dd   : > { %v5144_v43 = vpop.eup %5143  ;;  %4824 = vmatpush3.msra.mxu0 %v2250_v4 }
 0x8de   : > { %v2114_v44 = vadd.f32 %v4294_v32, %v2105_v42  ;;  %v2097_v46 = vmul.f32 %v5144_v43, %v2073_v8  ;;  %4825 = vmatprep.subr.mxu0 %v5229_v47  ;;  %v4295_v8 = vld [vmem:[%s6751_s14] ss:$0 sm:$0xff] }
 0x8df   : > { %4826 = vmatpush3.msra.mxu0 %v2249_v5 }
 0x8e0   : > { %4789 = vmatmul.mubr.msk.f32.vlgmr.msra.gmra.mxu1 %vm771_vm3, %v2114_v44  ;;  %v2106_v48 = vmul.f32 %v4293_v36, %v2097_v46  ;;  %4827 = vmatprep.subr.mxu0 %v5229_v47 }
 0x8e1   : > { %4791 = vmatprep.mubr.msk.f32.mxu1 %vm5231_vm4, %v5229_v47  ;;  %4828 = vmatpush3.msra.mxu0 %v2248_v6 }
 0x8e2   : > { %v5146_v49 = vpop.eup %5145  ;;  %v2115_v51 = vadd.f32 %v4294_v32, %v2106_v48  ;;  %4853 = vmatprep.subr.mxu0 %v5229_v47 }
 0x8e3   : > { %v2098_v52 = vmul.f32 %v5146_v49, %v2074_v14 }
 0x8e4   : > { %4792 = vmatmul.mubr.msk.f32.gmra.mxu1 %vm771_vm3, %v2115_v51 }
 0x8e5   : > { %4794 = vmatprep.mubr.msk.f32.mxu1 %vm5231_vm4, %v5229_v47  ;;  %v2107_v37 = vmul.f32 %v4293_v36, %v2098_v52 }
 0x8e7   : > { %v2116_v53 = vadd.f32 %v4294_v32, %v2107_v37  ;;  %v4299_v37 = vld [vmem:[%s6753_s16] ss:$0 sm:$0xff] }
 0x8e9   : > { %4795 = vmatmul.mubr.msk.f32.gmra.mxu1 %vm771_vm3, %v2116_v53 }
 0x8ea   : > { %2521 = vmatprep.mubr.f32.mxu1 %v5229_v47 }
 0x9a0   : > { %v2207_v9 = vpop.f32.mrf.mxu1 }
 0x9a1   : > { %v2208_v16 = vadd.f32 %v4295_v8, %v2207_v9 }
 0x9a2   : > { %v4790_v10 = vpop.f32.mrf.mxu1 }
 0x9a3   : > { %v2224_v12 = vmul.f32 0.044715, %v2208_v16  ;;  %v2221_v35 = vmul.f32 0.5, %v2208_v16 }
 0x9a4   : > { %v2212_v63 = vpop.f32.mrf.mxu1 }
 0x9a5   : > { %v2227_v14 = vmul.f32 %v2224_v12, %v2208_v16  ;;  %v2213_v3 = vadd.f32 %v4295_v8, %v2212_v63 }
 0x9a6   : > { %v4793_v17 = vpop.f32.mrf.mxu1 }
 0x9a7   : > { %v2230_v7 = vmul.f32 %v2227_v14, %v2208_v16  ;;  %v2225_v39 = vmul.f32 0.044715, %v2213_v3  ;;  %v2222_v42 = vmul.f32 0.5, %v2213_v3 }
 0x9a9   : > { %v2233_v38 = vadd.f32 %v2230_v7, %v2208_v16  ;;  %v2228_v22 = vmul.f32 %v2225_v39, %v2213_v3  ;;  %v2217_v13 = vpop.f32.mrf.mxu1  ;;  %v4319_v7 = vld [vmem:[%s6744_s7 + $0xf8] sm:$0xff]  ;;  %v4318_v39 = vld [vmem:[%s6744_s7 + $0xf0] sm:$0xff] }
 0x9aa   : > { %v2218_v59 = vadd.f32 %v4295_v8, %v2217_v13  ;;  %2473 = vmatprep.subr.mxu1 %v4319_v7  ;;  %v4315_v13 = vld [vmem:[%s6744_s7 + $0xd8] sm:$0xff] }
 0x9ab   : > { %v2236_v18 = vmul.f32 0.7978846, %v2233_v38  ;;  %v4796_v57 = vpop.f32.mrf.mxu1  ;;  %v2231_v11 = vmul.f32 %v2228_v22, %v2213_v3  ;;  %2474 = vmatpush1.msra.mxu1 %v4318_v39  ;;  %v4317_v38 = vld [vmem:[%s6744_s7 + $0xe8] sm:$0xff]  ;;  %v4316_v22 = vld [vmem:[%s6744_s7 + $0xe0] sm:$0xff] }
 0x9ac   : > { %v2226_v58 = vmul.f32 0.044715, %v2218_v59  ;;  %v2223_v48 = vmul.f32 0.5, %v2218_v59  ;;  %2475 = vmatprep.subr.mxu1 %v4317_v38  ;;  %v4312_v57 = vld [vmem:[%s6744_s7 + $0xc0] sm:$0xff] }
 0x9ad   : > { %5147 = vtanh.f32 %v2236_v18  ;;  %v2234_v15 = vadd.f32 %v2231_v11, %v2213_v3  ;;  %2476 = vmatpush1.msra.mxu1 %v4316_v22  ;;  %v4313_v18 = vld [vmem:[%s6744_s7 + $0xc8] sm:$0xff]  ;;  %v4311_v11 = vld [vmem:[%s6744_s7 + $0xb8] sm:$0xff] }
 0x9ae   : > { %v2229_v26 = vmul.f32 %v2226_v58, %v2218_v59  ;;  %2477 = vmatprep.subr.mxu1 %v4315_v13  ;;  %v4310_v58 = vld [vmem:[%s6744_s7 + $0xb0] sm:$0xff] }
 0x9af   : > { %v2237_v27 = vmul.f32 0.7978846, %v2234_v15  ;;  %v4309_v15 = vld [vmem:[%s6744_s7 + $0xa8] sm:$0xff] }
 0x9b0   : > { %v2232_v28 = vmul.f32 %v2229_v26, %v2218_v59  ;;  %v4308_v26 = vld [vmem:[%s6744_s7 + $0xa0] sm:$0xff] }
 0x9b1   : > { %5149 = vtanh.f32 %v2237_v27  ;;  %v4307_v27 = vld [vmem:[%s6744_s7 + $0x98] sm:$0xff] }
 0x9b2   : > { %v2235_v24 = vadd.f32 %v2232_v28, %v2218_v59  ;;  %v4314_v59 = vld [vmem:[%s6744_s7 + $0xd0] sm:$0xff] }
 0x9b3   : > { %2478 = vmatpush1.msra.mxu1 %v4314_v59  ;;  %v4306_v28 = vld [vmem:[%s6744_s7 + $0x90] sm:$0xff] }
 0x9b4   : > { %v2238_v31 = vmul.f32 0.7978846, %v2235_v24  ;;  %2479 = vmatprep.subr.mxu1 %v4313_v18  ;;  %v4305_v24 = vld [vmem:[%s6744_s7 + $0x88] sm:$0xff] }
 0x9b5   : > { %2480 = vmatpush1.msra.mxu1 %v4312_v57 }
 0x9b6   : > { %5151 = vtanh.f32 %v2238_v31  ;;  %2481 = vmatprep.subr.mxu1 %v4311_v11  ;;  %v4304_v31 = vld [vmem:[%s6744_s7 + $0x80] sm:$0xff] }
 0x9b7   : > { %2482 = vmatpush1.msra.mxu1 %v4310_v58 }
 0x9b8   : > { %2483 = vmatprep.subr.mxu1 %v4309_v15 }
 0x9b9   : > { %2484 = vmatpush1.msra.mxu1 %v4308_v26 }
 0x9ba   : > { %v5148_v33 = vpop.eup %5147  ;;  %2485 = vmatprep.subr.mxu1 %v4307_v27 }
 0x9bb   : > { %v2242_v36 = vadd.f32 1.0, %v5148_v33  ;;  %2486 = vmatpush1.msra.mxu1 %v4306_v28 }
 0x9bc   : > { %2487 = vmatprep.subr.mxu1 %v4305_v24 }
 0x9bd   : > { %v2245_v40 = vmul.f32 %v2242_v36, %v2221_v35  ;;  %2488 = vmatpush1.msra.mxu1 %v4304_v31 }
 0x9be   : > { %v5150_v32 = vpop.eup %5149  ;;  %4838 = vmatprep.subr.mxu1 %v5229_v47 }
 0x9bf   : > { %4830 = vmatmul.mubr.f32.vlgmr.msra.gmra.mxu0 %v2245_v40  ;;  %v2243_v43 = vadd.f32 1.0, %v5150_v32 }
 0x9c0   : > { %4832 = vmatprep.mubr.msk.f32.mxu0 %vm5231_vm4, %v5229_v47 }
 0x9c1   : > { %v2246_v44 = vmul.f32 %v2243_v43, %v2222_v42 }
 0x9c3   : > { %v5152_v46 = vpop.eup %5151  ;;  %4833 = vmatmul.mubr.f32.gmra.mxu0 %v2246_v44 }
 0x9c4   : > { %4835 = vmatprep.mubr.msk.f32.mxu0 %vm5231_vm4, %v5229_v47  ;;  %v2244_v49 = vadd.f32 1.0, %v5152_v46 }
 0x9c6   : > { %v2247_v51 = vmul.f32 %v2244_v49, %v2223_v48  ;;  %v4302_v49 = vld [vmem:[%s6788_s5 + $0x1] ss:$0 sm:$0xff] }
 0x9c8   : > { %4836 = vmatmul.mubr.f32.gmra.mxu0 %v2247_v51 }
 0x9c9   : > { %4859 = vmatprep.mubr.msk.f32.mxu0 %vm5231_vm4, %v5229_v47 }
 0xa7f   : > { %v2330_v52 = vpop.f32.mrf.mxu0 }
 0xa80   : > { %v2344_v53 = vadd.f32 %v2330_v52, %v5894_v56  ;;  %v4303_v52 = vld [vmem:[%s6743_s6 + $0x1] ss:$0 sm:$0xff] }
 0xa81   : > { %v4831_v55 = vpop.f32.mrf.mxu0 }
 0xa82   : > { %v6036_v30 = vadd.f32 %v4299_v37, %v2344_v53 }
 0xa83   : > { %v2335_v60 = vpop.f32.mrf.mxu0 }
 0xa84   : > { %v2345_v34 = vadd.f32 %v2335_v60, %v5899_v61  ;;  %v2361_v41 = vsel %vm771_vm3, %v6036_v30, 0.0 }
 0xa85   : > { %2362 = vadd.xlane.f32.xlu1 %v2361_v41  ;;  %v4834_v45 = vpop.f32.mrf.mxu0 }
 0xa86   : > { %v6041_v62 = vadd.f32 %v4299_v37, %v2345_v34 }
 0xa88   : > { %v2340_v50 = vpop.f32.mrf.mxu0  ;;  %v2364_v23 = vsel %vm771_vm3, %v6041_v62, 0.0 }
 0xa89   : > { %v2346_v25 = vadd.f32 %v2340_v50, %v5904_v0  ;;  %2365 = vadd.xlane.f32.xlu0 %v2364_v23 }
 0xa8a   : > { %v4837_v56 = vpop.f32.mrf.mxu0 }
 0xa8b   : > { %v6046_v54 = vadd.f32 %v4299_v37, %v2346_v25  ;;  %v4320_v56 = vld [vmem:[%s6745_s8 + $0x2] sm:$0x3] }
 0xa8d   : > { %v2367_v61 = vsel %vm778_vm2, %v6046_v54, 0.0 }
 0xa8e   : > { %2368 = vadd.xlane.f32.xlu1 %v2367_v61 }
 0xb0e   : > { %v2363_v1 = vpop.xlane.xlu1 %2362 }
 0xb0f   : > { %v2370_v2 = vmul.f32 0.015625, %v2363_v1 }
 0xb11   : > { %v6051_v4 = vsub.f32 %v6036_v30, %v2370_v2  ;;  %v2441_v2 = vrot.slane %v4320_v56, %v5499_v21 }
 0xb12   : > { %v2366_v5 = vpop.xlane.xlu0 %2365 }
 0xb13   : > { %v2371_v6 = vmul.f32 0.015625, %v2366_v5  ;;  %v2376_v8 = vmul.f32 %v6051_v4, %v6051_v4 }
 0xb15   : > { %v6056_v0 = vsub.f32 %v6041_v62, %v2371_v6  ;;  %v2379_v9 = vsel %vm771_vm3, %v2376_v8, 0.0 }
 0xb16   : > { %2380 = vadd.xlane.f32.xlu0 %v2379_v9  ;;  %v2445_v9 = vrot.slane %v4320_v56, %v5506_v29 }
 0xb17   : > { %v2369_v16 = vpop.xlane.xlu1 %2368  ;;  %v2377_v10 = vmul.f32 %v6056_v0, %v6056_v0 }
 0xb18   : > { %v2372_v12 = vmul.f32 0.015625, %v2369_v16 }
 0xb19   : > { %v2382_v63 = vsel %vm771_vm3, %v2377_v10, 0.0 }
 0xb1a   : > { %v6063_v14 = vsub.f32 %v6046_v54, %v2372_v12  ;;  %2383 = vadd.xlane.f32.xlu1 %v2382_v63 }
 0xb1c   : > { %v2378_v3 = vmul.f32 %v6063_v14, %v6063_v14 }
 0xb1e   : > { %v2385_v17 = vsel %vm778_vm2, %v2378_v3, 0.0 }
 0xb1f   : > { %2386 = vadd.xlane.f32.xlu0 %v2385_v17 }
 0xb9f   : > { %v2381_v33 = vpop.xlane.xlu0 %2380 }
 0xba0   : > { %v2388_v35 = vmul.f32 0.015625, %v2381_v33 }
 0xba2   : > { %v2391_v36 = vadd.f32 1e-06, %v2388_v35 }
 0xba3   : > { %v2384_v40 = vpop.xlane.xlu1 %2383 }
 0xba4   : > { %5153 = vrsqrt.f32 %v2391_v36  ;;  %v2389_v32 = vmul.f32 0.015625, %v2384_v40 }
 0xba6   : > { %v2392_v42 = vadd.f32 1e-06, %v2389_v32 }
 0xba8   : > { %5155 = vrsqrt.f32 %v2392_v42  ;;  %v2387_v43 = vpop.xlane.xlu0 %2386 }
 0xba9   : > { %v2390_v44 = vmul.f32 0.015625, %v2387_v43 }
 0xbab   : > { %v2393_v46 = vadd.f32 1e-06, %v2390_v44 }
 0xbad   : > { %5157 = vrsqrt.f32 %v2393_v46 }
 0xbb1   : > { %v5154_v48 = vpop.eup %5153 }
 0xbb2   : > { %v2397_v51 = vmul.f32 %v5154_v48, %v6051_v4 }
 0xbb4   : > { %v2406_v37 = vmul.f32 %v4302_v49, %v2397_v51 }
 0xbb5   : > { %v5156_v53 = vpop.eup %5155 }
 0xbb6   : > { %v2415_v55 = vadd.f32 %v4303_v52, %v2406_v37  ;;  %v2398_v60 = vmul.f32 %v5156_v53, %v6056_v0 }
 0xbb8   : > { %4321 = vmatmul.mubr.msk.f32.vlgmr.msra.gmra.mxu1 %vm771_vm3, %v2415_v55  ;;  %v2407_v34 = vmul.f32 %v4302_v49, %v2398_v60 }
 0xbb9   : > { %2527 = vmatprep.mubr.f32.mxu1 %v5229_v47 }
 0xbba   : > { %v5158_v41 = vpop.eup %5157  ;;  %v2416_v45 = vadd.f32 %v4303_v52, %v2407_v34 }
 0xbbb   : > { %v2399_v50 = vmul.f32 %v5158_v41, %v6063_v14 }
 0xbbc   : > { %4322 = vmatmul.mubr.msk.f32.gmra.mxu1 %vm771_vm3, %v2416_v45 }
 0xbbd   : > { %2533 = vmatprep.mubr.f32.mxu1 %v5229_v47  ;;  %v2408_v23 = vmul.f32 %v4302_v49, %v2399_v50 }
 0xbbf   : > { %v2417_v25 = vadd.f32 %v4303_v52, %v2408_v23 }
 0xbc1   : > { %4323 = vmatmul.mubr.msk.f32.gmra.mxu1 %vm771_vm3, %v2417_v25 }
 0xbc2   : > { %4844 = vmatprep.mubr.msk.f32.mxu1 %vm5231_vm4, %v5229_v47 }
 0xc78   : > { %v2523_v61 = vpop.f32.mrf.mxu1 }
 0xc79   : > { %v2524_v8 = vadd.f32 %v2523_v61, %v2441_v2 }
 0xc7a   : > { %v2525_v1 = vpop.f32.mrf.mxu1 }
 0xc7b   : > { %v6156_v14 = vadd.f32 %v2525_v1, %v2445_v9 }
 0xc7c   : > { %v2529_v4 = vpop.f32.mrf.mxu1 }
 0xc7d   : > { %v6137_v5 = vadd.f32 %v2529_v4, %v2441_v2 }
 0xc7e   : > { %v2531_v6 = vpop.f32.mrf.mxu1 }
 0xc7f   : > { %2545 = vrot.lane.b32.xlu0 %v6137_v5, %s6790_s1  ;;  %v6149_v63 = vadd.f32 %v2531_v6, %v2445_v9 }
 0xc81   : > { %v2535_v0 = vpop.f32.mrf.mxu1 }
 0xc82   : > { %v6142_v16 = vadd.f32 %v2535_v0, %v2441_v2 }
 0xc83   : > { %v2537_v10 = vpop.f32.mrf.mxu1  ;;  %2775 = vrot.lane.b32.xlu0 %v2524_v8, %s6791_s28 }
 0xc84   : > { %v6145_v12 = vadd.f32 %v2537_v10, %v2445_v9  ;;  %2547 = vrot.lane.b32.xlu1 %v6142_v16, %s6790_s1 }
 0xc86   : > { %4854 = vmatpush3.msk.msra.mxu0 %vm755_vm1, %v6145_v12 }
 0xc87   : > { %4855 = vmatprep.subr.mxu0 %v5229_v47  ;;  %3020 = vrot.lane.b32.xlu0 %v6142_v16, %s6792_s0 }
 0xc88   : > { %2543 = vrot.lane.b32.xlu1 %v2524_v8, %s6790_s1  ;;  %4856 = vmatpush3.msra.mxu0 %v6149_v63  ;;  %s5068_s1 = smul.u32 3, %s6797_s25 }
 0xc89   : > { %4857 = vmatprep.subr.mxu0 %v5229_v47 }
 0xc8a   : > { %4858 = vmatpush3.msra.mxu0 %v6156_v14 }
 0xc8b   : > { %3018 = vrot.lane.b32.xlu0 %v6137_v5, %s6792_s0  ;;  %4883 = vmatprep.subr.mxu0 %v5229_v47 }
 0xc8c   : > { %2779 = vrot.lane.b32.xlu1 %v6142_v16, %s6791_s28 }
 0xc8f   : > { %3016 = vrot.lane.b32.xlu0 %v2524_v8, %s6792_s0 }
 0xc90   : > { %2777 = vrot.lane.b32.xlu1 %v6137_v5, %s6791_s28 }
 0xc93   : > { %3259 = vrot.lane.b32.xlu0 %v6142_v16, %s6789_s4 }
 0xc94   : > { %2769 = vrot.lane.b32.xlu1 %v2524_v8, %s6793_s23 }
 0xc97   : > { %3257 = vrot.lane.b32.xlu0 %v6137_v5, %s6789_s4 }
 0xc98   : > { %2771 = vrot.lane.b32.xlu1 %v6137_v5, %s6793_s23 }
 0xc9b   : > { %3255 = vrot.lane.b32.xlu0 %v2524_v8, %s6789_s4 }
 0xc9c   : > { %2773 = vrot.lane.b32.xlu1 %v6142_v16, %s6793_s23 }
 0xca0   : > { %3010 = vrot.lane.b32.xlu1 %v2524_v8, %s6794_s24 }
 0xca4   : > { %3012 = vrot.lane.b32.xlu1 %v6137_v5, %s6794_s24 }
 0xca8   : > { %3014 = vrot.lane.b32.xlu1 %v6142_v16, %s6794_s24 }
 0xcac   : > { %3249 = vrot.lane.b32.xlu1 %v2524_v8, %s6795_s27 }
 0xcb0   : > { %2915 = vrot.lane.b32.xlu1 %v6145_v12, %s6793_s23 }
 0xcf1   : > { %v2546_v17 = vpop.permute.xlu0 %2545 }
 0xcf5   : > { %v2776_v39 = vpop.permute.xlu0 %2775 }
 0xcf6   : > { %v2548_v3 = vpop.permute.xlu1 %2547 }
 0xcf7   : > { %4839 = vmatpush3.xpose.msk.msra.mxu1 %vm960_vm5, %v2548_v3 }
 0xcf8   : > { %4840 = vmatprep.subr.mxu1 %v5229_v47 }
 0xcf9   : > { %v3021_v13 = vpop.permute.xlu0 %3020 }
 0xcfa   : > { %v2544_v7 = vpop.permute.xlu1 %2543 }
 0xcfb   : > { %4841 = vmatpush3.xpose.msk.msra.mxu1 %vm960_vm5, %v2546_v17 }
 0xcfc   : > { %4842 = vmatprep.subr.mxu1 %v5229_v47 }
 0xcfd   : > { %v3019_v18 = vpop.permute.xlu0 %3018 }
 0xcfe   : > { %v2780_v38 = vpop.permute.xlu1 %2779 }
 0xcff   : > { %4843 = vmatpush3.xpose.msk.msra.mxu1 %vm960_vm5, %v2544_v7 }
 0xd00   : > { %4868 = vmatprep.subr.mxu1 %v5229_v47 }
 0xd01   : > { %v3017_v58 = vpop.permute.xlu0 %3016 }
 0xd02   : > { %v2778_v22 = vpop.permute.xlu1 %2777  ;;  %4845 = vmatmul.mubr.msk.f32.vlgmr.msra.gmra.mxu1 %vm960_vm5, %v2524_v8 }
 0xd03   : > { %4869 = vmatpush3.xpose.msk.msra.mxu1 %vm960_vm5, %v2780_v38  ;;  %4847 = vmatprep.mubr.msk.f32.mxu1 %vm5231_vm4, %v5229_v47 }
 0xd04   : > { %4870 = vmatprep.subr.mxu1 %v5229_v47 }
 0xd05   : > { %v3260_v26 = vpop.permute.xlu0 %3259 }
 0xd06   : > { %v2770_v59 = vpop.permute.xlu1 %2769  ;;  %4848 = vmatmul.mubr.msk.f32.gmra.mxu1 %vm960_vm5, %v6137_v5 }
 0xd07   : > { %4871 = vmatpush3.xpose.msk.msra.mxu1 %vm960_vm5, %v2778_v22  ;;  %4850 = vmatprep.mubr.msk.f32.mxu1 %vm5231_vm4, %v5229_v47 }
 0xd08   : > { %4872 = vmatprep.subr.mxu1 %v5229_v47 }
 0xd09   : > { %v3258_v28 = vpop.permute.xlu0 %3257 }
 0xd0a   : > { %v2772_v57 = vpop.permute.xlu1 %2771  ;;  %4851 = vmatmul.mubr.msk.f32.gmra.mxu1 %vm960_vm5, %v6142_v16 }
 0xd0b   : > { %4873 = vmatpush3.xpose.msk.msra.mxu1 %vm960_vm5, %v2776_v39  ;;  %4874 = vmatprep.mubr.msk.f32.mxu1 %vm5231_vm4, %v5229_v47 }
 0xd0c   : > { %4898 = vmatprep.subr.mxu1 %v5229_v47 }
 0xd0d   : > { %v3256_v31 = vpop.permute.xlu0 %3255 }
 0xd0e   : > { %v2774_v11 = vpop.permute.xlu1 %2773  ;;  %4875 = vmatmul.mubr.msk.f32.vlgmr.msra.gmra.mxu1 %vm960_vm5, %v2770_v59 }
 0xd0f   : > { %4899 = vmatpush3.xpose.msk.msra.mxu1 %vm960_vm5, %v3021_v13  ;;  %4877 = vmatprep.mubr.msk.f32.mxu1 %vm5231_vm4, %v5229_v47 }
 0xd10   : > { %4900 = vmatprep.subr.mxu1 %v5229_v47 }
 0xd12   : > { %4878 = vmatmul.mubr.msk.f32.gmra.mxu1 %vm960_vm5, %v2772_v57  ;;  %v3011_v15 = vpop.permute.xlu1 %3010 }
 0xd13   : > { %4901 = vmatpush3.xpose.msk.msra.mxu1 %vm960_vm5, %v3019_v18  ;;  %4880 = vmatprep.mubr.msk.f32.mxu1 %vm5231_vm4, %v5229_v47 }
 0xd14   : > { %4902 = vmatprep.subr.mxu1 %v5229_v47 }
 0xd16   : > { %4881 = vmatmul.mubr.msk.f32.gmra.mxu1 %vm960_vm5, %v2774_v11  ;;  %v3013_v27 = vpop.permute.xlu1 %3012 }
 0xd17   : > { %4903 = vmatpush3.xpose.msk.msra.mxu1 %vm960_vm5, %v3017_v58  ;;  %4904 = vmatprep.mubr.msk.f32.mxu1 %vm5231_vm4, %v5229_v47 }
 0xd18   : > { %4928 = vmatprep.subr.mxu1 %v5229_v47 }
 0xd1a   : > { %4905 = vmatmul.mubr.msk.f32.vlgmr.msra.gmra.mxu1 %vm960_vm5, %v3011_v15  ;;  %v3015_v24 = vpop.permute.xlu1 %3014 }
 0xd1b   : > { %4929 = vmatpush3.xpose.msk.msra.mxu1 %vm960_vm5, %v3260_v26  ;;  %4907 = vmatprep.mubr.msk.f32.mxu1 %vm5231_vm4, %v5229_v47 }
 0xd1c   : > { %4930 = vmatprep.subr.mxu1 %v5229_v47 }
 0xd1e   : > { %4908 = vmatmul.mubr.msk.f32.gmra.mxu1 %vm960_vm5, %v3013_v27  ;;  %v3250_v33 = vpop.permute.xlu1 %3249 }
 0xd1f   : > { %4931 = vmatpush3.xpose.msk.msra.mxu1 %vm960_vm5, %v3258_v28  ;;  %4910 = vmatprep.mubr.msk.f32.mxu1 %vm5231_vm4, %v5229_v47 }
 0xd20   : > { %4932 = vmatprep.subr.mxu1 %v5229_v47 }
 0xd22   : > { %4911 = vmatmul.mubr.msk.f32.gmra.mxu1 %vm960_vm5, %v3015_v24  ;;  %v6274_v18 = vpop.permute.xlu1 %2915 }
 0xd23   : > { %4933 = vmatpush3.xpose.msk.msra.mxu1 %vm960_vm5, %v3256_v31  ;;  %4934 = vmatprep.mubr.msk.f32.mxu1 %vm5231_vm4, %v5229_v47 }
 0xd24   : > { %4958 = vmatprep.subr.mxu1 %v5229_v47 }
 0xd26   : > { %4935 = vmatmul.mubr.msk.f32.vlgmr.msra.gmra.mxu1 %vm960_vm5, %v3250_v33 }
 0xd27   : > { %4937 = vmatprep.mubr.msk.f32.mxu1 %vm5231_vm4, %v5229_v47 }
 0xdc2   : > { %v2627_v35 = vpop.f32.mrf.mxu1 }
 0xdc3   : > { %v2641_v36 = vmul.f32 0.25, %v2627_v35 }
 0xdc4   : > { %v4846_v40 = vpop.f32.mrf.mxu1 }
 0xdc5   : > { %v2644_v32 = vsel %vm1056_vm6, %v2641_v36, -inf }
 0xdc6   : > { %2645 = vmax.xlane.f32.xlu0 %v2644_v32  ;;  %v2632_v42 = vpop.f32.mrf.mxu1 }
 0xdc7   : > { %v2642_v43 = vmul.f32 0.25, %v2632_v42 }
 0xdc8   : > { %v4849_v44 = vpop.f32.mrf.mxu1 }
 0xdc9   : > { %v2647_v46 = vsel %vm1056_vm6, %v2642_v43, -inf }
 0xdca   : > { %2648 = vmax.xlane.f32.xlu1 %v2647_v46  ;;  %v2637_v48 = vpop.f32.mrf.mxu1 }
 0xdcb   : > { %v2643_v49 = vmul.f32 0.25, %v2637_v48 }
 0xdcc   : > { %v4852_v51 = vpop.f32.mrf.mxu1 }
 0xdcd   : > { %v2650_v52 = vsel %vm1063_vm7, %v2643_v49, -inf }
 0xdce   : > { %2651 = vmax.xlane.f32.xlu0 %v2650_v52  ;;  %v2859_v37 = vpop.f32.mrf.mxu1 }
 0xdcf   : > { %v2873_v53 = vmul.f32 0.25, %v2859_v37 }
 0xdd0   : > { %v4876_v55 = vpop.f32.mrf.mxu1 }
 0xdd1   : > { %v2876_v60 = vsel %vm1056_vm6, %v2873_v53, -inf }
 0xdd2   : > { %2877 = vmax.xlane.f32.xlu0 %v2876_v60  ;;  %v2864_v34 = vpop.f32.mrf.mxu1 }
 0xdd3   : > { %v2874_v41 = vmul.f32 0.25, %v2864_v34 }
 0xdd4   : > { %v4879_v45 = vpop.f32.mrf.mxu1 }
 0xdd5   : > { %v2879_v50 = vsel %vm1056_vm6, %v2874_v41, -inf }
 0xdd6   : > { %2880 = vmax.xlane.f32.xlu0 %v2879_v50  ;;  %v2869_v23 = vpop.f32.mrf.mxu1 }
 0xdd7   : > { %v2875_v25 = vmul.f32 0.25, %v2869_v23 }
 0xdd8   : > { %v4882_v56 = vpop.f32.mrf.mxu1 }
 0xdd9   : > { %v2882_v61 = vsel %vm1063_vm7, %v2875_v25, -inf }
 0xdda   : > { %2883 = vmax.xlane.f32.xlu1 %v2882_v61  ;;  %v3100_v1 = vpop.f32.mrf.mxu1 }
 0xddb   : > { %v6250_v2 = vmul.f32 0.25, %v3100_v1 }
 0xddc   : > { %v4906_v4 = vpop.f32.mrf.mxu1 }
 0xddd   : > { %v3117_v6 = vsel %vm1056_vm6, %v6250_v2, -inf }
 0xdde   : > { %3118 = vmax.xlane.f32.xlu0 %v3117_v6  ;;  %v3105_v8 = vpop.f32.mrf.mxu1 }
 0xddf   : > { %v6254_v0 = vmul.f32 0.25, %v3105_v8 }
 0xde0   : > { %v4909_v9 = vpop.f32.mrf.mxu1 }
 0xde1   : > { %v3120_v10 = vsel %vm1056_vm6, %v6254_v0, -inf }
 0xde2   : > { %3121 = vmax.xlane.f32.xlu1 %v3120_v10  ;;  %v3110_v3 = vpop.f32.mrf.mxu1 }
 0xde3   : > { %v6258_v17 = vmul.f32 0.25, %v3110_v3 }
 0xde4   : > { %v4912_v7 = vpop.f32.mrf.mxu1 }
 0xde5   : > { %v3123_v39 = vsel %vm1063_vm7, %v6258_v17, -inf }
 0xde6   : > { %3124 = vmax.xlane.f32.xlu0 %v3123_v39  ;;  %v3339_v38 = vpop.f32.mrf.mxu1 }
 0xde7   : > { %v6268_v13 = vmul.f32 0.25, %v3339_v38 }
 0xde8   : > { %v4936_v22 = vpop.f32.mrf.mxu1 }
 0xde9   : > { %v3356_v59 = vsel %vm1056_vm6, %v6268_v13, -inf }
 0xdf3   : > { %2911 = vrot.lane.b32.xlu1 %v6156_v14, %s6793_s23 }
 0xdf7   : > { %3154 = vrot.lane.b32.xlu1 %v6145_v12, %s6794_s24 }
 0xdfc   : > { %2913 = vrot.lane.b32.xlu0 %v6149_v63, %s6793_s23 }
 0xe1b   : > { %3357 = vmax.xlane.f32.xlu1 %v3356_v59 }
 0xe2c   : > { %3152 = vrot.lane.b32.xlu1 %v6149_v63, %s6794_s24 }
 0xe4f   : > { %v2646_v57 = vpop.xlane.xlu0 %2645 }
 0xe50   : > { %v2653_v11 = vsub.f32 %v2641_v36, %v2646_v57 }
 0xe52   : > { %v2656_v58 = vmul.f32 1.442695, %v2653_v11 }
 0xe53   : > { %v2649_v15 = vpop.xlane.xlu1 %2648 }
 0xe54   : > { %5159 = vpow2.f32 %v2656_v58  ;;  %v2654_v26 = vsub.f32 %v2642_v43, %v2649_v15 }
 0xe56   : > { %v2658_v27 = vmul.f32 1.442695, %v2654_v26 }
 0xe57   : > { %v2652_v28 = vpop.xlane.xlu0 %2651 }
 0xe58   : > { %5161 = vpow2.f32 %v2658_v27  ;;  %v2655_v24 = vsub.f32 %v2643_v49, %v2652_v28 }
 0xe5a   : > { %v2660_v31 = vmul.f32 1.442695, %v2655_v24 }
 0xe5b   : > { %v2878_v33 = vpop.xlane.xlu0 %2877 }
 0xe5c   : > { %5163 = vpow2.f32 %v2660_v31  ;;  %v2885_v35 = vsub.f32 %v2873_v53, %v2878_v33 }
 0xe5e   : > { %v2888_v40 = vmul.f32 1.442695, %v2885_v35 }
 0xe5f   : > { %v2881_v32 = vpop.xlane.xlu0 %2880 }
 0xe60   : > { %5165 = vpow2.f32 %v2888_v40  ;;  %v2886_v42 = vsub.f32 %v2874_v41, %v2881_v32 }
 0xe61   : > { %v6276_v44 = vpop.eup %5159 }
 0xe62   : > { %v2890_v46 = vmul.f32 1.442695, %v2886_v42  ;;  %v2662_v36 = vsel %vm1056_vm6, %v6276_v44, 0.0 }
 0xe63   : > { %v2884_v48 = vpop.xlane.xlu1 %2883  ;;  %2663 = vadd.xlane.f32.xlu0 %v2662_v36 }
 0xe64   : > { %5167 = vpow2.f32 %v2890_v46  ;;  %v2887_v43 = vsub.f32 %v2875_v25, %v2884_v48 }
 0xe65   : > { %v6280_v51 = vpop.eup %5161 }
 0xe66   : > { %v2892_v49 = vmul.f32 1.442695, %v2887_v43  ;;  %v2665_v52 = vsel %vm1056_vm6, %v6280_v51, 0.0 }
 0xe67   : > { %2666 = vadd.xlane.f32.xlu1 %v2665_v52  ;;  %v3119_v23 = vpop.xlane.xlu0 %3118 }
 0xe68   : > { %5169 = vpow2.f32 %v2892_v49  ;;  %v3126_v25 = vsub.f32 %v6250_v2, %v3119_v23 }
 0xe69   : > { %v6284_v37 = vpop.eup %5163 }
 0xe6a   : > { %v2668_v53 = vsel %vm1063_vm7, %v6284_v37, 0.0  ;;  %v3129_v4 = vmul.f32 1.442695, %v3126_v25 }
 0xe6b   : > { %2669 = vadd.xlane.f32.xlu0 %v2668_v53  ;;  %v3122_v56 = vpop.xlane.xlu1 %3121 }
 0xe6c   : > { %v3127_v1 = vsub.f32 %v6254_v0, %v3122_v56  ;;  %5171 = vpow2.f32 %v3129_v4 }
 0xe6d   : > { %v6288_v55 = vpop.eup %5165 }
 0xe6e   : > { %v2894_v60 = vsel %vm1056_vm6, %v6288_v55, 0.0  ;;  %v3131_v8 = vmul.f32 1.442695, %v3127_v1 }
 0xe6f   : > { %2895 = vadd.xlane.f32.xlu1 %v2894_v60  ;;  %v3125_v61 = vpop.xlane.xlu0 %3124  ;;  %v2912_v10 = vpop.permute.xlu1 %2911 }
 0xe70   : > { %v3128_v6 = vsub.f32 %v6258_v17, %v3125_v61  ;;  %5173 = vpow2.f32 %v3131_v8 }
 0xe71   : > { %v6292_v34 = vpop.eup %5167 }
 0xe72   : > { %v2897_v41 = vsel %vm1056_vm6, %v6292_v34, 0.0  ;;  %v3133_v9 = vmul.f32 1.442695, %v3128_v6 }
 0xe73   : > { %2898 = vadd.xlane.f32.xlu0 %v2897_v41  ;;  %v3155_v3 = vpop.permute.xlu1 %3154  ;;  %v2914_v11 = vpop.permute.xlu0 %2913 }
 0xe74   : > { %5175 = vpow2.f32 %v3133_v9 }
 0xe75   : > { %v6296_v45 = vpop.eup %5169 }
 0xe76   : > { %v2900_v50 = vsel %vm1063_vm7, %v6296_v45, 0.0 }
 0xe77   : > { %2901 = vadd.xlane.f32.xlu1 %v2900_v50 }
 0xe79   : > { %v6307_v7 = vpop.eup %5171 }
 0xe7a   : > { %v3135_v0 = vsel %vm1056_vm6, %v6307_v7, 0.0 }
 0xe7d   : > { %v6310_v2 = vpop.eup %5173 }
 0xe7e   : > { %v3138_v17 = vsel %vm1056_vm6, %v6310_v2, 0.0 }
 0xe81   : > { %v6314_v22 = vpop.eup %5175 }
 0xe82   : > { %v3141_v59 = vsel %vm1063_vm7, %v6314_v22, 0.0 }
 0xe88   : > { %3150 = vrot.lane.b32.xlu1 %v6156_v14, %s6794_s24 }
 0xe89   : > { %3393 = vrot.lane.b32.xlu0 %v6145_v12, %s6795_s27 }
 0xea4   : > { %v3358_v12 = vpop.xlane.xlu1 %3357 }
 0xea5   : > { %v3365_v39 = vsub.f32 %v6268_v13, %v3358_v12 }
 0xea7   : > { %v3368_v38 = vmul.f32 1.442695, %v3365_v39 }
 0xea8   : > { %3136 = vadd.xlane.f32.xlu0 %v3135_v0  ;;  %v3153_v58 = vpop.permute.xlu1 %3152  ;;  %v4371_v0 = vld [vmem:[%s6746_s9 + $0x78] sm:$0xff] }
 0xea9   : > { %5177 = vpow2.f32 %v3368_v38  ;;  %4959 = vmatpush3.msra.mxu1 %v4371_v0 }
 0xeaa   : > { %4960 = vmatprep.subr.mxu1 %v5229_v47 }
 0xeac   : > { %3139 = vadd.xlane.f32.xlu1 %v3138_v17  ;;  %3142 = vadd.xlane.f32.xlu0 %v3141_v59  ;;  %v4369_v17 = vld [vmem:[%s6746_s9 + $0x68] sm:$0xff]  ;;  %v4368_v59 = vld [vmem:[%s6746_s9 + $0x60] sm:$0xff] }
 0xeb6   : > { %v6320_v57 = vpop.eup %5177 }
 0xeb7   : > { %v3374_v13 = vsel %vm1056_vm6, %v6320_v57, 0.0 }
 0xeb8   : > { %3375 = vadd.xlane.f32.xlu0 %v3374_v13 }
 0xebd   : > { %3391 = vrot.lane.b32.xlu1 %v6149_v63, %s6795_s27 }
 0xec1   : > { %3251 = vrot.lane.b32.xlu1 %v6137_v5, %s6795_s27 }
 0xece   : > { %3389 = vrot.lane.b32.xlu0 %v6156_v14, %s6795_s27 }
 0xed2   : > { %3253 = vrot.lane.b32.xlu0 %v6142_v16, %s6795_s27  ;;  %s654_s27 = scalar_lea.vmem %s6758_s21, %s5068_s1 }
 0xeec   : > { %v2664_v15 = vpop.xlane.xlu0 %2663 }
 0xeed   : > { %5179 = vrcp.f32 %v2664_v15  ;;  %v4365_v15 = vld [vmem:[%s6746_s9 + $0x48] sm:$0xff] }
 0xef0   : > { %v2667_v26 = vpop.xlane.xlu1 %2666 }
 0xef1   : > { %5181 = vrcp.f32 %v2667_v26 }
 0xef4   : > { %v2670_v27 = vpop.xlane.xlu0 %2669 }
 0xef5   : > { %5183 = vrcp.f32 %v2670_v27 }
 0xef8   : > { %v2896_v28 = vpop.xlane.xlu1 %2895 }
 0xef9   : > { %5185 = vrcp.f32 %v2896_v28 }
 0xefa   : > { %v5180_v63 = vpop.eup %5179 }
 0xefb   : > { %v2674_v24 = vmul.f32 %v5180_v63, %v6276_v44  ;;  %v4364_v63 = vld [vmem:[%s6746_s9 + $0x40] sm:$0xff] }
 0xefc   : > { %v2899_v5 = vpop.xlane.xlu0 %2898 }
 0xefd   : > { %5187 = vrcp.f32 %v2899_v5  ;;  %4860 = vmatmul.mubr.msk.f32.vlgmr.msra.gmra.mxu0 %vm1056_vm6, %v2674_v24 }
 0xefe   : > { %v5182_v14 = vpop.eup %5181  ;;  %4884 = vmatpush3.msk.msra.mxu0 %vm755_vm1, %v6274_v18  ;;  %4862 = vmatprep.mubr.msk.f32.mxu0 %vm5231_vm4, %v5229_v47 }
 0xeff   : > { %4885 = vmatprep.subr.mxu0 %v5229_v47  ;;  %v2675_v16 = vmul.f32 %v5182_v14, %v6280_v51 }
 0xf00   : > { %4886 = vmatpush3.msra.mxu0 %v2914_v11  ;;  %v2902_v31 = vpop.xlane.xlu1 %2901  ;;  %v3394_v48 = vpop.permute.xlu0 %3393  ;;  %v4366_v11 = vld [vmem:[%s6746_s9 + $0x50] sm:$0xff] }
 0xf01   : > { %5189 = vrcp.f32 %v2902_v31  ;;  %4887 = vmatprep.subr.mxu0 %v5229_v47  ;;  %4863 = vmatmul.mubr.msk.f32.gmra.mxu0 %vm1056_vm6, %v2675_v16 }
 0xf02   : > { %v5184_v33 = vpop.eup %5183  ;;  %4888 = vmatpush3.msra.mxu0 %v2912_v10  ;;  %4865 = vmatprep.mubr.msk.f32.mxu0 %vm5231_vm4, %v5229_v47 }
 0xf03   : > { %v2676_v18 = vmul.f32 %v5184_v33, %v6284_v37  ;;  %4913 = vmatprep.subr.mxu0 %v5229_v47 }
 0xf04   : > { %v3151_v44 = vpop.permute.xlu1 %3150 }
 0xf05   : > { %4866 = vmatmul.mubr.msk.f32.gmra.mxu0 %vm1056_vm6, %v2676_v18 }
 0xf06   : > { %v5186_v35 = vpop.eup %5185  ;;  %4889 = vmatprep.mubr.msk.f32.mxu0 %vm5231_vm4, %v5229_v47 }
 0xf07   : > { %v2906_v40 = vmul.f32 %v5186_v35, %v6288_v55 }
 0xf09   : > { %4890 = vmatmul.mubr.msk.f32.vlgmr.msra.gmra.mxu0 %vm1056_vm6, %v2906_v40 }
 0xf0a   : > { %v5188_v32 = vpop.eup %5187  ;;  %4914 = vmatpush3.msk.msra.mxu0 %vm755_vm1, %v3155_v3  ;;  %4892 = vmatprep.mubr.msk.f32.mxu0 %vm5231_vm4, %v5229_v47 }
 0xf0b   : > { %4915 = vmatprep.subr.mxu0 %v5229_v47  ;;  %v2907_v42 = vmul.f32 %v5188_v32, %v6292_v34 }
 0xf0c   : > { %4916 = vmatpush3.msra.mxu0 %v3153_v58 }
 0xf0d   : > { %4917 = vmatprep.subr.mxu0 %v5229_v47  ;;  %4893 = vmatmul.mubr.msk.f32.gmra.mxu0 %vm1056_vm6, %v2907_v42 }
 0xf0e   : > { %v5190_v46 = vpop.eup %5189  ;;  %4918 = vmatpush3.msra.mxu0 %v3151_v44  ;;  %4895 = vmatprep.mubr.msk.f32.mxu0 %vm5231_vm4, %v5229_v47 }
 0xf0f   : > { %v2908_v36 = vmul.f32 %v5190_v46, %v6296_v45  ;;  %4943 = vmatprep.subr.mxu0 %v5229_v47 }
 0xf11   : > { %4896 = vmatmul.mubr.msk.f32.gmra.mxu0 %vm1056_vm6, %v2908_v36 }
 0xf12   : > { %4919 = vmatprep.mubr.msk.f32.mxu0 %vm5231_vm4, %v5229_v47 }
 0xf31   : > { %v3137_v43 = vpop.xlane.xlu0 %3136 }
 0xf32   : > { %5191 = vrcp.f32 %v3137_v43 }
 0xf35   : > { %v3140_v51 = vpop.xlane.xlu1 %3139  ;;  %v3143_v49 = vpop.xlane.xlu0 %3142 }
 0xf36   : > { %5193 = vrcp.f32 %v3140_v51 }
 0xf37   : > { %5195 = vrcp.f32 %v3143_v49 }
 0xf39   : > { %v3392_v52 = vpop.permute.xlu1 %3391 }
 0xf3d   : > { %v3252_v37 = vpop.permute.xlu1 %3251 }
 0xf3e   : > { %4938 = vmatmul.mubr.msk.f32.gmra.mxu1 %vm960_vm5, %v3252_v37 }
 0xf3f   : > { %v5192_v53 = vpop.eup %5191  ;;  %4940 = vmatprep.mubr.msk.f32.mxu1 %vm5231_vm4, %v5229_v47 }
 0xf40   : > { %v3147_v55 = vmul.f32 %v5192_v53, %v6307_v7 }
 0xf41   : > { %v3376_v60 = vpop.xlane.xlu0 %3375 }
 0xf42   : > { %5197 = vrcp.f32 %v3376_v60  ;;  %4920 = vmatmul.mubr.msk.f32.vlgmr.msra.gmra.mxu0 %vm1056_vm6, %v3147_v55 }
 0xf43   : > { %v5194_v34 = vpop.eup %5193  ;;  %4944 = vmatpush3.msk.msra.mxu0 %vm755_vm1, %v3394_v48  ;;  %4922 = vmatprep.mubr.msk.f32.mxu0 %vm5231_vm4, %v5229_v47 }
 0xf44   : > { %4945 = vmatprep.subr.mxu0 %v5229_v47  ;;  %v3148_v41 = vmul.f32 %v5194_v34, %v6310_v2  ;;  %v5196_v45 = vpop.eup %5195 }
 0xf45   : > { %4946 = vmatpush3.msra.mxu0 %v3392_v52  ;;  %v3390_v50 = vpop.permute.xlu0 %3389  ;;  %v3149_v23 = vmul.f32 %v5196_v45, %v6314_v22  ;;  %v4370_v22 = vld [vmem:[%s6746_s9 + $0x70] sm:$0xff] }
 0xf46   : > { %4947 = vmatprep.subr.mxu0 %v5229_v47  ;;  %4923 = vmatmul.mubr.msk.f32.gmra.mxu0 %vm1056_vm6, %v3148_v41 }
 0xf47   : > { %4948 = vmatpush3.msra.mxu0 %v3390_v50  ;;  %4925 = vmatprep.mubr.msk.f32.mxu0 %vm5231_vm4, %v5229_v47 }
 0xf48   : > { %4983 = vmatprep.subr.mxu0 %v5229_v47  ;;  %4961 = vmatpush3.msra.mxu1 %v4370_v22 }
 0xf49   : > { %v3254_v25 = vpop.permute.xlu0 %3253  ;;  %4962 = vmatprep.subr.mxu1 %v5229_v47 }
 0xf4a   : > { %4926 = vmatmul.mubr.msk.f32.gmra.mxu0 %vm1056_vm6, %v3149_v23  ;;  %4941 = vmatmul.mubr.msk.f32.gmra.mxu1 %vm960_vm5, %v3254_v25  ;;  %v6449_v25 = vld [vmem:[%s6747_s10 + $0x1] ss:$0 sm:$0xff] }
 0xf4b   : > { %4949 = vmatprep.mubr.msk.f32.mxu0 %vm5231_vm4, %v5229_v47  ;;  %4974 = vmatprep.mubr.msk.f32.mxu1 %vm5231_vm4, %v5229_v47 }
 0xf4c   : > { %4963 = vmatpush3.msra.mxu1 %v4369_v17 }
 0xf4d   : > { %4964 = vmatprep.subr.mxu1 %v5229_v47 }
 0xf4e   : > { %4965 = vmatpush3.msra.mxu1 %v4368_v59 }
 0xf4f   : > { %v5198_v56 = vpop.eup %5197  ;;  %4966 = vmatprep.subr.mxu1 %v5229_v47 }
 0xf50   : > { %v3386_v61 = vmul.f32 %v5198_v56, %v6320_v57  ;;  %v4367_v57 = vld [vmem:[%s6746_s9 + $0x58] sm:$0xff] }
 0xf51   : > { %4967 = vmatpush3.msra.mxu1 %v4367_v57  ;;  %v4387_v57 = vld [vmem:[%s6750_s13 + $0x70] sm:$0xff] }
 0xf52   : > { %4950 = vmatmul.mubr.msk.f32.vlgmr.msra.gmra.mxu0 %vm1056_vm6, %v3386_v61  ;;  %4968 = vmatprep.subr.mxu1 %v5229_v47 }
 0xf53   : > { %4952 = vmatprep.mubr.msk.f32.mxu0 %vm5231_vm4, %v5229_v47  ;;  %4969 = vmatpush3.msra.mxu1 %v4366_v11  ;;  %v4385_v11 = vld [vmem:[%s6750_s13 + $0x60] sm:$0xff] }
 0xf54   : > { %4970 = vmatprep.subr.mxu1 %v5229_v47 }
 0xf55   : > { %4971 = vmatpush3.msra.mxu1 %v4365_v15  ;;  %v4383_v15 = vld [vmem:[%s6750_s13 + $0x50] sm:$0xff] }
 0xf56   : > { %4972 = vmatprep.subr.mxu1 %v5229_v47 }
 0xf57   : > { %4973 = vmatpush3.msra.mxu1 %v4364_v63 }
 0xf58   : > { %5008 = vmatprep.subr.mxu1 %v5229_v47 }
 0xfbd   : > { %v2755_v1 = vpop.f32.mrf.mxu0 }
 0xfbf   : > { %v4861_v4 = vpop.f32.mrf.mxu0 }
 0xfc1   : > { %v6391_v6 = vpop.f32.mrf.mxu0 }
 0xfc3   : > { %v4864_v8 = vpop.f32.mrf.mxu0 }
 0xfc5   : > { %v6393_v9 = vpop.f32.mrf.mxu0 }
 0xfc7   : > { %v4867_v10 = vpop.f32.mrf.mxu0 }
 0xfc9   : > { %v2996_v3 = vpop.f32.mrf.mxu0 }
 0xfca   : > { %3491 = vrot.lane.b32.xlu1 %v2996_v3, %s6789_s4 }
 0xfcb   : > { %v4891_v7 = vpop.f32.mrf.mxu0 }
 0xfcd   : > { %v6396_v12 = vpop.f32.mrf.mxu0 }
 0xfcf   : > { %v4894_v39 = vpop.f32.mrf.mxu0 }
 0xfd1   : > { %v6398_v2 = vpop.f32.mrf.mxu0 }
 0xfd3   : > { %v4897_v38 = vpop.f32.mrf.mxu0 }
 0xffe   : > { %v3344_v13 = vpop.f32.mrf.mxu1 }
 0xfff   : > { %v3354_v35 = vmul.f32 0.25, %v3344_v13  ;;  %v4386_v13 = vld [vmem:[%s6750_s13 + $0x68] sm:$0xff] }
0x1000   : > { %v4939_v58 = vpop.f32.mrf.mxu1 }
0x1001   : > { %v3359_v40 = vsel %vm1056_vm6, %v3354_v35, -inf  ;;  %v4384_v58 = vld [vmem:[%s6750_s13 + $0x58] sm:$0xff] }
0x1002   : > { %v3235_v26 = vpop.f32.mrf.mxu0 }
0x1003   : > { %3503 = vrot.lane.b32.xlu0 %v3235_v26, %s6792_s0  ;;  %v4382_v26 = vld [vmem:[%s6750_s13 + $0x48] sm:$0xff] }
0x1004   : > { %v4921_v27 = vpop.f32.mrf.mxu0 }
0x1005   : > { %v4381_v27 = vld [vmem:[%s6750_s13 + $0x40] sm:$0xff] }
0x1006   : > { %v6429_v28 = vpop.f32.mrf.mxu0 }
0x1008   : > { %v4924_v24 = vpop.f32.mrf.mxu0 }
0x100a   : > { %v3245_v5 = vpop.f32.mrf.mxu0  ;;  %v3349_v14 = vpop.f32.mrf.mxu1 }
0x100b   : > { %v3355_v32 = vmul.f32 0.25, %v3349_v14 }
0x100c   : > { %v4927_v16 = vpop.f32.mrf.mxu0  ;;  %v4942_v31 = vpop.f32.mrf.mxu1 }
0x100d   : > { %v3362_v42 = vsel %vm1063_vm7, %v3355_v32, -inf }
0x1012   : > { %v3474_v33 = vpop.f32.mrf.mxu0 }
0x1013   : > { %3515 = vrot.lane.b32.xlu1 %v3474_v33, %s6791_s28 }
0x1014   : > { %v4951_v18 = vpop.f32.mrf.mxu0 }
0x1015   : > { %v6508_v18 = vld [vmem:[%s6748_s11 + $0x1] ss:$0 sm:$0xff] }
0x1022   : > { %3360 = vmax.xlane.f32.xlu0 %v3359_v40  ;;  %v6513_v40 = vld [vmem:[%s6749_s12 + $0x1] ss:$0 sm:$0xff] }
0x1037   : > { %3363 = vmax.xlane.f32.xlu1 %v3362_v42 }
0x103c   : > { %v3492_v44 = vpop.permute.xlu1 %3491 }
0x103d   : > { %v3524_v36 = vsel %vm960_vm5, %v2755_v1, %v3492_v44 }
0x1075   : > { %v3504_v46 = vpop.permute.xlu0 %3503 }
0x1076   : > { %v3527_v48 = vsel %vm1941_vm8, %v3524_v36, %v3504_v46 }
0x1085   : > { %v3516_v43 = vpop.permute.xlu1 %3515 }
0x1086   : > { %v3530_v51 = vsel %vm670_vm0, %v3527_v48, %v3516_v43 }
0x1087   : > { %4975 = vmatmul.mubr.msk.f32.vlgmr.msra.gmra.mxu1 %vm771_vm3, %v3530_v51 }
0x1088   : > { %4977 = vmatprep.mubr.msk.f32.mxu1 %vm5231_vm4, %v5229_v47 }
0x10ab   : > { %v3361_v49 = vpop.xlane.xlu0 %3360 }
0x10ac   : > { %v3366_v52 = vsub.f32 %v3354_v35, %v3361_v49 }
0x10ae   : > { %v3370_v37 = vmul.f32 1.442695, %v3366_v52 }
0x10b0   : > { %5199 = vpow2.f32 %v3370_v37 }
0x10bd   : > { %v5200_v53 = vpop.eup %5199 }
0x10be   : > { %v3377_v55 = vsel %vm1056_vm6, %v5200_v53, 0.0 }
0x10bf   : > { %3378 = vadd.xlane.f32.xlu0 %v3377_v55  ;;  %v4409_v55 = vld [vmem:[%s6752_s15 + $0xf8] sm:$0xff] }
0x10c0   : > { %v3364_v60 = vpop.xlane.xlu1 %3363  ;;  %5009 = vmatpush3.msra.mxu1 %v4409_v55 }
0x10c1   : > { %v3367_v34 = vsub.f32 %v3355_v32, %v3364_v60  ;;  %5010 = vmatprep.subr.mxu1 %v5229_v47  ;;  %v4407_v60 = vld [vmem:[%s6752_s15 + $0xe8] sm:$0xff] }
0x10c3   : > { %v3372_v41 = vmul.f32 1.442695, %v3367_v34  ;;  %v4406_v34 = vld [vmem:[%s6752_s15 + $0xe0] sm:$0xff] }
0x10c5   : > { %5201 = vpow2.f32 %v3372_v41  ;;  %v4405_v41 = vld [vmem:[%s6752_s15 + $0xd8] sm:$0xff] }
0x10d2   : > { %v5202_v45 = vpop.eup %5201 }
0x10d3   : > { %v3380_v50 = vsel %vm1063_vm7, %v5202_v45, 0.0 }
0x10d4   : > { %3381 = vadd.xlane.f32.xlu0 %v3380_v50  ;;  %v4403_v50 = vld [vmem:[%s6752_s15 + $0xc8] sm:$0xff] }
0x1147   : > { %v3617_v23 = vpop.f32.mrf.mxu1 }
0x1148   : > { %v3631_v56 = vadd.f32 %v3617_v23, %v6036_v30  ;;  %v3379_v61 = vpop.xlane.xlu0 %3378  ;;  %v4402_v23 = vld [vmem:[%s6752_s15 + $0xc0] sm:$0xff] }
0x1149   : > { %5203 = vrcp.f32 %v3379_v61  ;;  %v4976_v1 = vpop.f32.mrf.mxu1  ;;  %v4400_v61 = vld [vmem:[%s6752_s15 + $0xb0] sm:$0xff] }
0x114a   : > { %v6453_v4 = vadd.f32 %v6449_v25, %v3631_v56  ;;  %v4401_v56 = vld [vmem:[%s6752_s15 + $0xb8] sm:$0xff]  ;;  %v4399_v1 = vld [vmem:[%s6752_s15 + $0xa8] sm:$0xff] }
0x114c   : > { %v3649_v8 = vsel %vm771_vm3, %v6453_v4, 0.0 }
0x114d   : > { %3650 = vadd.xlane.f32.xlu0 %v3649_v8  ;;  %v4398_v8 = vld [vmem:[%s6752_s15 + $0xa0] sm:$0xff] }
0x1156   : > { %v5204_v10 = vpop.eup %5203 }
0x1157   : > { %v3387_v3 = vmul.f32 %v5204_v10, %v5200_v53  ;;  %v4397_v10 = vld [vmem:[%s6752_s15 + $0x98] sm:$0xff] }
0x1159   : > { %4953 = vmatmul.mubr.msk.f32.gmra.mxu0 %vm1056_vm6, %v3387_v3  ;;  %v4396_v3 = vld [vmem:[%s6752_s15 + $0x90] sm:$0xff] }
0x115a   : > { %4955 = vmatprep.mubr.msk.f32.mxu0 %vm5231_vm4, %v5229_v47 }
0x115d   : > { %v3382_v7 = vpop.xlane.xlu0 %3381 }
0x115e   : > { %5205 = vrcp.f32 %v3382_v7  ;;  %v4395_v7 = vld [vmem:[%s6752_s15 + $0x88] sm:$0xff] }
0x1163   : > { %3493 = vrot.lane.b32.xlu0 %v6396_v12, %s6789_s4  ;;  %v4388_v12 = vld [vmem:[%s6750_s13 + $0x78] sm:$0xff] }
0x1164   : > { %4984 = vmatpush3.msra.mxu0 %v4388_v12 }
0x1165   : > { %4985 = vmatprep.subr.mxu0 %v5229_v47 }
0x1166   : > { %4986 = vmatpush3.msra.mxu0 %v4387_v57 }
0x1167   : > { %3507 = vrot.lane.b32.xlu0 %v3245_v5, %s6792_s0  ;;  %4987 = vmatprep.subr.mxu0 %v5229_v47 }
0x1168   : > { %4988 = vmatpush3.msra.mxu0 %v4386_v13 }
0x1169   : > { %4989 = vmatprep.subr.mxu0 %v5229_v47 }
0x116a   : > { %4990 = vmatpush3.msra.mxu0 %v4385_v11 }
0x116b   : > { %v5206_v30 = vpop.eup %5205  ;;  %4991 = vmatprep.subr.mxu0 %v5229_v47 }
0x116c   : > { %v3388_v39 = vmul.f32 %v5206_v30, %v5202_v45  ;;  %4992 = vmatpush3.msra.mxu0 %v4384_v58  ;;  %v4404_v45 = vld [vmem:[%s6752_s15 + $0xd0] sm:$0xff]  ;;  %v4394_v30 = vld [vmem:[%s6752_s15 + $0x80] sm:$0xff] }
0x116d   : > { %4993 = vmatprep.subr.mxu0 %v5229_v47 }
0x116e   : > { %4956 = vmatmul.mubr.msk.f32.gmra.mxu0 %vm1056_vm6, %v3388_v39  ;;  %v6600_v39 = vld [vmem:[%s6751_s14 + $0x1] ss:$0 sm:$0xff] }
0x116f   : > { %4999 = vmatprep.mubr.msk.f32.mxu0 %vm5231_vm4, %v5229_v47  ;;  %4994 = vmatpush3.msra.mxu0 %v4383_v15 }
0x1170   : > { %4995 = vmatprep.subr.mxu0 %v5229_v47 }
0x1171   : > { %4996 = vmatpush3.msra.mxu0 %v4382_v26 }
0x1172   : > { %4997 = vmatprep.subr.mxu0 %v5229_v47 }
0x1173   : > { %4998 = vmatpush3.msra.mxu0 %v4381_v27 }
0x11d6   : > { %v3651_v38 = vpop.xlane.xlu0 %3650 }
0x11d7   : > { %v3658_v0 = vmul.f32 0.015625, %v3651_v38 }
0x11d9   : > { %v3661_v22 = vsub.f32 %v6453_v4, %v3658_v0 }
0x11da   : > { %v3494_v42 = vpop.permute.xlu0 %3493 }
0x11db   : > { %v3664_v17 = vmul.f32 %v3661_v22, %v3661_v22  ;;  %v3525_v46 = vsel %vm960_vm5, %v6391_v6, %v3494_v42 }
0x11dd   : > { %v3667_v59 = vsel %vm771_vm3, %v3664_v17, 0.0 }
0x11de   : > { %3668 = vadd.xlane.f32.xlu1 %v3667_v59  ;;  %v3508_v52 = vpop.permute.xlu0 %3507 }
0x11ef   : > { %3505 = vrot.lane.b32.xlu1 %v6429_v28, %s6792_s0 }
0x1219   : > { %v3479_v28 = vpop.f32.mrf.mxu0 }
0x121a   : > { %3517 = vrot.lane.b32.xlu1 %v3479_v28, %s6791_s28 }
0x121b   : > { %v4954_v63 = vpop.f32.mrf.mxu0 }
0x121e   : > { %3495 = vrot.lane.b32.xlu1 %v6398_v2, %s6789_s4 }
0x122e   : > { %v3484_v24 = vpop.f32.mrf.mxu0 }
0x122f   : > { %3519 = vrot.lane.b32.xlu1 %v3484_v24, %s6791_s28 }
0x1230   : > { %v4957_v5 = vpop.f32.mrf.mxu0 }
0x1267   : > { %v3669_v14 = vpop.xlane.xlu1 %3668 }
0x1268   : > { %v3676_v16 = vmul.f32 0.015625, %v3669_v14 }
0x126a   : > { %v3679_v31 = vadd.f32 1e-06, %v3676_v16 }
0x126b   : > { %v3506_v44 = vpop.permute.xlu1 %3505 }
0x126c   : > { %5207 = vrsqrt.f32 %v3679_v31  ;;  %v3528_v36 = vsel %vm1941_vm8, %v3525_v46, %v3506_v44 }
0x1279   : > { %v5208_v33 = vpop.eup %5207 }
0x127a   : > { %v3685_v35 = vmul.f32 %v5208_v33, %v3661_v22 }
0x127c   : > { %v3694_v2 = vmul.f32 %v6508_v18, %v3685_v35 }
0x127e   : > { %v3703_v32 = vadd.f32 %v6513_v40, %v3694_v2 }
0x1280   : > { %5000 = vmatmul.mubr.msk.f32.vlgmr.msra.gmra.mxu0 %vm771_vm3, %v3703_v32 }
0x1281   : > { %5002 = vmatprep.mubr.msk.f32.mxu0 %vm5231_vm4, %v5229_v47 }
0x128c   : > { %v3518_v48 = vpop.permute.xlu1 %3517 }
0x128d   : > { %v3531_v43 = vsel %vm670_vm0, %v3528_v36, %v3518_v48 }
0x128e   : > { %4978 = vmatmul.mubr.msk.f32.gmra.mxu1 %vm771_vm3, %v3531_v43 }
0x128f   : > { %4980 = vmatprep.mubr.msk.f32.mxu1 %vm5231_vm4, %v5229_v47 }
0x1290   : > { %v3496_v51 = vpop.permute.xlu1 %3495 }
0x1291   : > { %v3526_v49 = vsel %vm960_vm5, %v6393_v9, %v3496_v51  ;;  %v4408_v9 = vld [vmem:[%s6752_s15 + $0xf0] sm:$0xff] }
0x1292   : > { %v3529_v53 = vsel %vm1941_vm8, %v3526_v49, %v3508_v52  ;;  %5011 = vmatpush3.msra.mxu1 %v4408_v9 }
0x1293   : > { %5012 = vmatprep.subr.mxu1 %v5229_v47 }
0x1294   : > { %5013 = vmatpush3.msra.mxu1 %v4407_v60 }
0x1295   : > { %5014 = vmatprep.subr.mxu1 %v5229_v47 }
0x1296   : > { %5015 = vmatpush3.msra.mxu1 %v4406_v34 }
0x1297   : > { %5016 = vmatprep.subr.mxu1 %v5229_v47 }
0x1298   : > { %5017 = vmatpush3.msra.mxu1 %v4405_v41 }
0x1299   : > { %5018 = vmatprep.subr.mxu1 %v5229_v47 }
0x129a   : > { %5019 = vmatpush3.msra.mxu1 %v4404_v45 }
0x129b   : > { %5020 = vmatprep.subr.mxu1 %v5229_v47 }
0x129c   : > { %5021 = vmatpush3.msra.mxu1 %v4403_v50 }
0x129d   : > { %5022 = vmatprep.subr.mxu1 %v5229_v47 }
0x129e   : > { %5023 = vmatpush3.msra.mxu1 %v4402_v23 }
0x129f   : > { %5024 = vmatprep.subr.mxu1 %v5229_v47 }
0x12a0   : > { %5025 = vmatpush3.msra.mxu1 %v4401_v56 }
0x12a1   : > { %v3520_v37 = vpop.permute.xlu1 %3519  ;;  %5026 = vmatprep.subr.mxu1 %v5229_v47 }
0x12a2   : > { %v3532_v6 = vsel %vm670_vm0, %v3529_v53, %v3520_v37  ;;  %5027 = vmatpush3.msra.mxu1 %v4400_v61 }
0x12a3   : > { %4981 = vmatmul.mubr.msk.f32.gmra.mxu1 %vm771_vm3, %v3532_v6  ;;  %5028 = vmatprep.subr.mxu1 %v5229_v47 }
0x12a4   : > { %5040 = vmatprep.mubr.msk.f32.mxu1 %vm5231_vm4, %v5229_v47  ;;  %5029 = vmatpush3.msra.mxu1 %v4399_v1 }
0x12a5   : > { %5030 = vmatprep.subr.mxu1 %v5229_v47 }
0x12a6   : > { %5031 = vmatpush3.msra.mxu1 %v4398_v8 }
0x12a7   : > { %5032 = vmatprep.subr.mxu1 %v5229_v47 }
0x12a8   : > { %5033 = vmatpush3.msra.mxu1 %v4397_v10 }
0x12a9   : > { %5034 = vmatprep.subr.mxu1 %v5229_v47 }
0x12aa   : > { %5035 = vmatpush3.msra.mxu1 %v4396_v3 }
0x12ab   : > { %5036 = vmatprep.subr.mxu1 %v5229_v47 }
0x12ac   : > { %5037 = vmatpush3.msra.mxu1 %v4395_v7 }
0x12ad   : > { %5038 = vmatprep.subr.mxu1 %v5229_v47 }
0x12ae   : > { %5039 = vmatpush3.msra.mxu1 %v4394_v30 }
0x1340   : > { %v3798_v38 = vpop.f32.mrf.mxu0 }
0x1341   : > { %v3799_v0 = vadd.f32 %v6600_v39, %v3798_v38 }
0x1342   : > { %v5001_v22 = vpop.f32.mrf.mxu0 }
0x1343   : > { %v3815_v17 = vmul.f32 0.044715, %v3799_v0  ;;  %v3812_v63 = vmul.f32 0.5, %v3799_v0  ;;  %v3979_v22 = vld [vmem:[%s6756_s19 + $0x90] sm:$0xff] }
0x1345   : > { %v3818_v59 = vmul.f32 %v3815_v17, %v3799_v0  ;;  %v3977_v17 = vld [vmem:[%s6756_s19 + $0x80] sm:$0xff] }
0x1347   : > { %v3821_v12 = vmul.f32 %v3818_v59, %v3799_v0  ;;  %v3976_v59 = vld [vmem:[%s6756_s19 + $0x78] sm:$0xff] }
0x1349   : > { %v3824_v57 = vadd.f32 %v3821_v12, %v3799_v0  ;;  %v3983_v0 = vld [vmem:[%s6756_s19 + $0xb0] sm:$0xff]  ;;  %v3974_v12 = vld [vmem:[%s6756_s19 + $0x68] sm:$0xff] }
0x134a   : > { %4021 = vmatprep.subr.mxu0 %v3983_v0 }
0x134b   : > { %v3827_v13 = vmul.f32 0.7978846, %v3824_v57  ;;  %v3973_v57 = vld [vmem:[%s6756_s19 + $0x60] sm:$0xff] }
0x134d   : > { %5209 = vtanh.f32 %v3827_v13  ;;  %v3971_v13 = vld [vmem:[%s6756_s19 + $0x50] sm:$0xff] }
0x134e   : > { %v3622_v11 = vpop.f32.mrf.mxu1 }
0x134f   : > { %v3632_v58 = vadd.f32 %v3622_v11, %v6041_v62  ;;  %v3970_v11 = vld [vmem:[%s6756_s19 + $0x48] sm:$0xff] }
0x1350   : > { %v4979_v15 = vpop.f32.mrf.mxu1 }
0x1351   : > { %v3643_v26 = vadd.f32 %v6449_v25, %v3632_v58  ;;  %v3968_v58 = vld [vmem:[%s6756_s19 + $0x38] sm:$0xff]  ;;  %v3967_v15 = vld [vmem:[%s6756_s19 + $0x30] sm:$0xff] }
0x1353   : > { %v3652_v27 = vsel %vm771_vm3, %v3643_v26, 0.0 }
0x1354   : > { %3653 = vadd.xlane.f32.xlu0 %v3652_v27  ;;  %v3964_v27 = vld [vmem:[%s6756_s19 + $0x18] sm:$0xff] }
0x135a   : > { %v5210_v28 = vpop.eup %5209 }
0x135b   : > { %v3833_v24 = vadd.f32 1.0, %v5210_v28  ;;  %v3962_v28 = vld [vmem:[%s6756_s19 + $0x8] sm:$0xff] }
0x135d   : > { %v3836_v5 = vmul.f32 %v3833_v24, %v3812_v63  ;;  %v3961_v63 = vld [vmem:[%s6756_s19] sm:$0xff] }
0x135f   : > { %5041 = vmatmul.mubr.f32.vlgmr.msra.gmra.mxu1 %v3836_v5 }
0x1360   : > { %5043 = vmatprep.mubr.msk.f32.mxu1 %vm5231_vm4, %v5229_v47 }
0x1363   : > { %v3627_v14 = vpop.f32.mrf.mxu1 }
0x1364   : > { %v3633_v16 = vadd.f32 %v3627_v14, %v6046_v54 }
0x1365   : > { %v4982_v31 = vpop.f32.mrf.mxu1 }
0x1366   : > { %v3644_v62 = vadd.f32 %v6449_v25, %v3633_v16  ;;  %v4411_v25 = vld [vmem:[%s6753_s16 + $0x1] ss:$0 sm:$0xff] }
0x1368   : > { %v3655_v33 = vsel %vm778_vm2, %v3644_v62, 0.0 }
0x1369   : > { %3656 = vadd.xlane.f32.xlu1 %v3655_v33 }
0x13dd   : > { %v3654_v35 = vpop.xlane.xlu0 %3653 }
0x13de   : > { %v3659_v2 = vmul.f32 0.015625, %v3654_v35 }
0x13e0   : > { %v3662_v32 = vsub.f32 %v3643_v26, %v3659_v2  ;;  %v3965_v26 = vld [vmem:[%s6756_s19 + $0x20] sm:$0xff] }
0x13e2   : > { %v3665_v42 = vmul.f32 %v3662_v32, %v3662_v32 }
0x13e4   : > { %v3670_v44 = vsel %vm771_vm3, %v3665_v42, 0.0 }
0x13e5   : > { %3671 = vadd.xlane.f32.xlu0 %v3670_v44  ;;  %v3944_v44 = vld [vmem:[%s6754_s17] sm:$0x1] }
0x13f2   : > { %v3657_v46 = vpop.xlane.xlu1 %3656 }
0x13f3   : > { %v3660_v36 = vmul.f32 0.015625, %v3657_v46 }
0x13f5   : > { %v3663_v48 = vsub.f32 %v3644_v62, %v3660_v36 }
0x13f7   : > { %v3666_v43 = vmul.f32 %v3663_v48, %v3663_v48 }
0x13f9   : > { %v3673_v51 = vsel %vm778_vm2, %v3666_v43, 0.0 }
0x13fa   : > { %3674 = vadd.xlane.f32.xlu0 %v3673_v51 }
0x141f   : > { %v3922_v54 = vpop.f32.mrf.mxu1 }
0x1420   : > { %v3934_v49 = vadd.f32 %v3922_v54, %v6453_v4  ;;  %v3984_v54 = vld [vmem:[%s6756_s19 + $0xb8] sm:$0xff] }
0x1421   : > { %v5042_v52 = vpop.f32.mrf.mxu1 }
0x1422   : > { %v3943_v37 = vadd.f32 %v4411_v25, %v3934_v49  ;;  %v3981_v25 = vld [vmem:[%s6756_s19 + $0xa0] sm:$0xff]  ;;  %v3978_v49 = vld [vmem:[%s6756_s19 + $0x88] sm:$0xff] }
0x1424   : > { %v3946_v53 = vsel %vm778_vm2, %v3943_v37, 0.0 }
0x1425   : > { %3947 = vadd.xlane.f32.xlu0 %v3946_v53 }
0x146e   : > { %v3672_v6 = vpop.xlane.xlu0 %3671 }
0x146f   : > { %v3677_v55 = vmul.f32 0.015625, %v3672_v6 }
0x1471   : > { %v3680_v9 = vadd.f32 1e-06, %v3677_v55  ;;  %v3972_v55 = vld [vmem:[%s6756_s19 + $0x58] sm:$0xff] }
0x1473   : > { %5211 = vrsqrt.f32 %v3680_v9 }
0x1480   : > { %v5212_v60 = vpop.eup %5211 }
0x1481   : > { %v3686_v34 = vmul.f32 %v5212_v60, %v3662_v32  ;;  %v3969_v60 = vld [vmem:[%s6756_s19 + $0x40] sm:$0xff] }
0x1483   : > { %v3675_v41 = vpop.xlane.xlu0 %3674  ;;  %v3695_v45 = vmul.f32 %v6508_v18, %v3686_v34 }
0x1484   : > { %v3678_v50 = vmul.f32 0.015625, %v3675_v41 }
0x1485   : > { %v3704_v23 = vadd.f32 %v6513_v40, %v3695_v45 }
0x1486   : > { %v3681_v56 = vadd.f32 1e-06, %v3678_v50 }
0x1487   : > { %5003 = vmatmul.mubr.msk.f32.gmra.mxu0 %vm771_vm3, %v3704_v23 }
0x1488   : > { %5213 = vrsqrt.f32 %v3681_v56  ;;  %5005 = vmatprep.mubr.msk.f32.mxu0 %vm5231_vm4, %v5229_v47 }
0x1495   : > { %v5214_v4 = vpop.eup %5213 }
0x1496   : > { %v3687_v61 = vmul.f32 %v5214_v4, %v3663_v48  ;;  %v3945_v48 = vld [vmem:[%s6755_s18] sm:$0x1]  ;;  %v3963_v4 = vld [vmem:[%s6756_s19 + $0x10] sm:$0xff] }
0x1498   : > { %v3696_v1 = vmul.f32 %v6508_v18, %v3687_v61  ;;  %v3982_v18 = vld [vmem:[%s6756_s19 + $0xa8] sm:$0xff] }
0x1499   : > { %4022 = vmatpush1.msra.mxu0 %v3982_v18 }
0x149a   : > { %v3705_v8 = vadd.f32 %v6513_v40, %v3696_v1  ;;  %v3980_v40 = vld [vmem:[%s6756_s19 + $0x98] sm:$0xff] }
0x149b   : > { %4023 = vmatprep.subr.mxu0 %v3980_v40 }
0x149c   : > { %5006 = vmatmul.mubr.msk.f32.gmra.mxu0 %vm771_vm3, %v3705_v8 }
0x149d   : > { %4069 = vmatprep.mubr.f32.mxu0 %v5229_v47  ;;  %4024 = vmatpush1.msra.mxu0 %v3979_v22  ;;  %v5238_v22 = vmov 1966171168  }
0x149e   : > { %4025 = vmatprep.subr.mxu0 %v3977_v17  ;;  %v4154_v17 = vunpack.c.l.s4 %v5238_v22 }
0x149f   : > { %4026 = vmatpush1.msra.mxu0 %v3976_v59  ;;  %v3997_v59 = vsub.s32 2, %v5496_v20 }
0x14a0   : > { %4027 = vmatprep.subr.mxu0 %v3974_v12 }
0x14a1   : > { %4028 = vmatpush1.msra.mxu0 %v3973_v57 }
0x14a2   : > { %4029 = vmatprep.subr.mxu0 %v3971_v13  ;;  %v4155_v13 = vunpack.c.0.s8 %v4154_v17 }
0x14a3   : > { %4030 = vmatpush1.msra.mxu0 %v3970_v11 }
0x14a4   : > { %4031 = vmatprep.subr.mxu0 %v3968_v58 }
0x14a5   : > { %4032 = vmatpush1.msra.mxu0 %v3967_v15 }
0x14a6   : > { %4033 = vmatprep.subr.mxu0 %v3965_v26 }
0x14a7   : > { %4034 = vmatpush1.msra.mxu0 %v3964_v27 }
0x14a8   : > { %4035 = vmatprep.subr.mxu0 %v3962_v28 }
0x14a9   : > { %4036 = vmatpush1.msra.mxu0 %v3961_v63 }
0x14aa   : > { %5049 = vmatprep.subr.mxu0 %v5229_v47 }
0x14ae   : > { %v3948_v10 = vpop.xlane.xlu0 %3947 }
0x14af   : > { %v3949_v3 = vmul.f32 0.015625, %v3948_v10 }
0x14b1   : > { %v3950_v7 = vsub.f32 %v3943_v37, %v3949_v3  ;;  %v3975_v37 = vld [vmem:[%s6756_s19 + $0x70] sm:$0xff] }
0x14b3   : > { %v3951_v30 = vmul.f32 %v3950_v7, %v3950_v7 }
0x14b5   : > { %v3952_v38 = vsel %vm778_vm2, %v3951_v30, 0.0 }
0x14b6   : > { %3953 = vadd.xlane.f32.xlu1 %v3952_v38  ;;  %v3985_v38 = vld [vmem:[%s6757_s20] sm:$0x7] }
0x14b7   : > { %v3994_v0 = vrot.slane %v3985_v38, %v5506_v29  ;;  %v3990_v40 = vrot.slane %v3985_v38, %v5499_v21  ;;  %v3998_v11 = vrot.slane %v3985_v38, %v3997_v59  ;;  %v4158_v29 = vsub.s32 %v4155_v13, %v5496_v20 }
0x153f   : > { %v3954_v24 = vpop.xlane.xlu1 %3953 }
0x1540   : > { %v3955_v5 = vmul.f32 0.015625, %v3954_v24 }
0x1542   : > { %v3956_v14 = vadd.f32 1e-06, %v3955_v5 }
0x1544   : > { %5215 = vrsqrt.f32 %v3956_v14 }
0x1547   : > { %v3803_v16 = vpop.f32.mrf.mxu0 }
0x1548   : > { %v3804_v31 = vadd.f32 %v6600_v39, %v3803_v16 }
0x1549   : > { %v5004_v62 = vpop.f32.mrf.mxu0 }
0x154a   : > { %v3816_v33 = vmul.f32 0.044715, %v3804_v31  ;;  %v3813_v45 = vmul.f32 0.5, %v3804_v31 }
0x154c   : > { %v3819_v35 = vmul.f32 %v3816_v33, %v3804_v31 }
0x154e   : > { %v3822_v2 = vmul.f32 %v3819_v35, %v3804_v31 }
0x1550   : > { %v3825_v32 = vadd.f32 %v3822_v2, %v3804_v31 }
0x1551   : > { %v5216_v42 = vpop.eup %5215 }
0x1552   : > { %v3958_v46 = vmul.f32 %v5216_v42, %v3950_v7  ;;  %v3828_v36 = vmul.f32 0.7978846, %v3825_v32 }
0x1554   : > { %v3959_v43 = vmul.f32 %v3958_v46, %v3944_v44  ;;  %5217 = vtanh.f32 %v3828_v36 }
0x1556   : > { %v3960_v51 = vadd.f32 %v3959_v43, %v3945_v48 }
0x1558   : > { %4412 = vmatmul.mubr.msk.f32.vlgmr.msra.gmra.mxu0 %vm771_vm3, %v3960_v51 }
0x1559   : > { %5050 = vmatpush3.msra.mxu0 %v3984_v54  ;;  %5065 = vmatprep.mubr.msk.f32.mxu0 %vm5231_vm4, %v5229_v47 }
0x155a   : > { %5051 = vmatprep.subr.mxu0 %v5229_v47 }
0x155b   : > { %5052 = vmatpush3.msra.mxu0 %v3981_v25 }
0x155c   : > { %5053 = vmatprep.subr.mxu0 %v5229_v47  ;;  %v3808_v52 = vpop.f32.mrf.mxu0 }
0x155d   : > { %v3809_v53 = vadd.f32 %v6600_v39, %v3808_v52  ;;  %5054 = vmatpush3.msra.mxu0 %v3978_v49  ;;  %v3966_v39 = vld [vmem:[%s6756_s19 + $0x28] sm:$0xff] }
0x155e   : > { %5055 = vmatprep.subr.mxu0 %v5229_v47  ;;  %v5007_v6 = vpop.f32.mrf.mxu0 }
0x155f   : > { %v3817_v9 = vmul.f32 0.044715, %v3809_v53  ;;  %5056 = vmatpush3.msra.mxu0 %v3975_v37  ;;  %v3814_v10 = vmul.f32 0.5, %v3809_v53 }
0x1560   : > { %5057 = vmatprep.subr.mxu0 %v5229_v47 }
0x1561   : > { %v5218_v34 = vpop.eup %5217  ;;  %v3820_v41 = vmul.f32 %v3817_v9, %v3809_v53  ;;  %5058 = vmatpush3.msra.mxu0 %v3972_v55 }
0x1562   : > { %5059 = vmatprep.subr.mxu0 %v5229_v47  ;;  %v3834_v50 = vadd.f32 1.0, %v5218_v34 }
0x1563   : > { %5060 = vmatpush3.msra.mxu0 %v3969_v60  ;;  %v3823_v23 = vmul.f32 %v3820_v41, %v3809_v53 }
0x1564   : > { %5061 = vmatprep.subr.mxu0 %v5229_v47  ;;  %v3837_v56 = vmul.f32 %v3834_v50, %v3813_v45 }
0x1565   : > { %5062 = vmatpush3.msra.mxu0 %v3966_v39  ;;  %v3826_v61 = vadd.f32 %v3823_v23, %v3809_v53 }
0x1566   : > { %5063 = vmatprep.subr.mxu0 %v5229_v47  ;;  %5044 = vmatmul.mubr.f32.gmra.mxu1 %v3837_v56 }
0x1567   : > { %5064 = vmatpush3.msra.mxu0 %v3963_v4  ;;  %5046 = vmatprep.mubr.msk.f32.mxu1 %vm5231_vm4, %v5229_v47  ;;  %v3829_v1 = vmul.f32 0.7978846, %v3826_v61 }
0x1568   : > { %5066 = vmatmul.mubr.msk.f32.vlgmr.msra.gmra.mxu0 %vm771_vm3, %v3960_v51 }
0x1569   : > { %5219 = vtanh.f32 %v3829_v1 }
0x1576   : > { %v5220_v8 = vpop.eup %5219 }
0x1577   : > { %v3835_v3 = vadd.f32 1.0, %v5220_v8 }
0x1579   : > { %v3838_v7 = vmul.f32 %v3835_v3, %v3814_v10 }
0x157b   : > { %5047 = vmatmul.mubr.f32.gmra.mxu1 %v3838_v7 }
0x1618   : > { %v4071_v30 = vpop.f32.mrf.mxu0 }
0x1619   : > { %v4072_v12 = vadd.f32 %v4071_v30, %v3990_v40 }
0x161a   : > { %v4073_v18 = vpop.f32.mrf.mxu0 }
0x161b   : > { %v4074_v47 = vadd.f32 %v4073_v18, %v3994_v0  ;;  %v4146_v15 = vmax.f32 %v4072_v12, 0.0 }
0x161d   : > { %v4147_v57 = vmax.f32 %v4074_v47, 0.0 }
0x161f   : > { %v4152_v28 = vcombine.low %v4146_v15, %v4147_v57 }
0x1621   : > { %v4159_v5 = vrot.slane %v4152_v28, %v4158_v29 }
0x1626   : > { %v3927_v58 = vpop.f32.mrf.mxu1 }
0x1628   : > { %v4142_v26 = vpop.f32.mrf.mxu0  ;;  %v5045_v27 = vpop.f32.mrf.mxu1 }
0x1629   : > { %v4143_v63 = vadd.f32 %v4142_v26, %v3998_v11 }
0x162a   : > { %v5067_v24 = vpop.f32.mrf.mxu0 }
0x162b   : > { %v4148_v21 = vmax.f32 %v4143_v63, 0.0 }
0x162d   : > { %v4166_v14 = vrot.slane %v4148_v21, %v4158_v29 }
0x162f   : > { %v4167_v16 = vcombine.low %v4159_v5, %v4166_v14 }
0x1631   : > { %v4174_v31 = vrot.slane %v4167_v16, %v4158_v29 }
0x1633   : > { %4180 = vst.msk [vmem:[%s654_s27] sm:$0x7] %vm4178_vm9, %v4174_v31 }
0x163b   : > { %v3931_v62 = vpop.f32.mrf.mxu1 }
0x163d   : > { %v5048_v33 = vpop.f32.mrf.mxu1 }
0x163e PF: > { %s31_s2 = sadd.s32 1, %s5227_s2  }
0x163f   : > { %p28_p4 = scmp.ge.s32.totalorder %s31_s2, 4  }
0x1641   :  { %30 = sbr.rel (!%p28_p4) target bundleno = 7 (0x7), region = 146 }

</bundles_post_ra>
